<compile_context>
chip_gen: v5e
topology: v5e:2x2
jax: 0.10.0
libtpu: 0.0.40
codegen_flags: <defaults>
</compile_context>

<pallas_src>
import functools

import jax
import jax.numpy as jnp
from jax import lax
from jax.experimental import pallas as pl
from jax.experimental.pallas import tpu as pltpu

_LANE = 128

# Ordered layout of the packed per-feature vectors (bias / BN gamma / BN beta).
# Every segment size is a multiple of 128 so each in-kernel slice is
# lane-aligned; ("bfc", out_padded) is appended at build time.
_VEC_ORDER = [
    ("b1", 128),
    ("b2", 256), ("g2", 256), ("be2", 256),
    ("b3", 512), ("g3", 512), ("be3", 512),
    ("b4", 1024), ("g4", 1024), ("be4", 1024),
]


def _round_up(n, m):
    return ((n + m - 1) // m) * m


def _vec_layout(out_padded):
    order = list(_VEC_ORDER) + [("bfc", out_padded)]
    offs, off = {}, 0
    for name, n in order:
        offs[name] = (off, n)
        off += n
    return offs, off, order


def _generator_kernel(
    vec_offs,                     # static dict: name -> (offset, size)
    x_ref,                        # (B, in_padded) bf16
    w1_ref, w2_ref, w3_ref,       # bf16 weights, pre-transposed (in, out), VMEM
    w4_hbm_ref, wfc_hbm_ref,      # bf16 weights left in HBM (manual prefetch)
    vec_ref,                      # (1, total_vec) f32 packed bias/gamma/beta
    out_ref,                      # (B, out_padded) f32
    w4_buf, wfc_buf, dma_sems,    # scratch: VMEM dst buffers + DMA semaphores
):
    """Whole MLP forward in one kernel invocation."""
    # Kick off the two largest weight transfers; blocks 1-3 run under them.
    cp_w4 = pltpu.make_async_copy(w4_hbm_ref, w4_buf, dma_sems.at[0])
    cp_wfc = pltpu.make_async_copy(wfc_hbm_ref, wfc_buf, dma_sems.at[1])
    cp_w4.start()
    cp_wfc.start()

    def vec(name):
        off, n = vec_offs[name]
        return vec_ref[:, off:off + n]          # static, lane-aligned slice

    def linear(x, w, b):
        # bf16 MXU inputs, f32 accumulation.
        return jnp.dot(x.astype(jnp.bfloat16), w,
                       preferred_element_type=jnp.float32) + b

    def leaky_relu(x):
        return jnp.maximum(x, 0.2 * x)

    def batch_norm(x, gamma, beta, eps=0.8):
        # Train-mode BN over the whole (single-block) batch, biased variance,
        # folded into one scale/shift per feature: y = x*scale + shift.
        mu = jnp.mean(x, axis=0, keepdims=True)
        var = jnp.mean(x * x, axis=0, keepdims=True) - mu * mu
        scale = gamma * lax.rsqrt(var + eps)
        shift = beta - mu * scale
        return x * scale + shift

    x = x_ref[...]                                                   # bf16
    h = leaky_relu(linear(x, w1_ref[...], vec("b1")))                          # block1
    h = leaky_relu(batch_norm(linear(h, w2_ref[...], vec("b2")),
                              vec("g2"), vec("be2")))                          # block2
    h = leaky_relu(batch_norm(linear(h, w3_ref[...], vec("b3")),
                              vec("g3"), vec("be3")))                          # block3
    cp_w4.wait()
    h = leaky_relu(batch_norm(linear(h, w4_buf[...], vec("b4")),
                              vec("g4"), vec("be4")))                          # block4
    cp_wfc.wait()
    out_ref[...] = jnp.tanh(linear(h, wfc_buf[...], vec("bfc")))               # fc+tanh


@functools.partial(jax.jit, static_argnames=("out_shape_4d",))
def generator_forward(x, params, out_shape_4d):
    """x: (B, kT, kW, kH) float32 -> (B, out_kT, out_kW, out_kH) float32."""
    B = x.shape[0]
    x2d = x.reshape(B, -1)                       # x.view(x.shape[0], -1)
    in_features = x2d.shape[1]

    in_padded = params["w1"].shape[0]            # lane-dense (multiple of 128)
    if in_features < in_padded:
        x2d = jnp.pad(x2d, ((0, 0), (0, in_padded - in_features)))
    x2d = x2d.astype(jnp.bfloat16)               # MXU input dtype, done once

    out_features = out_shape_4d[0] * out_shape_4d[1] * out_shape_4d[2]
    out_padded = params["wfc"].shape[1]          # lane-dense (multiple of 128)

    vec_offs, vec_total, _ = _vec_layout(out_padded)
    kernel = functools.partial(_generator_kernel, vec_offs)

    # Advisory cost hint so XLA schedules this us-scale call sensibly.
    flops = 2 * B * (in_padded * 128 + 128 * 256 + 256 * 512
                     + 512 * 1024 + 1024 * out_padded)
    transcendentals = B * out_padded + (256 + 512 + 1024)   # tanh + rsqrt
    weight_bytes = 2 * (in_padded * 128 + 128 * 256 + 256 * 512
                        + 512 * 1024 + 1024 * out_padded)   # bf16
    bytes_accessed = (weight_bytes + 4 * vec_total
                      + 2 * B * in_padded + 4 * B * out_padded)

    vmem = pl.BlockSpec(memory_space=pltpu.MemorySpace.VMEM)
    hbm = pl.BlockSpec(memory_space=pl.ANY)

    out2d = pl.pallas_call(
        kernel,
        out_shape=jax.ShapeDtypeStruct((B, out_padded), jnp.float32),
        in_specs=[vmem, vmem, vmem, vmem, hbm, hbm, vmem],
        out_specs=vmem,
        scratch_shapes=[
            pltpu.VMEM((512, 1024), jnp.bfloat16),        # w4 landing buffer
            pltpu.VMEM((1024, out_padded), jnp.bfloat16),  # wfc landing buffer
            pltpu.SemaphoreType.DMA((2,)),
        ],
        cost_estimate=pl.CostEstimate(
            flops=flops,
            transcendentals=transcendentals,
            bytes_accessed=bytes_accessed),
    )(x2d, params["w1"], params["w2"], params["w3"],
      params["w4"], params["wfc"], params["vec"])

    if out_padded > out_features:
        out2d = out2d[:, :out_features]
    return out2d.reshape((B,) + out_shape_4d)


def init_params(key, in_features, out_features):
    """Deterministic synthetic parameters (shapes match the PyTorch module).

    Linear weights are stored pre-transposed as (in, out) in bfloat16 with
    input/output feature dims zero-padded to multiples of 128 (padding never
    changes the result; the wrapper slices the output back). All per-feature
    vectors (bias, BN gamma/beta) are packed into a single lane-dense
    (1, total) float32 slab `params["vec"]` laid out by `_vec_layout`.
    """
    in_padded = _round_up(in_features, _LANE)
    out_padded = _round_up(out_features, _LANE)

    dims = [(in_features, 128), (128, 256), (256, 512), (512, 1024),
            (1024, out_features)]
    pad_in = [in_padded, 128, 256, 512, 1024]
    pad_out = [128, 256, 512, 1024, out_padded]
    names = ["w1", "w2", "w3", "w4", "wfc"]

    params = {}
    biases = {}
    keys = jax.random.split(key, 5)
    for (din, dout), din_p, dout_p, name, k in zip(dims, pad_in, pad_out,
                                                   names, keys):
        kw, kb = jax.random.split(k)
        scale = 1.0 / jnp.sqrt(jnp.float32(din))
        w = jax.random.uniform(kw, (din, dout), jnp.float32, -scale, scale)
        b = jax.random.uniform(kb, (1, dout), jnp.float32, -scale, scale)
        w = jnp.pad(w, ((0, din_p - din), (0, dout_p - dout)))
        b = jnp.pad(b, ((0, 0), (0, dout_p - dout)))
        params[name] = w.astype(jnp.bfloat16)
        biases[name] = b

    pieces = {
        "b1": biases["w1"],
        "b2": biases["w2"],
        "g2": jnp.ones((1, 256), jnp.float32),
        "be2": jnp.zeros((1, 256), jnp.float32),
        "b3": biases["w3"],
        "g3": jnp.ones((1, 512), jnp.float32),
        "be3": jnp.zeros((1, 512), jnp.float32),
        "b4": biases["w4"],
        "g4": jnp.ones((1, 1024), jnp.float32),
        "be4": jnp.zeros((1, 1024), jnp.float32),
        "bfc": biases["wfc"],
    }
    _, _, order = _vec_layout(out_padded)
    params["vec"] = jnp.concatenate([pieces[name] for name, _ in order],
                                    axis=1)
    return params


if __name__ == "__main__":
    # Small, consistent shapes:
    #   data_cfg.kernel:      kT=2, kW=8, kH=8 -> elements = 128 (input)
    #   data_cfg.out_kernel:  kT=2, kW=8, kH=8 -> elements = 128 (output)
    B = 2
    in_kT, in_kW, in_kH = 2, 8, 8
    out_kT, out_kW, out_kH = 2, 8, 8
    in_elements = in_kT * in_kW * in_kH
    out_elements = out_kT * out_kW * out_kH

    key = jax.random.PRNGKey(0)
    k_x, k_p = jax.random.split(key)
    x = jax.random.normal(k_x, (B, in_kT, in_kW, in_kH), jnp.float32)
    params = init_params(k_p, in_elements, out_elements)

    y = generator_forward(x, params, (out_kT, out_kW, out_kH))
    y = jax.block_until_ready(y)

    assert y.shape == (B, out_kT, out_kW, out_kH), y.shape
    assert bool(jnp.all(jnp.isfinite(y)))
    assert bool(jnp.all(jnp.abs(y) <= 1.0))  # tanh output range
    print("KERNEL_OK")
</pallas_src>

<mosaic_0001>
module attributes {stable_mosaic.version = 11 : i64} {
  func.func @_generator_kernel(%arg0: memref<2x128xbf16, #tpu.memory_space<vmem>>, %arg1: memref<128x128xbf16, #tpu.memory_space<vmem>>, %arg2: memref<128x256xbf16, #tpu.memory_space<vmem>>, %arg3: memref<256x512xbf16, #tpu.memory_space<vmem>>, %arg4: memref<512x1024xbf16, #tpu.memory_space<any>>, %arg5: memref<1024x128xbf16, #tpu.memory_space<any>>, %arg6: memref<1x5632xf32, #tpu.memory_space<vmem>>, %arg7: memref<2x128xf32, #tpu.memory_space<vmem>>, %arg8: memref<512x1024xbf16, #tpu.memory_space<vmem>>, %arg9: memref<1024x128xbf16, #tpu.memory_space<vmem>>, %arg10: memref<2x!tpu.dma_semaphore, #tpu.memory_space<semaphore_mem>>) attributes {dimension_semantics = [], scalar_prefetch = 0 : i64, scratch_operands = 3 : i64, tpu.core_type = #tpu.core_type<tc>} {
    %c0_i32 = arith.constant 0 : i32
    %0 = tpu.memref_slice %arg10[%c0_i32] : memref<2x!tpu.dma_semaphore, #tpu.memory_space<semaphore_mem>> -> memref<1x!tpu.dma_semaphore, #tpu.memory_space<semaphore_mem>>
    %1 = tpu.memref_squeeze %0 : memref<1x!tpu.dma_semaphore, #tpu.memory_space<semaphore_mem>> -> memref<!tpu.dma_semaphore, #tpu.memory_space<semaphore_mem>>
    tpu.enqueue_dma source(%arg4 : memref<512x1024xbf16, #tpu.memory_space<any>>) target(%arg8 : memref<512x1024xbf16, #tpu.memory_space<vmem>>) target_semaphore(%1 : memref<!tpu.dma_semaphore, #tpu.memory_space<semaphore_mem>>)
    %c1_i32 = arith.constant 1 : i32
    %2 = tpu.memref_slice %arg10[%c1_i32] : memref<2x!tpu.dma_semaphore, #tpu.memory_space<semaphore_mem>> -> memref<1x!tpu.dma_semaphore, #tpu.memory_space<semaphore_mem>>
    %3 = tpu.memref_squeeze %2 : memref<1x!tpu.dma_semaphore, #tpu.memory_space<semaphore_mem>> -> memref<!tpu.dma_semaphore, #tpu.memory_space<semaphore_mem>>
    tpu.enqueue_dma source(%arg5 : memref<1024x128xbf16, #tpu.memory_space<any>>) target(%arg9 : memref<1024x128xbf16, #tpu.memory_space<vmem>>) target_semaphore(%3 : memref<!tpu.dma_semaphore, #tpu.memory_space<semaphore_mem>>)
    %c0 = arith.constant 0 : index
    %c0_0 = arith.constant 0 : index
    %4 = vector.load %arg0[%c0, %c0_0] : memref<2x128xbf16, #tpu.memory_space<vmem>>, vector<2x128xbf16>
    %c0_1 = arith.constant 0 : index
    %c0_2 = arith.constant 0 : index
    %5 = vector.load %arg1[%c0_1, %c0_2] : memref<128x128xbf16, #tpu.memory_space<vmem>>, vector<128x128xbf16>
    %c0_3 = arith.constant 0 : index
    %c0_4 = arith.constant 0 : index
    %6 = vector.load %arg6[%c0_3, %c0_4] : memref<1x5632xf32, #tpu.memory_space<vmem>>, vector<1x128xf32>
    %cst = arith.constant dense<0.000000e+00> : vector<2x128xf32>
    %7 = tpu.matmul %4, %5, %cst {dimension_numbers = #tpu.dot_dimension_numbers<[1], [0], [0], [1], [0, 0, 1, 1], [], []>} : vector<2x128xbf16>, vector<128x128xbf16>, vector<2x128xf32> -> vector<2x128xf32>
    %8 = vector.broadcast %6 : vector<1x128xf32> to vector<2x128xf32>
    %9 = arith.addf %7, %8 : vector<2x128xf32>
    %cst_5 = arith.constant 2.000000e-01 : f32
    %10 = vector.broadcast %cst_5 : f32 to vector<2x128xf32>
    %11 = arith.mulf %10, %9 : vector<2x128xf32>
    %12 = arith.maximumf %9, %11 : vector<2x128xf32>
    %c0_6 = arith.constant 0 : index
    %c0_7 = arith.constant 0 : index
    %13 = vector.load %arg2[%c0_6, %c0_7] : memref<128x256xbf16, #tpu.memory_space<vmem>>, vector<128x256xbf16>
    %c0_8 = arith.constant 0 : index
    %c128 = arith.constant 128 : index
    %14 = vector.load %arg6[%c0_8, %c128] : memref<1x5632xf32, #tpu.memory_space<vmem>>, vector<1x256xf32>
    %15 = arith.truncf %12 : vector<2x128xf32> to vector<2x128xbf16>
    %cst_9 = arith.constant dense<0.000000e+00> : vector<2x256xf32>
    %16 = tpu.matmul %15, %13, %cst_9 {dimension_numbers = #tpu.dot_dimension_numbers<[1], [0], [0], [1], [0, 0, 1, 1], [], []>} : vector<2x128xbf16>, vector<128x256xbf16>, vector<2x256xf32> -> vector<2x256xf32>
    %17 = vector.broadcast %14 : vector<1x256xf32> to vector<2x256xf32>
    %18 = arith.addf %16, %17 : vector<2x256xf32>
    %c0_10 = arith.constant 0 : index
    %c384 = arith.constant 384 : index
    %19 = vector.load %arg6[%c0_10, %c384] : memref<1x5632xf32, #tpu.memory_space<vmem>>, vector<1x256xf32>
    %c0_11 = arith.constant 0 : index
    %c640 = arith.constant 640 : index
    %20 = vector.load %arg6[%c0_11, %c640] : memref<1x5632xf32, #tpu.memory_space<vmem>>, vector<1x256xf32>
    %cst_12 = arith.constant dense<0.000000e+00> : vector<256xf32>
    %21 = vector.multi_reduction <add>, %18, %cst_12 [0] : vector<2x256xf32> to vector<256xf32>
    %22 = vector.shape_cast %21 : vector<256xf32> to vector<1x256xf32>
    %cst_13 = arith.constant 2.000000e+00 : f32
    %23 = vector.broadcast %cst_13 : f32 to vector<1x256xf32>
    %24 = arith.divf %22, %23 : vector<1x256xf32>
    %25 = arith.mulf %18, %18 : vector<2x256xf32>
    %cst_14 = arith.constant dense<0.000000e+00> : vector<256xf32>
    %26 = vector.multi_reduction <add>, %25, %cst_14 [0] : vector<2x256xf32> to vector<256xf32>
    %27 = vector.shape_cast %26 : vector<256xf32> to vector<1x256xf32>
    %cst_15 = arith.constant 2.000000e+00 : f32
    %28 = vector.broadcast %cst_15 : f32 to vector<1x256xf32>
    %29 = arith.divf %27, %28 : vector<1x256xf32>
    %30 = arith.mulf %24, %24 : vector<1x256xf32>
    %31 = arith.subf %29, %30 : vector<1x256xf32>
    %cst_16 = arith.constant 8.000000e-01 : f32
    %32 = vector.broadcast %cst_16 : f32 to vector<1x256xf32>
    %33 = arith.addf %31, %32 : vector<1x256xf32>
    %34 = math.rsqrt %33 : vector<1x256xf32>
    %35 = arith.mulf %19, %34 : vector<1x256xf32>
    %36 = arith.mulf %24, %35 : vector<1x256xf32>
    %37 = arith.subf %20, %36 : vector<1x256xf32>
    %38 = vector.broadcast %35 : vector<1x256xf32> to vector<2x256xf32>
    %39 = arith.mulf %18, %38 : vector<2x256xf32>
    %40 = vector.broadcast %37 : vector<1x256xf32> to vector<2x256xf32>
    %41 = arith.addf %39, %40 : vector<2x256xf32>
    %cst_17 = arith.constant 2.000000e-01 : f32
    %42 = vector.broadcast %cst_17 : f32 to vector<2x256xf32>
    %43 = arith.mulf %42, %41 : vector<2x256xf32>
    %44 = arith.maximumf %41, %43 : vector<2x256xf32>
    %c0_18 = arith.constant 0 : index
    %c0_19 = arith.constant 0 : index
    %45 = vector.load %arg3[%c0_18, %c0_19] : memref<256x512xbf16, #tpu.memory_space<vmem>>, vector<256x512xbf16>
    %c0_20 = arith.constant 0 : index
    %c896 = arith.constant 896 : index
    %46 = vector.load %arg6[%c0_20, %c896] : memref<1x5632xf32, #tpu.memory_space<vmem>>, vector<1x512xf32>
    %47 = arith.truncf %44 : vector<2x256xf32> to vector<2x256xbf16>
    %cst_21 = arith.constant dense<0.000000e+00> : vector<2x512xf32>
    %48 = tpu.matmul %47, %45, %cst_21 {dimension_numbers = #tpu.dot_dimension_numbers<[1], [0], [0], [1], [0, 0, 1, 1], [], []>} : vector<2x256xbf16>, vector<256x512xbf16>, vector<2x512xf32> -> vector<2x512xf32>
    %49 = vector.broadcast %46 : vector<1x512xf32> to vector<2x512xf32>
    %50 = arith.addf %48, %49 : vector<2x512xf32>
    %c0_22 = arith.constant 0 : index
    %c1408 = arith.constant 1408 : index
    %51 = vector.load %arg6[%c0_22, %c1408] : memref<1x5632xf32, #tpu.memory_space<vmem>>, vector<1x512xf32>
    %c0_23 = arith.constant 0 : index
    %c1920 = arith.constant 1920 : index
    %52 = vector.load %arg6[%c0_23, %c1920] : memref<1x5632xf32, #tpu.memory_space<vmem>>, vector<1x512xf32>
    %cst_24 = arith.constant dense<0.000000e+00> : vector<512xf32>
    %53 = vector.multi_reduction <add>, %50, %cst_24 [0] : vector<2x512xf32> to vector<512xf32>
    %54 = vector.shape_cast %53 : vector<512xf32> to vector<1x512xf32>
    %cst_25 = arith.constant 2.000000e+00 : f32
    %55 = vector.broadcast %cst_25 : f32 to vector<1x512xf32>
    %56 = arith.divf %54, %55 : vector<1x512xf32>
    %57 = arith.mulf %50, %50 : vector<2x512xf32>
    %cst_26 = arith.constant dense<0.000000e+00> : vector<512xf32>
    %58 = vector.multi_reduction <add>, %57, %cst_26 [0] : vector<2x512xf32> to vector<512xf32>
    %59 = vector.shape_cast %58 : vector<512xf32> to vector<1x512xf32>
    %cst_27 = arith.constant 2.000000e+00 : f32
    %60 = vector.broadcast %cst_27 : f32 to vector<1x512xf32>
    %61 = arith.divf %59, %60 : vector<1x512xf32>
    %62 = arith.mulf %56, %56 : vector<1x512xf32>
    %63 = arith.subf %61, %62 : vector<1x512xf32>
    %cst_28 = arith.constant 8.000000e-01 : f32
    %64 = vector.broadcast %cst_28 : f32 to vector<1x512xf32>
    %65 = arith.addf %63, %64 : vector<1x512xf32>
    %66 = math.rsqrt %65 : vector<1x512xf32>
    %67 = arith.mulf %51, %66 : vector<1x512xf32>
    %68 = arith.mulf %56, %67 : vector<1x512xf32>
    %69 = arith.subf %52, %68 : vector<1x512xf32>
    %70 = vector.broadcast %67 : vector<1x512xf32> to vector<2x512xf32>
    %71 = arith.mulf %50, %70 : vector<2x512xf32>
    %72 = vector.broadcast %69 : vector<1x512xf32> to vector<2x512xf32>
    %73 = arith.addf %71, %72 : vector<2x512xf32>
    %cst_29 = arith.constant 2.000000e-01 : f32
    %74 = vector.broadcast %cst_29 : f32 to vector<2x512xf32>
    %75 = arith.mulf %74, %73 : vector<2x512xf32>
    %76 = arith.maximumf %73, %75 : vector<2x512xf32>
    %c0_i32_30 = arith.constant 0 : i32
    %77 = tpu.memref_slice %arg10[%c0_i32_30] : memref<2x!tpu.dma_semaphore, #tpu.memory_space<semaphore_mem>> -> memref<1x!tpu.dma_semaphore, #tpu.memory_space<semaphore_mem>>
    %78 = tpu.memref_squeeze %77 : memref<1x!tpu.dma_semaphore, #tpu.memory_space<semaphore_mem>> -> memref<!tpu.dma_semaphore, #tpu.memory_space<semaphore_mem>>
    tpu.wait_dma2 semaphore(%78 : memref<!tpu.dma_semaphore, #tpu.memory_space<semaphore_mem>>) src(%arg4 : memref<512x1024xbf16, #tpu.memory_space<any>>) dst(%arg8 : memref<512x1024xbf16, #tpu.memory_space<vmem>>)
    %c0_31 = arith.constant 0 : index
    %c0_32 = arith.constant 0 : index
    %79 = vector.load %arg8[%c0_31, %c0_32] : memref<512x1024xbf16, #tpu.memory_space<vmem>>, vector<512x1024xbf16>
    %c0_33 = arith.constant 0 : index
    %c2432 = arith.constant 2432 : index
    %80 = vector.load %arg6[%c0_33, %c2432] : memref<1x5632xf32, #tpu.memory_space<vmem>>, vector<1x1024xf32>
    %81 = arith.truncf %76 : vector<2x512xf32> to vector<2x512xbf16>
    %cst_34 = arith.constant dense<0.000000e+00> : vector<2x1024xf32>
    %82 = tpu.matmul %81, %79, %cst_34 {dimension_numbers = #tpu.dot_dimension_numbers<[1], [0], [0], [1], [0, 0, 1, 1], [], []>} : vector<2x512xbf16>, vector<512x1024xbf16>, vector<2x1024xf32> -> vector<2x1024xf32>
    %83 = vector.broadcast %80 : vector<1x1024xf32> to vector<2x1024xf32>
    %84 = arith.addf %82, %83 : vector<2x1024xf32>
    %c0_35 = arith.constant 0 : index
    %c3456 = arith.constant 3456 : index
    %85 = vector.load %arg6[%c0_35, %c3456] : memref<1x5632xf32, #tpu.memory_space<vmem>>, vector<1x1024xf32>
    %c0_36 = arith.constant 0 : index
    %c4480 = arith.constant 4480 : index
    %86 = vector.load %arg6[%c0_36, %c4480] : memref<1x5632xf32, #tpu.memory_space<vmem>>, vector<1x1024xf32>
    %cst_37 = arith.constant dense<0.000000e+00> : vector<1024xf32>
    %87 = vector.multi_reduction <add>, %84, %cst_37 [0] : vector<2x1024xf32> to vector<1024xf32>
    %88 = vector.shape_cast %87 : vector<1024xf32> to vector<1x1024xf32>
    %cst_38 = arith.constant 2.000000e+00 : f32
    %89 = vector.broadcast %cst_38 : f32 to vector<1x1024xf32>
    %90 = arith.divf %88, %89 : vector<1x1024xf32>
    %91 = arith.mulf %84, %84 : vector<2x1024xf32>
    %cst_39 = arith.constant dense<0.000000e+00> : vector<1024xf32>
    %92 = vector.multi_reduction <add>, %91, %cst_39 [0] : vector<2x1024xf32> to vector<1024xf32>
    %93 = vector.shape_cast %92 : vector<1024xf32> to vector<1x1024xf32>
    %cst_40 = arith.constant 2.000000e+00 : f32
    %94 = vector.broadcast %cst_40 : f32 to vector<1x1024xf32>
    %95 = arith.divf %93, %94 : vector<1x1024xf32>
    %96 = arith.mulf %90, %90 : vector<1x1024xf32>
    %97 = arith.subf %95, %96 : vector<1x1024xf32>
    %cst_41 = arith.constant 8.000000e-01 : f32
    %98 = vector.broadcast %cst_41 : f32 to vector<1x1024xf32>
    %99 = arith.addf %97, %98 : vector<1x1024xf32>
    %100 = math.rsqrt %99 : vector<1x1024xf32>
    %101 = arith.mulf %85, %100 : vector<1x1024xf32>
    %102 = arith.mulf %90, %101 : vector<1x1024xf32>
    %103 = arith.subf %86, %102 : vector<1x1024xf32>
    %104 = vector.broadcast %101 : vector<1x1024xf32> to vector<2x1024xf32>
    %105 = arith.mulf %84, %104 : vector<2x1024xf32>
    %106 = vector.broadcast %103 : vector<1x1024xf32> to vector<2x1024xf32>
    %107 = arith.addf %105, %106 : vector<2x1024xf32>
    %cst_42 = arith.constant 2.000000e-01 : f32
    %108 = vector.broadcast %cst_42 : f32 to vector<2x1024xf32>
    %109 = arith.mulf %108, %107 : vector<2x1024xf32>
    %110 = arith.maximumf %107, %109 : vector<2x1024xf32>
    %c1_i32_43 = arith.constant 1 : i32
    %111 = tpu.memref_slice %arg10[%c1_i32_43] : memref<2x!tpu.dma_semaphore, #tpu.memory_space<semaphore_mem>> -> memref<1x!tpu.dma_semaphore, #tpu.memory_space<semaphore_mem>>
    %112 = tpu.memref_squeeze %111 : memref<1x!tpu.dma_semaphore, #tpu.memory_space<semaphore_mem>> -> memref<!tpu.dma_semaphore, #tpu.memory_space<semaphore_mem>>
    tpu.wait_dma2 semaphore(%112 : memref<!tpu.dma_semaphore, #tpu.memory_space<semaphore_mem>>) src(%arg5 : memref<1024x128xbf16, #tpu.memory_space<any>>) dst(%arg9 : memref<1024x128xbf16, #tpu.memory_space<vmem>>)
    %c0_44 = arith.constant 0 : index
    %c0_45 = arith.constant 0 : index
    %113 = vector.load %arg9[%c0_44, %c0_45] : memref<1024x128xbf16, #tpu.memory_space<vmem>>, vector<1024x128xbf16>
    %c0_46 = arith.constant 0 : index
    %c5504 = arith.constant 5504 : index
    %114 = vector.load %arg6[%c0_46, %c5504] : memref<1x5632xf32, #tpu.memory_space<vmem>>, vector<1x128xf32>
    %115 = arith.truncf %110 : vector<2x1024xf32> to vector<2x1024xbf16>
    %cst_47 = arith.constant dense<0.000000e+00> : vector<2x128xf32>
    %116 = tpu.matmul %115, %113, %cst_47 {dimension_numbers = #tpu.dot_dimension_numbers<[1], [0], [0], [1], [0, 0, 1, 1], [], []>} : vector<2x1024xbf16>, vector<1024x128xbf16>, vector<2x128xf32> -> vector<2x128xf32>
    %117 = vector.broadcast %114 : vector<1x128xf32> to vector<2x128xf32>
    %118 = arith.addf %116, %117 : vector<2x128xf32>
    %119 = math.tanh %118 : vector<2x128xf32>
    %c0_48 = arith.constant 0 : index
    %c0_49 = arith.constant 0 : index
    %120 = vector.load %arg7[%c0_48, %c0_49] : memref<2x128xf32, #tpu.memory_space<vmem>>, vector<2x128xf32>
    tpu.vector_store %arg7[%c0_48, %c0_49], %119 {strides = array<i32>} : memref<2x128xf32, #tpu.memory_space<vmem>>, vector<2x128xf32>,
    return
  }
}

</mosaic_0001>

<bundles_post_ra>
// kernel: generator_forward.1
= control target key start
LH: loop header
LB: loop body
LE: loop exit
PB: predicated region body
PF: predicated region fallthrough
CT: control target
= control target key end

     0   :  { %12 = vsyncpa [#allocation6], 0  ;;  %s6823_s0 = inlined_call_operand.vmem [shape: bf16[2,128], index: 0, kind: input, shape index: {}]   ;;  %s6824_s1 = inlined_call_operand.vmem [shape: bf16[128,128], index: 1, kind: input, shape index: {}]   ;;  %s6825_s2 = inlined_call_operand.hbm [shape: bf16[128,256], index: 2, kind: input, shape index: {}]   ;;  %s6826_s3 = inlined_call_operand.hbm [shape: bf16[256,512], index: 3, kind: input, shape index: {}]   ;;  %s6827_s4 = inlined_call_operand.hbm [shape: bf16[512,1024], index: 4, kind: input, shape index: {}]   ;;  %s6828_s5 = inlined_call_operand.hbm [shape: bf16[1024,128], index: 5, kind: input, shape index: {}]   ;;  %s6829_s6 = inlined_call_operand.hbm [shape: f32[1,5632], index: 6, kind: input, shape index: {}]   ;;  %s6830_s7 = inlined_call_operand.vmem [shape: f32[2,128], index: 7, kind: output, shape index: {}]  }
   0x1   :  { %13 = vsyncpa [#allocation8], 0  ;;  %s35_s26 = sshll.u32 %s6826_s3, 4  ;;  %s6309_s27 = smov [#allocation7]   ;;  %s36_s26 = int_to_ptr.hbm [resolvable:$true] %s35_s26 }
   0x2   :  { %s37_s28 = sshll.u32 %s6309_s27, 4  ;;  %s22_s8 = sshll.u32 %s6825_s2, 4  ;;  %s38_s28 = int_to_ptr.vmem [resolvable:$true] %s37_s28  ;;  %s23_s8 = int_to_ptr.hbm [resolvable:$true] %s22_s8 }
   0x3   :  { %s6310_s9 = smov 256   ;;  %s6311_s10 = smov 16  }
   0x4   :  { %43 = dma.hbm_to_vmem [thread:$0]  %s36_s26, 8192, %s38_s28, [#allocation8], %s6310_s9, %s6310_s9, %s6311_s10  }
   0x5   :  { %s6312_s11 = smov [#allocation5]   ;;  %s6313_s13 = smov 128  }
   0x6   :  { %s24_s12 = sshll.u32 %s6312_s11, 4  ;;  %s6314_s14 = smov 8   ;;  %s25_s12 = int_to_ptr.vmem [resolvable:$true] %s24_s12 }
   0x7   :  { %30 = dma.hbm_to_vmem [thread:$0]  %s23_s8, 2048, %s25_s12, [#allocation6], %s6313_s13, %s6313_s13, %s6314_s14  }
   0x8   :  { %s49_s16 = sshll.u32 %s6829_s6, 4  ;;  %s6315_s17 = smov [#allocation9]   ;;  %s50_s16 = int_to_ptr.hbm [resolvable:$true] %s49_s16 }
   0x9   :  { %s51_s18 = sshll.u32 %s6315_s17, 4  ;;  %s52_s18 = int_to_ptr.vmem [resolvable:$true] %s51_s18 }
   0xa   :  { %54 = dma.hbm_to_vmem [thread:$0]  %s50_s16, 704, %s52_s18, [#allocation8]  }
   0xb   :  { %6301 = dma.done.wait [#allocation6], 2048  }
   0xc   :  { %6302 = vsyncadd [#allocation6], 4294965248 }
   0xd   :  { %6303 = dma.done.wait [#allocation8], 8896  }
   0xe   :  { %6304 = vsyncadd [#allocation8], 4294958400  ;;  %v5735_v0 = vld [vmem:[%s6824_s1 + $0x38] sm:$0xff]  ;;  %v5734_v1 = vld [vmem:[%s6824_s1 + $0x30] sm:$0xff]  ;;  %vm309_vm0 = vcmask 1041408   ;;  %vm380_vm7 = vcmask 1040384  }
   0xf   :  { %163 = vmatpush.bf16.msra.mxu0 %v5735_v0  ;;  %v4184_v2 = vld [vmem:[#allocation5 + $0x70] sm:$0xf]  ;;  %v5751_v3 = vld [vmem:[#allocation5 + $0x74] sm:$0xf0]  ;;  %v5750_v4 = vld [vmem:[#allocation5 + $0x74] sm:$0xf] }
  0x10   :  { %v4185_v5 = vor.u32 %v5751_v3, %v4184_v2  ;;  %v4186_v6 = vld [vmem:[#allocation5 + $0x78] sm:$0xf0]  ;;  %v4176_v7 = vld [vmem:[#allocation5 + $0x60] sm:$0xf]  ;;  %v5749_v8 = vld [vmem:[#allocation5 + $0x64] sm:$0xf0] }
  0x11   :  { %v4189_v9 = vor.u32 %v5750_v4, %v4186_v6  ;;  %v5748_v10 = vld [vmem:[#allocation5 + $0x64] sm:$0xf]  ;;  %v4178_v11 = vld [vmem:[#allocation5 + $0x68] sm:$0xf0]  ;;  %v4177_v13 = vor.u32 %v5749_v8, %v4176_v7  ;;  %v4168_v15 = vld [vmem:[#allocation5 + $0x50] sm:$0xf] }
  0x12   :  { %v5733_v12 = vld [vmem:[%s6824_s1 + $0x28] sm:$0xff]  ;;  %281 = vmatpush.bf16.msra.mxu1 %v4185_v5  ;;  %v4181_v14 = vor.u32 %v5748_v10, %v4178_v11  ;;  %v5747_v16 = vld [vmem:[#allocation5 + $0x54] sm:$0xf0]  ;;  %v5746_v17 = vld [vmem:[#allocation5 + $0x54] sm:$0xf]  ;;  %v6316_v0 = vmov 2.0  }
  0x13   :  { %164 = vmatpush.bf16.msra.mxu0 %v5734_v1  ;;  %294 = vmatpush.bf16.msra.mxu2 %v4189_v9  ;;  %v4170_v18 = vld [vmem:[#allocation5 + $0x58] sm:$0xf0]  ;;  %v5732_v19 = vld [vmem:[%s6824_s1 + $0x20] sm:$0xff]  ;;  %v4169_v20 = vor.u32 %v5747_v16, %v4168_v15  ;;  %v5745_v23 = vld [vmem:[#allocation5 + $0x44] sm:$0xf0]  ;;  %6147 = vrcp.f32 %v6316_v0  ;;  %s74_s12 = sshll.u32 %s6827_s4, 4  ;;  %s75_s12 = int_to_ptr.hbm [resolvable:$true] %s74_s12 }
  0x14   :  { %v4173_v21 = vor.u32 %v5746_v17, %v4170_v18  ;;  %v4160_v22 = vld [vmem:[#allocation5 + $0x40] sm:$0xf]  ;;  %v5744_v24 = vld [vmem:[#allocation5 + $0x44] sm:$0xf]  ;;  %v4162_v25 = vld [vmem:[#allocation5 + $0x48] sm:$0xf0] }
  0x15   :  { %v5731_v26 = vld [vmem:[%s6824_s1 + $0x18] sm:$0xff]  ;;  %v4161_v27 = vor.u32 %v5745_v23, %v4160_v22  ;;  %v4165_v28 = vor.u32 %v5744_v24, %v4162_v25  ;;  %v4152_v29 = vld [vmem:[#allocation5 + $0x30] sm:$0xf]  ;;  %v5742_v31 = vld [vmem:[#allocation5 + $0x34] sm:$0xf]  ;;  %s6317_s13 = smov [#allocation2]  }
  0x16   :  { %282 = vmatpush.bf16.msra.mxu1 %v4177_v13  ;;  %v5743_v30 = vld [vmem:[#allocation5 + $0x34] sm:$0xf0]  ;;  %v4154_v32 = vld [vmem:[#allocation5 + $0x38] sm:$0xf0]  ;;  %v5730_v33 = vld [vmem:[%s6824_s1 + $0x10] sm:$0xff]  ;;  %s76_s14 = sshll.u32 %s6317_s13, 4  ;;  %s77_s14 = int_to_ptr.vmem [resolvable:$true] %s76_s14 }
  0x17   :  { %165 = vmatpush.bf16.msra.mxu0 %v5733_v12  ;;  %295 = vmatpush.bf16.msra.mxu2 %v4181_v14  ;;  %v4153_v34 = vor.u32 %v5743_v30, %v4152_v29  ;;  %v4157_v35 = vor.u32 %v5742_v31, %v4154_v32  ;;  %v4144_v36 = vld [vmem:[#allocation5 + $0x20] sm:$0xf]  ;;  %v5741_v37 = vld [vmem:[#allocation5 + $0x24] sm:$0xf0]  ;;  %v5740_v38 = vld [vmem:[#allocation5 + $0x24] sm:$0xf] }
  0x18   :  { %v4146_v39 = vld [vmem:[#allocation5 + $0x28] sm:$0xf0]  ;;  %v4145_v41 = vor.u32 %v5741_v37, %v4144_v36  ;;  %v5728_v43 = vld [vmem:[%s6824_s1] sm:$0xff]  ;;  %v4136_v45 = vld [vmem:[#allocation5 + $0x10] sm:$0xf]  ;;  %s88_s16 = sshll.u32 %s6828_s5, 4  ;;  %s89_s16 = int_to_ptr.hbm [resolvable:$true] %s88_s16 }
  0x19   :  { %v5729_v40 = vld [vmem:[%s6824_s1 + $0x8] sm:$0xff]  ;;  %v4149_v42 = vor.u32 %v5740_v38, %v4146_v39  ;;  %v94_v44 = vld [vmem:[%s6823_s0] sm:$0x1]  ;;  %v5739_v46 = vld [vmem:[#allocation5 + $0x14] sm:$0xf0]  ;;  %v6397_v2 = vpop.eup %6147  ;;  %s6318_s17 = smov [#allocation3]  }
  0x1a   :  { %283 = vmatpush.bf16.msra.mxu1 %v4169_v20  ;;  %v5738_v47 = vld [vmem:[#allocation5 + $0x14] sm:$0xf]  ;;  %v4137_v48 = vor.u32 %v5739_v46, %v4136_v45  ;;  %v4138_v49 = vld [vmem:[#allocation5 + $0x18] sm:$0xf0]  ;;  %v4128_v51 = vld [vmem:[#allocation5] sm:$0xf]  ;;  %vm329_vm1 = vweird.f32 %v6397_v2 }
  0x1b   :  { %166 = vmatpush.bf16.msra.mxu0 %v5732_v19  ;;  %296 = vmatpush.bf16.msra.mxu2 %v4173_v21  ;;  %v4141_v50 = vor.u32 %v5738_v47, %v4138_v49  ;;  %v5737_v52 = vld [vmem:[#allocation5 + $0x4] sm:$0xf0]  ;;  %v5736_v53 = vld [vmem:[#allocation5 + $0x4] sm:$0xf]  ;;  %v4130_v55 = vld [vmem:[#allocation5 + $0x8] sm:$0xf0] }
  0x1c   :  { %v4129_v54 = vor.u32 %v5737_v52, %v4128_v51  ;;  %v4133_v56 = vor.u32 %v5736_v53, %v4130_v55  ;;  %v6146_v57 = vld [vmem:[#allocation9] ss:$0 sm:$0xff]  ;;  %v6395_v1 = vld [vmem:[#allocation9 + $0x1] sm:$0x3]  ;;  %v5782_v4 = vld [vmem:[#allocation7 + $0xec] sm:$0xf0] }
  0x1d   :  { %v4304_v3 = vld [vmem:[#allocation7 + $0xe0] sm:$0xf]  ;;  %v5814_v7 = vld [vmem:[#allocation7 + $0x1ec] sm:$0xf0]  ;;  %v5780_v8 = vld [vmem:[#allocation7 + $0xe4] sm:$0xf] }
  0x1e   :  { %284 = vmatpush.bf16.msra.mxu1 %v4161_v27  ;;  %v4432_v5 = vld [vmem:[#allocation7 + $0x1e0] sm:$0xf]  ;;  %v4305_v6 = vor.u32 %v5782_v4, %v4304_v3  ;;  %v4306_v9 = vld [vmem:[#allocation7 + $0xf0] sm:$0xf0]  ;;  %v5812_v12 = vld [vmem:[#allocation7 + $0x1e4] sm:$0xf] }
  0x1f   :  { %167 = vmatpush.bf16.msra.mxu0 %v5731_v26  ;;  %297 = vmatpush.bf16.msra.mxu2 %v4165_v28  ;;  %v4433_v10 = vor.u32 %v5814_v7, %v4432_v5  ;;  %v4309_v11 = vor.u32 %v5780_v8, %v4306_v9  ;;  %v4434_v13 = vld [vmem:[#allocation7 + $0x1f0] sm:$0xf0]  ;;  %v197_v14 = vperm.slane %v6395_v1, 0  ;;  %v325_v15 = vmul.f32 2.0, %v6397_v2  ;;  %v4288_v17 = vld [vmem:[#allocation7 + $0xc0] sm:$0xf] }
  0x20   :  { %806 = vmatpush.bf16.msra.mxu3 %v4305_v6  ;;  %v4437_v16 = vor.u32 %v5812_v12, %v4434_v13  ;;  %v5778_v18 = vld [vmem:[#allocation7 + $0xcc] sm:$0xf0]  ;;  %v4416_v19 = vld [vmem:[#allocation7 + $0x1c0] sm:$0xf]  ;;  %v5776_v22 = vld [vmem:[#allocation7 + $0xc4] sm:$0xf] }
  0x21   :  { %v4289_v20 = vor.u32 %v5778_v18, %v4288_v17  ;;  %v5810_v21 = vld [vmem:[#allocation7 + $0x1cc] sm:$0xf0]  ;;  %v4290_v23 = vld [vmem:[#allocation7 + $0xd0] sm:$0xf0]  ;;  %v5808_v26 = vld [vmem:[#allocation7 + $0x1c4] sm:$0xf] }
  0x22   :  { %285 = vmatpush.bf16.msra.mxu1 %v4153_v34  ;;  %v4417_v24 = vor.u32 %v5810_v21, %v4416_v19  ;;  %v4293_v25 = vor.u32 %v5776_v22, %v4290_v23  ;;  %v326_v28 = vsub.f32 1.0, %v325_v15  ;;  %v198_v29 = vperm.slane %v6395_v1, 1  ;;  %v4418_v30 = vld [vmem:[#allocation7 + $0x1d0] sm:$0xf0]  ;;  %v5774_v34 = vld [vmem:[#allocation7 + $0xac] sm:$0xf0] }
  0x23   :  { %168 = vmatpush.bf16.msra.mxu0 %v5730_v33  ;;  %298 = vmatpush.bf16.msra.mxu2 %v4157_v35  ;;  %v4421_v32 = vor.u32 %v5808_v26, %v4418_v30  ;;  %v4272_v33 = vld [vmem:[#allocation7 + $0xa0] sm:$0xf]  ;;  %v5806_v37 = vld [vmem:[#allocation7 + $0x1ac] sm:$0xf0]  ;;  %v5772_v38 = vld [vmem:[#allocation7 + $0xa4] sm:$0xf] }
  0x24   :  { %807 = vmatpush.bf16.msra.mxu3 %v4289_v20  ;;  %v4400_v35 = vld [vmem:[#allocation7 + $0x1a0] sm:$0xf]  ;;  %v4273_v36 = vor.u32 %v5774_v34, %v4272_v33  ;;  %v4274_v39 = vld [vmem:[#allocation7 + $0xb0] sm:$0xf0]  ;;  %v327_v47 = vmul.f32 %v6397_v2, %v326_v28  ;;  %v5770_v51 = vld [vmem:[#allocation7 + $0x8c] sm:$0xf0] }
  0x25   :  { %v4402_v45 = vld [vmem:[#allocation7 + $0x1b0] sm:$0xf0]  ;;  %v4240_v9 = vld [vmem:[#allocation7 + $0x60] sm:$0xf]  ;;  %v5764_v19 = vld [vmem:[#allocation7 + $0x64] sm:$0xf] }
  0x26   :  { %286 = vmatpush.bf16.msra.mxu1 %v4145_v41  ;;  %v328_v0 = vadd.f32 %v6397_v2, %v327_v47  ;;  %v4386_v5 = vld [vmem:[#allocation7 + $0x190] sm:$0xf0]  ;;  %v4368_v15 = vld [vmem:[#allocation7 + $0x160] sm:$0xf]  ;;  %79 = dma.hbm_to_vmem [thread:$0]  %s75_s12, 32768, %s77_s14, [#allocation4] }
  0x27   :  { %169 = vmatpush.bf16.msra.mxu0 %v5729_v40  ;;  %299 = vmatpush.bf16.msra.mxu2 %v4149_v42  ;;  %v4401_v42 = vor.u32 %v5806_v37, %v4400_v35  ;;  %v4242_v20 = vld [vmem:[#allocation7 + $0x70] sm:$0xf0]  ;;  %v4224_v30 = vld [vmem:[#allocation7 + $0x40] sm:$0xf]  ;;  %s90_s18 = sshll.u32 %s6318_s17, 4  ;;  %s91_s18 = int_to_ptr.vmem [resolvable:$true] %s90_s18 }
  0x28   :  { %808 = vmatpush.bf16.msra.mxu3 %v4273_v36  ;;  %v4370_v26 = vld [vmem:[#allocation7 + $0x170] sm:$0xf0]  ;;  %v4245_v28 = vor.u32 %v5764_v19, %v4242_v20  ;;  %v4352_v33 = vld [vmem:[#allocation7 + $0x140] sm:$0xf]  ;;  %v5784_v19 = vld [vmem:[#allocation7 + $0x104] sm:$0xf] }
  0x29   :  { %v4322_v20 = vld [vmem:[#allocation7 + $0x110] sm:$0xf0]  ;;  %93 = dma.hbm_to_vmem [thread:$0]  %s89_s16, 8192, %s91_s18, [#allocation4 + $0x1] }
  0x2a   :  { %287 = vmatpush.bf16.msra.mxu1 %v4137_v48 }
  0x2b   :  { %170 = vmatpush.bf16.msra.mxu0 %v5728_v43  ;;  %300 = vmatpush.bf16.msra.mxu2 %v4141_v50  ;;  %v4277_v43 = vor.u32 %v5772_v38, %v4274_v39  ;;  %v4256_v50 = vld [vmem:[#allocation7 + $0x80] sm:$0xf]  ;;  %v5794_v39 = vld [vmem:[#allocation7 + $0x14c] sm:$0xf0] }
  0x2c   :  { %v4257_v55 = vor.u32 %v5770_v51, %v4256_v50  ;;  %v4208_v51 = vld [vmem:[#allocation7 + $0x20] sm:$0xf] }
  0x2e   :  { %171 = vmatmul.bf16.vlgmr.msra.gmra.mxu0 %v94_v44  ;;  %288 = vmatpush.bf16.msra.mxu1 %v4129_v54  ;;  %v5804_v44 = vld [vmem:[#allocation7 + $0x1a4] sm:$0xf] }
  0x2f   :  { %301 = vmatpush.bf16.msra.mxu2 %v4133_v56  ;;  %819 = vmatpush.bf16.msrb.mxu0 %v4433_v10  ;;  %v4405_v48 = vor.u32 %v5804_v44, %v4402_v45  ;;  %v4384_v56 = vld [vmem:[#allocation7 + $0x180] sm:$0xf]  ;;  %v5766_v10 = vld [vmem:[#allocation7 + $0x6c] sm:$0xf0]  ;;  %v4354_v44 = vld [vmem:[#allocation7 + $0x150] sm:$0xf0] }
  0x30   :  { %809 = vmatpush.bf16.msra.mxu3 %v4257_v55 }
  0x32   :  { %832 = vmatpush.bf16.msrb.mxu1 %v4309_v11 }
  0x33   :  { %845 = vmatpush.bf16.msrb.mxu2 %v4437_v16  ;;  %820 = vmatpush.bf16.msrb.mxu0 %v4417_v24  ;;  %v5798_v16 = vld [vmem:[#allocation7 + $0x16c] sm:$0xf0] }
  0x34   :  { %v4369_v18 = vor.u32 %v5798_v16, %v4368_v15  ;;  %v5786_v15 = vld [vmem:[#allocation7 + $0x10c] sm:$0xf0]  ;;  %v5752_v16 = vld [vmem:[#allocation7 + $0x4] sm:$0xf] }
  0x36   :  { %833 = vmatpush.bf16.msrb.mxu1 %v4293_v25  ;;  %v5796_v25 = vld [vmem:[#allocation7 + $0x164] sm:$0xf] }
  0x37   :  { %846 = vmatpush.bf16.msrb.mxu2 %v4421_v32  ;;  %821 = vmatpush.bf16.msrb.mxu0 %v4401_v42  ;;  %v5762_v32 = vld [vmem:[#allocation7 + $0x4c] sm:$0xf0]  ;;  %v4353_v42 = vor.u32 %v5794_v39, %v4352_v33  ;;  %v4314_v33 = vld [vmem:[#allocation7 + $0xf8] sm:$0xf0]  ;;  %v4296_v39 = vld [vmem:[#allocation7 + $0xc8] sm:$0xf] }
  0x3a   :  { %834 = vmatpush.bf16.msrb.mxu1 %v4277_v43  ;;  %v4226_v43 = vld [vmem:[#allocation7 + $0x50] sm:$0xf0] }
  0x3b   :  { %847 = vmatpush.bf16.msrb.mxu2 %v4405_v48 }
  0xab   :  { %v172_v58 = vpop.f32.mrf.mxu0 }
  0xac   :  { %v173_v59 = vadd.f32 %v6146_v57, %v172_v58  ;;  %v5802_v57 = vld [vmem:[#allocation7 + $0x18c] sm:$0xf0] }
  0xae   :  { %v176_v60 = vmul.f32 0.2, %v173_v59 }
  0xb0   :  { %v177_v61 = vmax.f32 %v173_v59, %v176_v60  ;;  %v4385_v59 = vor.u32 %v5802_v57, %v4384_v56  ;;  %v5768_v60 = vld [vmem:[#allocation7 + $0x84] sm:$0xf]  ;;  %v4336_v57 = vld [vmem:[#allocation7 + $0x120] sm:$0xf] }
  0xb2   :  { %v195_v62 = vpack.c.bf16 %v177_v61, %v177_v61  ;;  %v4258_v61 = vld [vmem:[#allocation7 + $0x90] sm:$0xf0]  ;;  %822 = vmatpush.bf16.msrb.mxu0 %v4385_v59  ;;  %v5790_v59 = vld [vmem:[#allocation7 + $0x12c] sm:$0xf0] }
  0xb3   :  { %v174_v63 = vpop.f32.mrf.mxu0  ;;  %v4261_v4 = vor.u32 %v5768_v60, %v4258_v61  ;;  %v4337_v61 = vor.u32 %v5790_v59, %v4336_v57  ;;  %v5807_v59 = vld [vmem:[#allocation7 + $0x1b4] sm:$0xf0] }
  0xb4   :  { %289 = vmatmul.bf16.vlgmr.msra.gmra.mxu1 %v195_v62  ;;  %302 = vmatmul.bf16.vlgmr.msra.gmra.mxu2 %v195_v62  ;;  %v5800_v62 = vld [vmem:[#allocation7 + $0x184] sm:$0xf] }
  0xb5   :  { %v4389_v8 = vor.u32 %v5800_v62, %v4386_v5  ;;  %835 = vmatpush.bf16.msrb.mxu1 %v4261_v4  ;;  %v5756_v62 = vld [vmem:[#allocation7 + $0x24] sm:$0xf] }
  0xb6   :  { %823 = vmatpush.bf16.msrb.mxu0 %v4369_v18  ;;  %v4194_v18 = vld [vmem:[#allocation7 + $0x10] sm:$0xf0] }
  0xb7   :  { %848 = vmatpush.bf16.msrb.mxu2 %v4389_v8  ;;  %v4192_v8 = vld [vmem:[#allocation7] sm:$0xf] }
  0xb9   :  { %836 = vmatpush.bf16.msrb.mxu1 %v4245_v28  ;;  %v4325_v28 = vor.u32 %v5784_v19, %v4322_v20  ;;  %v4394_v19 = vld [vmem:[#allocation7 + $0x198] sm:$0xf0] }
  0xba   :  { %824 = vmatpush.bf16.msrb.mxu0 %v4353_v42  ;;  %v4424_v42 = vld [vmem:[#allocation7 + $0x1c8] sm:$0xf] }
  0xbe   :  { %825 = vmatpush.bf16.msrb.mxu0 %v4337_v61  ;;  %v4282_v61 = vld [vmem:[#allocation7 + $0xb8] sm:$0xf0] }
 0x131   :  { %v290_v27 = vpop.f32.mrf.mxu1 }
 0x132   :  { %v6402_v31 = vadd.f32 %v290_v27, %v197_v14  ;;  %v4241_v14 = vor.u32 %v5766_v10, %v4240_v9  ;;  %v6422_v27 = vsel %vm329_vm1, %v6397_v2, %v328_v0  ;;  %v5792_v2 = vld [vmem:[#allocation7 + $0x144] sm:$0xf]  ;;  %v5754_v9 = vld [vmem:[#allocation7 + $0xc] sm:$0xf0]  ;;  %v4320_v10 = vld [vmem:[#allocation7 + $0x100] sm:$0xf] }
 0x133   :  { %v4357_v50 = vor.u32 %v5792_v2, %v4354_v44  ;;  %v5788_v0 = vld [vmem:[#allocation7 + $0x124] sm:$0xf] }
 0x134   :  { %v310_v40 = vsel %vm309_vm0, %v6402_v31, 0.0  ;;  %v333_v41 = vmul.f32 %v6402_v31, %v6402_v31  ;;  %810 = vmatpush.bf16.msra.mxu3 %v4241_v14  ;;  %v4193_v14 = vor.u32 %v5754_v9, %v4192_v8  ;;  %v4392_v8 = vld [vmem:[#allocation7 + $0x188] sm:$0xf] }
 0x135   :  { %v311_v46 = vrot.slane %v310_v40, 4 }
 0x136   :  { %v335_v49 = vsel %vm309_vm0, %v333_v41, 0.0  ;;  %v4225_v41 = vor.u32 %v5762_v32, %v4224_v30  ;;  %v5815_v30 = vld [vmem:[#allocation7 + $0x1f4] sm:$0xf0]  ;;  %v5781_v32 = vld [vmem:[#allocation7 + $0xec] sm:$0xf] }
 0x137   :  { %v312_v52 = vadd.f32 %v311_v46, %v310_v40  ;;  %v336_v53 = vrot.slane %v335_v49, 4  ;;  %v303_v54 = vpop.f32.mrf.mxu2  ;;  %v5760_v40 = vld [vmem:[#allocation7 + $0x44] sm:$0xf] }
 0x138   :  { %v6410_v58 = vadd.f32 %v303_v54, %v198_v29  ;;  %v4373_v29 = vor.u32 %v5796_v25, %v4370_v26  ;;  %811 = vmatpush.bf16.msra.mxu3 %v4225_v41  ;;  %v4440_v25 = vld [vmem:[#allocation7 + $0x1e8] sm:$0xf]  ;;  %v4197_v26 = vor.u32 %v5752_v16, %v4194_v18  ;;  %v5779_v41 = vld [vmem:[#allocation7 + $0xd4] sm:$0xf0]  ;;  %v5801_v18 = vld [vmem:[#allocation7 + $0x18c] sm:$0xf] }
 0x139   :  { %v313_v63 = vrot.slane %v312_v52, 2  ;;  %v337_v1 = vadd.f32 %v336_v53, %v335_v49  ;;  %v292_v3 = vpop.f32.mrf.mxu1  ;;  %v4229_v49 = vor.u32 %v5760_v40, %v4226_v43  ;;  %v5811_v43 = vld [vmem:[#allocation7 + $0x1d4] sm:$0xf0]  ;;  %v4297_v44 = vor.u32 %v5779_v41, %v4296_v39 }
 0x13a   :  { %v317_v6 = vsel %vm309_vm0, %v6410_v58, 0.0  ;;  %v334_v7 = vmul.f32 %v6410_v58, %v6410_v58  ;;  %849 = vmatpush.bf16.msrb.mxu2 %v4373_v29  ;;  %v5763_v41 = vld [vmem:[#allocation7 + $0x54] sm:$0xf0] }
 0x13b   :  { %v314_v11 = vadd.f32 %v313_v63, %v312_v52  ;;  %v338_v12 = vrot.slane %v337_v1, 2  ;;  %v318_v13 = vrot.slane %v317_v6, 4  ;;  %v5758_v52 = vld [vmem:[#allocation7 + $0x2c] sm:$0xf0]  ;;  %837 = vmatpush.bf16.msrb.mxu1 %v4229_v49  ;;  %v4210_v63 = vld [vmem:[#allocation7 + $0x30] sm:$0xf0] }
 0x13c   :  { %v342_v17 = vsel %vm309_vm0, %v334_v7, 0.0  ;;  %v4209_v60 = vor.u32 %v5758_v52, %v4208_v51  ;;  %v4213_v5 = vor.u32 %v5756_v62, %v4210_v63  ;;  %v4426_v51 = vld [vmem:[#allocation7 + $0x1d8] sm:$0xf0] }
 0x13d   :  { %v315_v21 = vrot.slane %v314_v11, 1  ;;  %v339_v22 = vadd.f32 %v338_v12, %v337_v1  ;;  %v319_v23 = vadd.f32 %v318_v13, %v317_v6  ;;  %v343_v24 = vrot.slane %v342_v17, 4  ;;  %v4338_v6 = vld [vmem:[#allocation7 + $0x130] sm:$0xf0] }
 0x13e   :  { %850 = vmatpush.bf16.msrb.mxu2 %v4357_v50  ;;  %812 = vmatpush.bf16.msra.mxu3 %v4209_v60  ;;  %v4341_v7 = vor.u32 %v5788_v0, %v4338_v6  ;;  %v5809_v50 = vld [vmem:[#allocation7 + $0x1cc] sm:$0xf]  ;;  %v4264_v6 = vld [vmem:[#allocation7 + $0x88] sm:$0xf] }
 0x13f   :  { %v316_v34 = vadd.f32 %v315_v21, %v314_v11  ;;  %v340_v35 = vrot.slane %v339_v22, 1  ;;  %v320_v36 = vrot.slane %v319_v23, 2  ;;  %v344_v37 = vadd.f32 %v343_v24, %v342_v17  ;;  %v305_v38 = vpop.f32.mrf.mxu2  ;;  %838 = vmatpush.bf16.msrb.mxu1 %v4213_v5  ;;  %v5783_v24 = vld [vmem:[#allocation7 + $0xf4] sm:$0xf0]  ;;  %v5773_v60 = vld [vmem:[#allocation7 + $0xac] sm:$0xf] }
 0x140   :  { %v4321_v17 = vor.u32 %v5786_v15, %v4320_v10  ;;  %v4442_v38 = vld [vmem:[#allocation7 + $0x1f8] sm:$0xf0]  ;;  %v5805_v0 = vld [vmem:[#allocation7 + $0x1ac] sm:$0xf]  ;;  %v5803_v10 = vld [vmem:[#allocation7 + $0x194] sm:$0xf0] }
 0x141   :  { %v6425_v45 = vmul.f32 %v6422_v27, %v316_v34  ;;  %v341_v46 = vadd.f32 %v340_v35, %v339_v22  ;;  %v321_v47 = vadd.f32 %v320_v36, %v319_v23  ;;  %v345_v48 = vrot.slane %v344_v37, 2  ;;  %v4312_v23 = vld [vmem:[#allocation7 + $0xe8] sm:$0xf] }
 0x142   :  { %851 = vmatpush.bf16.msrb.mxu2 %v4341_v7  ;;  %813 = vmatpush.bf16.msra.mxu3 %v4193_v14  ;;  %v4313_v29 = vor.u32 %v5783_v24, %v4312_v23  ;;  %v4441_v35 = vor.u32 %v5815_v30, %v4440_v25  ;;  %v4317_v36 = vor.u32 %v5781_v32, %v4314_v33  ;;  %v5771_v7 = vld [vmem:[#allocation7 + $0x94] sm:$0xf0]  ;;  %v4248_v25 = vld [vmem:[#allocation7 + $0x68] sm:$0xf]  ;;  %v5765_v32 = vld [vmem:[#allocation7 + $0x6c] sm:$0xf] }
 0x143   :  { %v349_v53 = vmul.f32 %v341_v46, %v6422_v27  ;;  %v351_v54 = vmul.f32 %v6425_v45, %v6425_v45  ;;  %v322_v55 = vrot.slane %v321_v47, 1  ;;  %v346_v56 = vadd.f32 %v345_v48, %v344_v37  ;;  %826 = vmatpush.bf16.msrb.mxu0 %v4321_v17  ;;  %v5813_v37 = vld [vmem:[#allocation7 + $0x1ec] sm:$0xf]  ;;  %839 = vmatpush.bf16.msrb.mxu1 %v4197_v26  ;;  %v4298_v48 = vld [vmem:[#allocation7 + $0xd8] sm:$0xf0] }
 0x144   :  { %v4445_v40 = vor.u32 %v5813_v37, %v4442_v38  ;;  %v4425_v46 = vor.u32 %v5811_v43, %v4424_v42  ;;  %v4265_v15 = vor.u32 %v5771_v7, %v4264_v6  ;;  %v4393_v16 = vor.u32 %v5803_v10, %v4392_v8  ;;  %v4266_v17 = vld [vmem:[#allocation7 + $0x98] sm:$0xf0]  ;;  %v5767_v26 = vld [vmem:[#allocation7 + $0x74] sm:$0xf0]  ;;  %v5797_v37 = vld [vmem:[#allocation7 + $0x16c] sm:$0xf] }
 0x145   :  { %v353_v1 = vsub.f32 %v349_v53, %v351_v54  ;;  %v323_v3 = vadd.f32 %v322_v55, %v321_v47  ;;  %v347_v4 = vrot.slane %v346_v56, 1  ;;  %v5777_v47 = vld [vmem:[#allocation7 + $0xcc] sm:$0xf]  ;;  %v4429_v53 = vor.u32 %v5809_v50, %v4426_v51  ;;  %v4280_v54 = vld [vmem:[#allocation7 + $0xa8] sm:$0xf] }
 0x146   :  { %852 = vmatpush.bf16.msrb.mxu2 %v4325_v28  ;;  %858 = vmatpush.bf16.msrb.mxu3 %v4313_v29  ;;  %v4301_v49 = vor.u32 %v5777_v47, %v4298_v48  ;;  %v5775_v55 = vld [vmem:[#allocation7 + $0xb4] sm:$0xf0]  ;;  %v4397_v23 = vor.u32 %v5801_v18, %v4394_v19  ;;  %v4376_v28 = vld [vmem:[#allocation7 + $0x168] sm:$0xf]  ;;  %v4249_v29 = vor.u32 %v5767_v26, %v4248_v25  ;;  %v4250_v33 = vld [vmem:[#allocation7 + $0x78] sm:$0xf0] }
 0x147   :  { %v6430_v11 = vadd.f32 0.8, %v353_v1  ;;  %v6433_v12 = vmul.f32 %v6422_v27, %v323_v3  ;;  %v348_v13 = vadd.f32 %v347_v4, %v346_v56  ;;  %871 = vmatpush.bf16.msra.mxu0 %v4441_v35  ;;  %884 = vmatpush.bf16.msra.mxu1 %v4317_v36  ;;  %v4408_v56 = vld [vmem:[#allocation7 + $0x1a8] sm:$0xf]  ;;  %v4281_v62 = vor.u32 %v5775_v55, %v4280_v54  ;;  %v4410_v1 = vld [vmem:[#allocation7 + $0x1b8] sm:$0xf0] }
 0x148   :  { %v4409_v63 = vor.u32 %v5807_v59, %v4408_v56  ;;  %v4285_v4 = vor.u32 %v5773_v60, %v4282_v61  ;;  %v4413_v5 = vor.u32 %v5805_v0, %v4410_v1  ;;  %v5799_v30 = vld [vmem:[#allocation7 + $0x174] sm:$0xf0]  ;;  %v4253_v36 = vor.u32 %v5765_v32, %v4250_v33  ;;  %v4378_v38 = vld [vmem:[#allocation7 + $0x178] sm:$0xf0]  ;;  %v4360_v42 = vld [vmem:[#allocation7 + $0x148] sm:$0xf] }
 0x149   :  { %6149 = vrsqrt.f32 %v6430_v11  ;;  %v350_v21 = vmul.f32 %v348_v13, %v6422_v27  ;;  %v352_v22 = vmul.f32 %v6433_v12, %v6433_v12  ;;  %v5769_v13 = vld [vmem:[#allocation7 + $0x8c] sm:$0xf]  ;;  %v4377_v35 = vor.u32 %v5799_v30, %v4376_v28  ;;  %v5759_v59 = vld [vmem:[#allocation7 + $0x34] sm:$0xf0]  ;;  %v4344_v60 = vld [vmem:[#allocation7 + $0x128] sm:$0xf] }
 0x14a   :  { %897 = vmatpush.bf16.msra.mxu2 %v4445_v40  ;;  %859 = vmatpush.bf16.msrb.mxu3 %v4297_v44  ;;  %v4381_v39 = vor.u32 %v5797_v37, %v4378_v38  ;;  %v4232_v40 = vld [vmem:[#allocation7 + $0x48] sm:$0xf]  ;;  %v5761_v47 = vld [vmem:[#allocation7 + $0x4c] sm:$0xf]  ;;  %v307_v61 = vld [vmem:[#allocation9 + $0x3] sm:$0x3]  ;;  %vm363_vm6 = vweird.f32 %v6430_v11 }
 0x14b   :  { %v354_v34 = vsub.f32 %v350_v21, %v352_v22  ;;  %872 = vmatpush.bf16.msra.mxu0 %v4425_v46  ;;  %885 = vmatpush.bf16.msra.mxu1 %v4301_v49  ;;  %v4269_v21 = vor.u32 %v5769_v13, %v4266_v17  ;;  %v5795_v46 = vld [vmem:[#allocation7 + $0x154] sm:$0xf0]  ;;  %v4233_v49 = vor.u32 %v5763_v41, %v4232_v40  ;;  %v5793_v51 = vld [vmem:[#allocation7 + $0x14c] sm:$0xf]  ;;  %v4218_v0 = vld [vmem:[#allocation7 + $0x38] sm:$0xf0] }
 0x14c   :  { %v4361_v50 = vor.u32 %v5795_v46, %v4360_v42  ;;  %v5753_v17 = vld [vmem:[#allocation7 + $0xc] sm:$0xf]  ;;  %v4202_v19 = vld [vmem:[#allocation7 + $0x18] sm:$0xf0]  ;;  %v308_v30 = vld [vmem:[#allocation9 + $0x5] sm:$0x3] }
 0x14d   :  { %v6439_v2 = vadd.f32 0.8, %v354_v34 }
 0x14e   :  { %898 = vmatpush.bf16.msra.mxu2 %v4429_v53  ;;  %860 = vmatpush.bf16.msrb.mxu3 %v4281_v62  ;;  %v4362_v53 = vld [vmem:[#allocation7 + $0x158] sm:$0xf0]  ;;  %v5791_v62 = vld [vmem:[#allocation7 + $0x134] sm:$0xf0] }
 0x14f   :  { %v6441_v52 = vpop.eup %6149  ;;  %6151 = vrsqrt.f32 %v6439_v2  ;;  %873 = vmatpush.bf16.msra.mxu0 %v4409_v63  ;;  %886 = vmatpush.bf16.msra.mxu1 %v4285_v4  ;;  %vm373_vm3 = vweird.f32 %v6439_v2  ;;  %v4365_v56 = vor.u32 %v5793_v51, %v4362_v53  ;;  %v5757_v63 = vld [vmem:[#allocation7 + $0x2c] sm:$0xf]  ;;  %v4346_v4 = vld [vmem:[#allocation7 + $0x138] sm:$0xf0]  ;;  %v4345_v8 = vor.u32 %v5791_v62, %v4344_v60 }
 0x150   :  { %v358_v57 = vmul.f32 %v6441_v52, %v6430_v11  ;;  %vm364_vm5 = vweird.f32 %v6441_v52  ;;  %v5755_v11 = vld [vmem:[#allocation7 + $0x14] sm:$0xf0]  ;;  %v4221_v13 = vor.u32 %v5757_v63, %v4218_v0 }
 0x151   :  { %vm6469_vm8 = vmor %vm363_vm6, %vm364_vm5  ;;  %vm1040_vm6 = vcmask 1042434  }
 0x152   :  { %v359_v3 = vmul.f32 %v6441_v52, %v358_v57  ;;  %899 = vmatpush.bf16.msra.mxu2 %v4413_v5  ;;  %861 = vmatpush.bf16.msrb.mxu3 %v4265_v15  ;;  %v4216_v57 = vld [vmem:[#allocation7 + $0x28] sm:$0xf] }
 0x153   :  { %874 = vmatpush.bf16.msra.mxu0 %v4393_v16  ;;  %887 = vmatpush.bf16.msra.mxu1 %v4269_v21  ;;  %v4217_v7 = vor.u32 %v5759_v59, %v4216_v57  ;;  %v4328_v15 = vld [vmem:[#allocation7 + $0x108] sm:$0xf]  ;;  %v5787_v16 = vld [vmem:[#allocation7 + $0x114] sm:$0xf0]  ;;  %v4330_v21 = vld [vmem:[#allocation7 + $0x118] sm:$0xf0] }
 0x154   :  { %v360_v9 = vmul.f32 0.5, %v359_v3  ;;  %v5789_v3 = vld [vmem:[#allocation7 + $0x12c] sm:$0xf] }
 0x155   :  { %v6447_v14 = vpop.eup %6151 }
 0x156   :  { %v368_v20 = vmul.f32 %v6447_v14, %v6439_v2  ;;  %v361_v22 = vsub.f32 1.5, %v360_v9  ;;  %vm374_vm2 = vweird.f32 %v6447_v14  ;;  %900 = vmatpush.bf16.msra.mxu2 %v4397_v23  ;;  %862 = vmatpush.bf16.msrb.mxu3 %v4249_v29  ;;  %v4234_v2 = vld [vmem:[#allocation7 + $0x58] sm:$0xf0]  ;;  %v4200_v9 = vld [vmem:[#allocation7 + $0x8] sm:$0xf] }
 0x157   :  { %vm6456_vm4 = vmor %vm373_vm3, %vm374_vm2  ;;  %875 = vmatpush.bf16.msra.mxu0 %v4377_v35  ;;  %888 = vmatpush.bf16.msra.mxu1 %v4253_v36  ;;  %v4237_v55 = vor.u32 %v5761_v47, %v4234_v2  ;;  %v4201_v23 = vor.u32 %v5755_v11, %v4200_v9 }
 0x158   :  { %v369_v24 = vmul.f32 %v6447_v14, %v368_v20  ;;  %v362_v48 = vmul.f32 %v6441_v52, %v361_v22  ;;  %v5785_v20 = vld [vmem:[#allocation7 + $0x10c] sm:$0xf] }
 0x159   :  { %v4333_v28 = vor.u32 %v5785_v20, %v4330_v21 }
 0x15a   :  { %v370_v34 = vmul.f32 0.5, %v369_v24  ;;  %901 = vmatpush.bf16.msra.mxu2 %v4381_v39  ;;  %863 = vmatpush.bf16.msrb.mxu3 %v4233_v49  ;;  %v366_v10 = vsel %vm6469_vm8, %v6441_v52, %v362_v48  ;;  %v4329_v24 = vor.u32 %v5787_v16, %v4328_v15  ;;  %v4205_v52 = vor.u32 %v5753_v17, %v4202_v19 }
 0x15b   :  { %876 = vmatpush.bf16.msra.mxu0 %v4361_v50  ;;  %889 = vmatpush.bf16.msra.mxu1 %v4237_v55 }
 0x15c   :  { %v371_v43 = vsub.f32 1.5, %v370_v34 }
 0x15e   :  { %v372_v54 = vmul.f32 %v6447_v14, %v371_v43  ;;  %902 = vmatpush.bf16.msra.mxu2 %v4365_v56  ;;  %864 = vmatpush.bf16.msrb.mxu3 %v4217_v7 }
 0x15f   :  { %877 = vmatpush.bf16.msra.mxu0 %v4345_v8  ;;  %890 = vmatpush.bf16.msra.mxu1 %v4221_v13 }
 0x160   :  { %v376_v1 = vsel %vm6456_vm4, %v6447_v14, %v372_v54  ;;  %v4349_v14 = vor.u32 %v5789_v3, %v4346_v4 }
 0x161   :  { %v379_v6 = vrot.slane %v376_v1, 7 }
 0x162   :  { %903 = vmatpush.bf16.msra.mxu2 %v4349_v14  ;;  %865 = vmatpush.bf16.msrb.mxu3 %v4201_v23 }
 0x163   :  { %v381_v18 = vsel %vm380_vm7, %v366_v10, %v379_v6  ;;  %878 = vmatpush.bf16.msra.mxu0 %v4329_v24  ;;  %891 = vmatpush.bf16.msra.mxu1 %v4205_v52 }
 0x164   :  { %v383_v22 = vmul.f32 %v381_v18, %v307_v61 }
 0x166   :  { %v385_v25 = vperm.slane %v383_v22, 0  ;;  %v386_v26 = vperm.slane %v383_v22, 1  ;;  %904 = vmatpush.bf16.msra.mxu2 %v4333_v28 }
 0x168   :  { %v390_v29 = vmul.f32 %v386_v26, %v6433_v12  ;;  %v389_v32 = vmul.f32 %v385_v25, %v6425_v45  ;;  %v398_v36 = vmul.f32 %v386_v26, %v6410_v58  ;;  %v397_v38 = vmul.f32 %v385_v25, %v6402_v31  ;;  %v474_v31 = vld [vmem:[#allocation9 + $0x7] sm:$0xf] }
 0x169   :  { %v479_v48 = vperm.slane %v474_v31, 1  ;;  %v478_v49 = vperm.slane %v474_v31, 0  ;;  %v481_v21 = vperm.slane %v474_v31, 3  ;;  %v480_v24 = vperm.slane %v474_v31, 2 }
 0x16a   :  { %v393_v33 = vrot.slane %v390_v29, 7 }
 0x16c   :  { %v394_v34 = vsel %vm380_vm7, %v389_v32, %v393_v33 }
 0x16d   :  { %v396_v35 = vsub.f32 %v308_v30, %v394_v34 }
 0x16f   :  { %v401_v37 = vperm.slane %v396_v35, 1  ;;  %v400_v39 = vperm.slane %v396_v35, 0 }
 0x171   :  { %v405_v40 = vadd.f32 %v401_v37, %v398_v36  ;;  %v404_v41 = vadd.f32 %v400_v39, %v397_v38 }
 0x173   :  { %v407_v12 = vmul.f32 0.2, %v405_v40  ;;  %v406_v42 = vmul.f32 0.2, %v404_v41 }
 0x175   :  { %v408_v43 = vmax.f32 %v404_v41, %v406_v42  ;;  %v409_v44 = vmax.f32 %v405_v40, %v407_v12 }
 0x177   :  { %v475_v46 = vpack.c.bf16 %v408_v43, %v408_v43  ;;  %v476_v45 = vpack.c.bf16 %v409_v44, %v409_v44 }
 0x179   :  { %814 = vmatmul.bf16.vlgmr.msra.gmra.mxu3 %v475_v46  ;;  %827 = vmatmul.bf16.vlgmr.msrb.gmra.mxu0 %v476_v45 }
 0x17a   :  { %840 = vmatmul.bf16.vlgmr.msrb.gmra.mxu1 %v475_v46  ;;  %853 = vmatmul.bf16.vlgmr.msrb.gmra.mxu2 %v476_v45 }
 0x189   :  { %866 = vmatmul.bf16.vlgmr.msrb.gmra.mxu3 %v475_v46  ;;  %879 = vmatmul.bf16.vlgmr.msra.gmra.mxu0 %v476_v45 }
 0x18a   :  { %892 = vmatmul.bf16.vlgmr.msra.gmra.mxu1 %v475_v46  ;;  %905 = vmatmul.bf16.vlgmr.msra.gmra.mxu2 %v476_v45 }
 0x1f6   :  { %v828_v58 = vpop.f32.mrf.mxu0 }
 0x1f7   :  { %v841_v47 = vpop.f32.mrf.mxu1 }
 0x1f8   :  { %v842_v50 = vadd.f32 %v841_v47, %v479_v48 }
 0x1fc   :  { %v815_v2 = vpop.f32.mrf.mxu3 }
 0x1fd   :  { %v816_v51 = vadd.f32 %v815_v2, %v478_v49  ;;  %v854_v53 = vpop.f32.mrf.mxu2 }
 0x1fe   :  { %v6488_v54 = vadd.f32 %v854_v53, %v842_v50  ;;  %v830_v55 = vpop.f32.mrf.mxu0 }
 0x1ff   :  { %v6490_v56 = vadd.f32 %v828_v58, %v816_v51  ;;  %v843_v57 = vpop.f32.mrf.mxu1 }
 0x200   :  { %v919_v59 = vsel %vm309_vm0, %v6488_v54, 0.0  ;;  %v945_v60 = vmul.f32 %v6488_v54, %v6488_v54 }
 0x201   :  { %v912_v61 = vsel %vm309_vm0, %v6490_v56, 0.0  ;;  %v944_v62 = vmul.f32 %v6490_v56, %v6490_v56  ;;  %v920_v63 = vrot.slane %v919_v59, 4 }
 0x202   :  { %v913_v0 = vrot.slane %v912_v61, 4  ;;  %v955_v1 = vsel %vm309_vm0, %v945_v60, 0.0 }
 0x203   :  { %v948_v3 = vsel %vm309_vm0, %v944_v62, 0.0  ;;  %v921_v4 = vadd.f32 %v920_v63, %v919_v59  ;;  %v956_v5 = vrot.slane %v955_v1, 4 }
 0x204   :  { %v914_v6 = vadd.f32 %v913_v0, %v912_v61  ;;  %v949_v7 = vrot.slane %v948_v3, 4  ;;  %v817_v8 = vpop.f32.mrf.mxu3 }
 0x205   :  { %v922_v9 = vrot.slane %v921_v4, 2  ;;  %v957_v11 = vadd.f32 %v956_v5, %v955_v1  ;;  %v856_v10 = vpop.f32.mrf.mxu2 }
 0x206   :  { %v915_v13 = vrot.slane %v914_v6, 2  ;;  %v950_v14 = vadd.f32 %v949_v7, %v948_v3  ;;  %v880_v15 = vpop.f32.mrf.mxu0 }
 0x207   :  { %v923_v16 = vadd.f32 %v922_v9, %v921_v4  ;;  %v958_v17 = vrot.slane %v957_v11, 2  ;;  %v893_v18 = vpop.f32.mrf.mxu1 }
 0x208   :  { %v916_v19 = vadd.f32 %v915_v13, %v914_v6  ;;  %v951_v20 = vrot.slane %v950_v14, 2  ;;  %v894_v32 = vadd.f32 %v893_v18, %v481_v21 }
 0x209   :  { %v924_v22 = vrot.slane %v923_v16, 1  ;;  %v959_v23 = vadd.f32 %v958_v17, %v957_v11 }
 0x20a   :  { %v917_v25 = vrot.slane %v916_v19, 1  ;;  %v952_v26 = vadd.f32 %v951_v20, %v950_v14 }
 0x20b   :  { %v925_v52 = vadd.f32 %v924_v22, %v923_v16  ;;  %v960_v28 = vrot.slane %v959_v23, 1 }
 0x20c   :  { %v918_v29 = vadd.f32 %v917_v25, %v916_v19  ;;  %v953_v30 = vrot.slane %v952_v26, 1  ;;  %v867_v33 = vpop.f32.mrf.mxu3 }
 0x20d   :  { %v6503_v34 = vmul.f32 %v925_v52, %v6422_v27  ;;  %v961_v35 = vadd.f32 %v960_v28, %v959_v23  ;;  %v868_v36 = vadd.f32 %v867_v33, %v480_v24  ;;  %v906_v37 = vpop.f32.mrf.mxu2 }
 0x20e   :  { %v6506_v38 = vmul.f32 %v918_v29, %v6422_v27  ;;  %v954_v39 = vadd.f32 %v953_v30, %v952_v26  ;;  %v6508_v40 = vadd.f32 %v906_v37, %v894_v32  ;;  %v882_v41 = vpop.f32.mrf.mxu0 }
 0x20f   :  { %v977_v12 = vmul.f32 %v961_v35, %v6422_v27  ;;  %v981_v42 = vmul.f32 %v6503_v34, %v6503_v34  ;;  %v6513_v43 = vadd.f32 %v880_v15, %v868_v36  ;;  %v895_v44 = vpop.f32.mrf.mxu1 }
 0x210   :  { %v976_v46 = vmul.f32 %v954_v39, %v6422_v27  ;;  %v980_v45 = vmul.f32 %v6506_v38, %v6506_v38  ;;  %v933_v31 = vsel %vm309_vm0, %v6508_v40, 0.0  ;;  %v947_v58 = vmul.f32 %v6508_v40, %v6508_v40 }
 0x211   :  { %v985_v47 = vsub.f32 %v977_v12, %v981_v42  ;;  %v926_v48 = vsel %vm309_vm0, %v6513_v43, 0.0  ;;  %v946_v49 = vmul.f32 %v6513_v43, %v6513_v43  ;;  %v934_v50 = vrot.slane %v933_v31, 4 }
 0x212   :  { %v984_v2 = vsub.f32 %v976_v46, %v980_v45  ;;  %v927_v51 = vrot.slane %v926_v48, 4  ;;  %v969_v53 = vsel %vm309_vm0, %v947_v58, 0.0 }
 0x213   :  { %v6527_v55 = vadd.f32 0.8, %v985_v47  ;;  %v962_v57 = vsel %vm309_vm0, %v946_v49, 0.0  ;;  %v935_v59 = vadd.f32 %v934_v50, %v933_v31  ;;  %v970_v60 = vrot.slane %v969_v53, 4 }
 0x214   :  { %v928_v61 = vadd.f32 %v927_v51, %v926_v48  ;;  %v963_v62 = vrot.slane %v962_v57, 4  ;;  %v869_v63 = vpop.f32.mrf.mxu3  ;;  %v988_v4 = vadd.f32 0.8, %v984_v2 }
 0x215   :  { %v936_v0 = vrot.slane %v935_v59, 2  ;;  %v971_v1 = vadd.f32 %v970_v60, %v969_v53  ;;  %v908_v3 = vpop.f32.mrf.mxu2  ;;  %6153 = vrsqrt.f32 %v6527_v55  ;;  %vm1008_vm10 = vweird.f32 %v6527_v55 }
 0x216   :  { %v929_v5 = vrot.slane %v928_v61, 2  ;;  %v964_v6 = vadd.f32 %v963_v62, %v962_v57  ;;  %6155 = vrsqrt.f32 %v988_v4  ;;  %vm998_vm12 = vweird.f32 %v988_v4 }
 0x217   :  { %v937_v7 = vadd.f32 %v936_v0, %v935_v59  ;;  %v972_v8 = vrot.slane %v971_v1, 2 }
 0x218   :  { %v930_v9 = vadd.f32 %v929_v5, %v928_v61  ;;  %v965_v11 = vrot.slane %v964_v6, 2 }
 0x219   :  { %v938_v10 = vrot.slane %v937_v7, 1  ;;  %v973_v13 = vadd.f32 %v972_v8, %v971_v1 }
 0x21a   :  { %v931_v14 = vrot.slane %v930_v9, 1  ;;  %v966_v15 = vadd.f32 %v965_v11, %v964_v6  ;;  %v910_v6 = vld [vmem:[#allocation9 + $0xb] sm:$0xf] }
 0x21b   :  { %v939_v16 = vadd.f32 %v938_v10, %v937_v7  ;;  %v974_v17 = vrot.slane %v973_v13, 1  ;;  %v6154_v18 = vpop.eup %6153 }
 0x21c   :  { %v932_v19 = vadd.f32 %v931_v14, %v930_v9  ;;  %v967_v20 = vrot.slane %v966_v15, 1  ;;  %v1003_v25 = vmul.f32 %v6154_v18, %v6527_v55  ;;  %v6156_v28 = vpop.eup %6155  ;;  %vm1009_vm9 = vweird.f32 %v6154_v18 }
 0x21d   :  { %v6532_v21 = vmul.f32 %v939_v16, %v6422_v27  ;;  %v975_v22 = vadd.f32 %v974_v17, %v973_v13  ;;  %v993_v35 = vmul.f32 %v6156_v28, %v988_v4  ;;  %vm999_vm11 = vweird.f32 %v6156_v28  ;;  %vm1010_vm13 = vmor %vm1008_vm10, %vm1009_vm9 }
 0x21e   :  { %v6535_v23 = vmul.f32 %v932_v19, %v6422_v27  ;;  %v968_v24 = vadd.f32 %v967_v20, %v966_v15  ;;  %v1004_v36 = vmul.f32 %v6154_v18, %v1003_v25  ;;  %vm6545_vm1 = vmor %vm998_vm12, %vm999_vm11  ;;  %v911_v25 = vld [vmem:[#allocation9 + $0xf] sm:$0xf] }
 0x21f   :  { %v979_v26 = vmul.f32 %v975_v22, %v6422_v27  ;;  %v983_v52 = vmul.f32 %v6532_v21, %v6532_v21  ;;  %v994_v41 = vmul.f32 %v6156_v28, %v993_v35 }
 0x220   :  { %v978_v29 = vmul.f32 %v968_v24, %v6422_v27  ;;  %v982_v30 = vmul.f32 %v6535_v23, %v6535_v23  ;;  %v1005_v12 = vmul.f32 0.5, %v1004_v36 }
 0x221   :  { %v987_v32 = vsub.f32 %v979_v26, %v983_v52  ;;  %v995_v44 = vmul.f32 0.5, %v994_v41 }
 0x222   :  { %v986_v33 = vsub.f32 %v978_v29, %v982_v30  ;;  %v1006_v46 = vsub.f32 1.5, %v1005_v12 }
 0x223   :  { %v991_v37 = vadd.f32 0.8, %v987_v32  ;;  %v996_v48 = vsub.f32 1.5, %v995_v44 }
 0x224   :  { %v990_v39 = vadd.f32 0.8, %v986_v33  ;;  %v1007_v49 = vmul.f32 %v6154_v18, %v1006_v46 }
 0x225   :  { %6157 = vrsqrt.f32 %v991_v37  ;;  %v997_v59 = vmul.f32 %v6156_v28, %v996_v48  ;;  %vm1028_vm2 = vweird.f32 %v991_v37 }
 0x226   :  { %6159 = vrsqrt.f32 %v990_v39  ;;  %v1011_v60 = vsel %vm1010_vm13, %v6154_v18, %v1007_v49  ;;  %vm1018_vm3 = vweird.f32 %v990_v39 }
 0x227   :  { %v1036_v0 = vrot.slane %v1011_v60, 7  ;;  %v1001_v1 = vsel %vm6545_vm1, %v6156_v28, %v997_v59 }
 0x229   :  { %v1039_v7 = vsel %vm380_vm7, %v1001_v1, %v1036_v0 }
 0x22b   :  { %v6158_v42 = vpop.eup %6157 }
 0x22c   :  { %v6160_v45 = vpop.eup %6159  ;;  %v1023_v31 = vmul.f32 %v6158_v42, %v991_v37  ;;  %vm1029_vm14 = vweird.f32 %v6158_v42 }
 0x22d   :  { %v1013_v58 = vmul.f32 %v6160_v45, %v990_v39  ;;  %vm1019_vm15 = vweird.f32 %v6160_v45  ;;  %vm1030_vm4 = vmor %vm1028_vm2, %vm1029_vm14 }
 0x22e   :  { %v1024_v47 = vmul.f32 %v6158_v42, %v1023_v31  ;;  %vm1020_vm5 = vmor %vm1018_vm3, %vm1019_vm15 }
 0x22f   :  { %v1014_v50 = vmul.f32 %v6160_v45, %v1013_v58 }
 0x230   :  { %v1025_v2 = vmul.f32 0.5, %v1024_v47 }
 0x231   :  { %v1015_v51 = vmul.f32 0.5, %v1014_v50 }
 0x232   :  { %v1026_v53 = vsub.f32 1.5, %v1025_v2 }
 0x233   :  { %v1016_v57 = vsub.f32 1.5, %v1015_v51 }
 0x234   :  { %v1027_v62 = vmul.f32 %v6158_v42, %v1026_v53 }
 0x235   :  { %v1017_v63 = vmul.f32 %v6160_v45, %v1016_v57 }
 0x236   :  { %v1031_v55 = vsel %vm1030_vm4, %v6158_v42, %v1027_v62 }
 0x237   :  { %v1021_v3 = vsel %vm1020_vm5, %v6160_v45, %v1017_v63  ;;  %v1038_v5 = vrot.slane %v1031_v55, 5 }
 0x238   :  { %v1037_v4 = vrot.slane %v1021_v3, 6 }
 0x23a   :  { %v1041_v8 = vsel %vm1040_vm6, %v1037_v4, %v1038_v5 }
 0x23b   :  { %v1042_v9 = vsel %vm309_vm0, %v1039_v7, %v1041_v8 }
 0x23c   :  { %v1044_v11 = vmul.f32 %v1042_v9, %v910_v6 }
 0x23e   :  { %v1046_v10 = vperm.slane %v1044_v11, 0  ;;  %v1047_v13 = vperm.slane %v1044_v11, 1  ;;  %v1048_v14 = vperm.slane %v1044_v11, 2  ;;  %v1049_v15 = vperm.slane %v1044_v11, 3 }
 0x240   :  { %v1055_v16 = vmul.f32 %v1047_v13, %v6503_v34  ;;  %v1056_v17 = vmul.f32 %v1048_v14, %v6535_v23  ;;  %v1057_v18 = vmul.f32 %v1049_v15, %v6532_v21  ;;  %v1054_v19 = vmul.f32 %v1046_v10, %v6506_v38 }
 0x241   :  { %v1070_v30 = vmul.f32 %v1046_v10, %v6490_v56  ;;  %v1071_v34 = vmul.f32 %v1047_v13, %v6488_v54  ;;  %v1072_v23 = vmul.f32 %v1048_v14, %v6513_v43  ;;  %v1073_v21 = vmul.f32 %v1049_v15, %v6508_v40 }
 0x242   :  { %v1062_v20 = vrot.slane %v1055_v16, 7  ;;  %v1063_v22 = vrot.slane %v1056_v17, 6  ;;  %v1064_v24 = vrot.slane %v1057_v18, 5 }
 0x244   :  { %v1065_v26 = vsel %vm380_vm7, %v1054_v19, %v1062_v20  ;;  %v1066_v52 = vsel %vm1040_vm6, %v1063_v22, %v1064_v24 }
 0x245   :  { %v1067_v28 = vsel %vm309_vm0, %v1065_v26, %v1066_v52 }
 0x246   :  { %v1069_v29 = vsub.f32 %v911_v25, %v1067_v28 }
 0x248   :  { %v1075_v38 = vperm.slane %v1069_v29, 0  ;;  %v1076_v32 = vperm.slane %v1069_v29, 1  ;;  %v1077_v33 = vperm.slane %v1069_v29, 2  ;;  %v1078_v35 = vperm.slane %v1069_v29, 3 }
 0x24a   :  { %v1083_v36 = vadd.f32 %v1075_v38, %v1070_v30  ;;  %v1084_v37 = vadd.f32 %v1076_v32, %v1071_v34  ;;  %v1085_v39 = vadd.f32 %v1077_v33, %v1072_v23  ;;  %v1086_v41 = vadd.f32 %v1078_v35, %v1073_v21 }
 0x24c   :  { %v1087_v12 = vmul.f32 0.2, %v1083_v36  ;;  %v1088_v42 = vmul.f32 0.2, %v1084_v37  ;;  %v1089_v44 = vmul.f32 0.2, %v1085_v39 }
 0x24d   :  { %v1090_v46 = vmul.f32 0.2, %v1086_v41 }
 0x24e   :  { %v6565_v45 = vmax.f32 %v1083_v36, %v1087_v12  ;;  %v6567_v56 = vmax.f32 %v1084_v37, %v1088_v42  ;;  %v6569_v54 = vmax.f32 %v1085_v39, %v1089_v44 }
 0x24f   :  { %v6571_v43 = vmax.f32 %v1086_v41, %v1090_v46 }
 0x250   :  { %6305 = dma.done.wait [#allocation4], 32768 }
 0x251   :  { %6306 = vsyncadd [#allocation4], 4294934528  ;;  %v4672_v40 = vld [vmem:[#allocation2 + $0x1c0] sm:$0xf] }
 0x252   :  { %v5876_v31 = vld [vmem:[#allocation2 + $0x1dc] sm:$0xf0] }
 0x253   :  { %v4928_v58 = vld [vmem:[#allocation2 + $0x3c0] sm:$0xf]  ;;  %v4673_v47 = vor.u32 %v5876_v31, %v4672_v40 }
 0x254   :  { %v5940_v48 = vld [vmem:[#allocation2 + $0x3dc] sm:$0xf0] }
 0x255   :  { %v5440_v49 = vld [vmem:[#allocation2 + $0x7c0] sm:$0xf]  ;;  %v4929_v2 = vor.u32 %v5940_v48, %v4928_v58  ;;  %2657 = vmatpush.bf16.msra.mxu3 %v4673_v47 }
 0x256   :  { %v6068_v50 = vld [vmem:[#allocation2 + $0x7dc] sm:$0xf0] }
 0x257   :  { %v5441_v51 = vor.u32 %v6068_v50, %v5440_v49  ;;  %v5184_v53 = vld [vmem:[#allocation2 + $0x5c0] sm:$0xf]  ;;  %2670 = vmatpush.bf16.msrb.mxu0 %v4929_v2 }
 0x258   :  { %v6004_v57 = vld [vmem:[#allocation2 + $0x5dc] sm:$0xf0] }
 0x259   :  { %v4640_v59 = vld [vmem:[#allocation2 + $0x180] sm:$0xf]  ;;  %v5185_v60 = vor.u32 %v6004_v57, %v5184_v53  ;;  %2696 = vmatpush.bf16.msrb.mxu2 %v5441_v51 }
 0x25a   :  { %v5868_v61 = vld [vmem:[#allocation2 + $0x19c] sm:$0xf0] }
 0x25b   :  { %v4896_v62 = vld [vmem:[#allocation2 + $0x380] sm:$0xf]  ;;  %v4641_v55 = vor.u32 %v5868_v61, %v4640_v59  ;;  %2683 = vmatpush.bf16.msrb.mxu1 %v5185_v60 }
 0x25c   :  { %v5932_v63 = vld [vmem:[#allocation2 + $0x39c] sm:$0xf0] }
 0x25d   :  { %v4897_v0 = vor.u32 %v5932_v63, %v4896_v62  ;;  %v5408_v1 = vld [vmem:[#allocation2 + $0x780] sm:$0xf]  ;;  %2658 = vmatpush.bf16.msra.mxu3 %v4641_v55 }
 0x25e   :  { %v6060_v3 = vld [vmem:[#allocation2 + $0x79c] sm:$0xf0] }
 0x25f   :  { %v5152_v4 = vld [vmem:[#allocation2 + $0x580] sm:$0xf]  ;;  %v5409_v5 = vor.u32 %v6060_v3, %v5408_v1  ;;  %2671 = vmatpush.bf16.msrb.mxu0 %v4897_v0 }
 0x260   :  { %v5996_v6 = vld [vmem:[#allocation2 + $0x59c] sm:$0xf0] }
 0x261   :  { %v4608_v7 = vld [vmem:[#allocation2 + $0x140] sm:$0xf]  ;;  %v5153_v9 = vor.u32 %v5996_v6, %v5152_v4  ;;  %2697 = vmatpush.bf16.msrb.mxu2 %v5409_v5 }
 0x262   :  { %v5860_v8 = vld [vmem:[#allocation2 + $0x15c] sm:$0xf0] }
 0x263   :  { %v4864_v11 = vld [vmem:[#allocation2 + $0x340] sm:$0xf]  ;;  %v4609_v14 = vor.u32 %v5860_v8, %v4608_v7  ;;  %2684 = vmatpush.bf16.msrb.mxu1 %v5153_v9 }
 0x264   :  { %v5924_v10 = vld [vmem:[#allocation2 + $0x35c] sm:$0xf0] }
 0x265   :  { %v5376_v13 = vld [vmem:[#allocation2 + $0x740] sm:$0xf]  ;;  %v4865_v18 = vor.u32 %v5924_v10, %v4864_v11  ;;  %2659 = vmatpush.bf16.msra.mxu3 %v4609_v14 }
 0x266   :  { %v6052_v15 = vld [vmem:[#allocation2 + $0x75c] sm:$0xf0] }
 0x267   :  { %v5120_v16 = vld [vmem:[#allocation2 + $0x540] sm:$0xf]  ;;  %v5377_v19 = vor.u32 %v6052_v15, %v5376_v13  ;;  %2672 = vmatpush.bf16.msrb.mxu0 %v4865_v18  ;;  %v5936_v18 = vld [vmem:[#allocation2 + $0x3c4] sm:$0xf] }
 0x268   :  { %v5988_v17 = vld [vmem:[#allocation2 + $0x55c] sm:$0xf0] }
 0x269   :  { %v4576_v20 = vld [vmem:[#allocation2 + $0x100] sm:$0xf]  ;;  %v5121_v25 = vor.u32 %v5988_v17, %v5120_v16  ;;  %2698 = vmatpush.bf16.msrb.mxu2 %v5377_v19  ;;  %v5872_v16 = vld [vmem:[#allocation2 + $0x1c4] sm:$0xf] }
 0x26a   :  { %v5852_v22 = vld [vmem:[#allocation2 + $0x11c] sm:$0xf0]  ;;  %v4674_v17 = vld [vmem:[#allocation2 + $0x1e0] sm:$0xf0] }
 0x26b   :  { %v4832_v24 = vld [vmem:[#allocation2 + $0x300] sm:$0xf]  ;;  %v4577_v34 = vor.u32 %v5852_v22, %v4576_v20  ;;  %2685 = vmatpush.bf16.msrb.mxu1 %v5121_v25  ;;  %v4930_v19 = vld [vmem:[#allocation2 + $0x3e0] sm:$0xf0] }
 0x26c   :  { %v5916_v26 = vld [vmem:[#allocation2 + $0x31c] sm:$0xf0]  ;;  %v6064_v20 = vld [vmem:[#allocation2 + $0x7c4] sm:$0xf] }
 0x26d   :  { %v5344_v52 = vld [vmem:[#allocation2 + $0x700] sm:$0xf]  ;;  %v4833_v23 = vor.u32 %v5916_v26, %v4832_v24  ;;  %2660 = vmatpush.bf16.msra.mxu3 %v4577_v34  ;;  %v5442_v24 = vld [vmem:[#allocation2 + $0x7e0] sm:$0xf0]  ;;  %v4677_v34 = vor.u32 %v5872_v16, %v4674_v17 }
 0x26e   :  { %v6044_v28 = vld [vmem:[#allocation2 + $0x71c] sm:$0xf0]  ;;  %v5314_v16 = vld [vmem:[#allocation2 + $0x6e0] sm:$0xf0] }
 0x26f   :  { %v5088_v29 = vld [vmem:[#allocation2 + $0x500] sm:$0xf]  ;;  %v5345_v21 = vor.u32 %v6044_v28, %v5344_v52  ;;  %2673 = vmatpush.bf16.msrb.mxu0 %v4833_v23  ;;  %v4933_v23 = vor.u32 %v5936_v18, %v4930_v19  ;;  %v5968_v17 = vld [vmem:[#allocation2 + $0x4c4] sm:$0xf] }
 0x270   :  { %v5980_v30 = vld [vmem:[#allocation2 + $0x51c] sm:$0xf0]  ;;  %v5058_v18 = vld [vmem:[#allocation2 + $0x4e0] sm:$0xf0] }
 0x271   :  { %v4544_v38 = vld [vmem:[#allocation2 + $0xc0] sm:$0xf]  ;;  %v5089_v35 = vor.u32 %v5980_v30, %v5088_v29  ;;  %2699 = vmatpush.bf16.msrb.mxu2 %v5345_v21  ;;  %v6000_v29 = vld [vmem:[#allocation2 + $0x5c4] sm:$0xf] }
 0x272   :  { %v5844_v32 = vld [vmem:[#allocation2 + $0xdc] sm:$0xf0]  ;;  %v5186_v30 = vld [vmem:[#allocation2 + $0x5e0] sm:$0xf0] }
 0x273   :  { %v4800_v33 = vld [vmem:[#allocation2 + $0x2c0] sm:$0xf]  ;;  %v4545_v42 = vor.u32 %v5844_v32, %v4544_v38  ;;  %2686 = vmatpush.bf16.msrb.mxu1 %v5089_v35  ;;  %v5864_v21 = vld [vmem:[#allocation2 + $0x184] sm:$0xf]  ;;  %v5445_v38 = vor.u32 %v6064_v20, %v5442_v24 }
 0x274   :  { %v5908_v36 = vld [vmem:[#allocation2 + $0x2dc] sm:$0xf0]  ;;  %v5928_v35 = vld [vmem:[#allocation2 + $0x384] sm:$0xf] }
 0x275   :  { %v5312_v37 = vld [vmem:[#allocation2 + $0x6c0] sm:$0xf]  ;;  %v4801_v44 = vor.u32 %v5908_v36, %v4800_v33  ;;  %2661 = vmatpush.bf16.msra.mxu3 %v4545_v42  ;;  %v4642_v33 = vld [vmem:[#allocation2 + $0x1a0] sm:$0xf0] }
 0x276   :  { %v6036_v39 = vld [vmem:[#allocation2 + $0x6dc] sm:$0xf0]  ;;  %v4898_v36 = vld [vmem:[#allocation2 + $0x3a0] sm:$0xf0] }
 0x277   :  { %v5056_v41 = vld [vmem:[#allocation2 + $0x4c0] sm:$0xf]  ;;  %v5313_v46 = vor.u32 %v6036_v39, %v5312_v37  ;;  %2674 = vmatpush.bf16.msrb.mxu0 %v4801_v44  ;;  %v5189_v37 = vor.u32 %v6000_v29, %v5186_v30  ;;  %v6056_v39 = vld [vmem:[#allocation2 + $0x784] sm:$0xf] }
 0x278   :  { %v5972_v12 = vld [vmem:[#allocation2 + $0x4dc] sm:$0xf0]  ;;  %v5992_v42 = vld [vmem:[#allocation2 + $0x584] sm:$0xf] }
 0x279   :  { %v4512_v40 = vld [vmem:[#allocation2 + $0x80] sm:$0xf]  ;;  %v5057_v47 = vor.u32 %v5972_v12, %v5056_v41  ;;  %2700 = vmatpush.bf16.msrb.mxu2 %v5313_v46  ;;  %v5410_v41 = vld [vmem:[#allocation2 + $0x7a0] sm:$0xf0]  ;;  %v6575_v12 = vpack.c.bf16 %v6565_v45, %v6565_v45  ;;  %v6579_v46 = vpack.c.bf16 %v6571_v43, %v6571_v43 }
 0x27a   :  { %v5836_v31 = vld [vmem:[#allocation2 + $0x9c] sm:$0xf0]  ;;  %v5154_v44 = vld [vmem:[#allocation2 + $0x5a0] sm:$0xf0]  ;;  %v5413_v45 = vor.u32 %v6056_v39, %v5410_v41 }
 0x27b   :  { %v4768_v58 = vld [vmem:[#allocation2 + $0x280] sm:$0xf]  ;;  %v4513_v53 = vor.u32 %v5836_v31, %v4512_v40  ;;  %2687 = vmatpush.bf16.msrb.mxu1 %v5057_v47  ;;  %v6583_v40 = vpack.c.bf16 %v6567_v56, %v6567_v56  ;;  %v4645_v31 = vor.u32 %v5864_v21, %v4642_v33  ;;  %v5856_v47 = vld [vmem:[#allocation2 + $0x144] sm:$0xf]  ;;  %v5157_v43 = vor.u32 %v5992_v42, %v5154_v44 }
 0x27c   :  { %v5900_v48 = vld [vmem:[#allocation2 + $0x29c] sm:$0xf0]  ;;  %v6048_v56 = vld [vmem:[#allocation2 + $0x744] sm:$0xf] }
 0x27d   :  { %v5280_v49 = vld [vmem:[#allocation2 + $0x680] sm:$0xf]  ;;  %v4769_v57 = vor.u32 %v5900_v48, %v4768_v58  ;;  %2662 = vmatpush.bf16.msra.mxu3 %v4513_v53  ;;  %v4901_v58 = vor.u32 %v5928_v35, %v4898_v36  ;;  %v4610_v48 = vld [vmem:[#allocation2 + $0x160] sm:$0xf0] }
 0x27e   :  { %v6028_v50 = vld [vmem:[#allocation2 + $0x69c] sm:$0xf0]  ;;  %v5984_v53 = vld [vmem:[#allocation2 + $0x544] sm:$0xf] }
 0x27f   :  { %v5024_v2 = vld [vmem:[#allocation2 + $0x480] sm:$0xf]  ;;  %v5281_v59 = vor.u32 %v6028_v50, %v5280_v49  ;;  %2675 = vmatpush.bf16.msrb.mxu0 %v4769_v57  ;;  %v5920_v49 = vld [vmem:[#allocation2 + $0x344] sm:$0xf] }
 0x280   :  { %v5964_v51 = vld [vmem:[#allocation2 + $0x49c] sm:$0xf0]  ;;  %v4866_v50 = vld [vmem:[#allocation2 + $0x360] sm:$0xf0] }
 0x281   :  { %v4480_v60 = vld [vmem:[#allocation2 + $0x40] sm:$0xf]  ;;  %v5025_v63 = vor.u32 %v5964_v51, %v5024_v2  ;;  %2701 = vmatpush.bf16.msrb.mxu2 %v5281_v59  ;;  %v6587_v2 = vpack.c.bf16 %v6569_v54, %v6569_v54  ;;  %v5378_v51 = vld [vmem:[#allocation2 + $0x760] sm:$0xf0]  ;;  %v4613_v59 = vor.u32 %v5856_v47, %v4610_v48 }
 0x282   :  { %v5828_v61 = vld [vmem:[#allocation2 + $0x5c] sm:$0xf0]  ;;  %v5122_v57 = vld [vmem:[#allocation2 + $0x560] sm:$0xf0]  ;;  %v5381_v54 = vor.u32 %v6048_v56, %v5378_v51 }
 0x283   :  { %v4736_v62 = vld [vmem:[#allocation2 + $0x240] sm:$0xf]  ;;  %v4481_v5 = vor.u32 %v5828_v61, %v4480_v60  ;;  %2688 = vmatpush.bf16.msrb.mxu1 %v5025_v63  ;;  %v4869_v60 = vor.u32 %v5920_v49, %v4866_v50  ;;  %v5848_v61 = vld [vmem:[#allocation2 + $0x104] sm:$0xf] }
 0x284   :  { %v5892_v55 = vld [vmem:[#allocation2 + $0x25c] sm:$0xf0]  ;;  %v5912_v63 = vld [vmem:[#allocation2 + $0x304] sm:$0xf] }
 0x285   :  { %v5248_v0 = vld [vmem:[#allocation2 + $0x640] sm:$0xf]  ;;  %v4737_v8 = vor.u32 %v5892_v55, %v4736_v62  ;;  %2663 = vmatpush.bf16.msra.mxu3 %v4481_v5  ;;  %v4578_v62 = vld [vmem:[#allocation2 + $0x120] sm:$0xf0] }
 0x286   :  { %v6020_v1 = vld [vmem:[#allocation2 + $0x65c] sm:$0xf0]  ;;  %v4834_v55 = vld [vmem:[#allocation2 + $0x320] sm:$0xf0] }
 0x287   :  { %v4992_v3 = vld [vmem:[#allocation2 + $0x440] sm:$0xf]  ;;  %v5249_v9 = vor.u32 %v6020_v1, %v5248_v0  ;;  %2676 = vmatpush.bf16.msrb.mxu0 %v4737_v8  ;;  %v5125_v0 = vor.u32 %v5984_v53, %v5122_v57  ;;  %v6040_v1 = vld [vmem:[#allocation2 + $0x704] sm:$0xf]  ;;  %v4680_v57 = vld [vmem:[#allocation2 + $0x1c8] sm:$0xf] }
 0x288   :  { %v5956_v4 = vld [vmem:[#allocation2 + $0x45c] sm:$0xf0]  ;;  %v5090_v5 = vld [vmem:[#allocation2 + $0x520] sm:$0xf0] }
 0x289   :  { %v4448_v6 = vld [vmem:[#allocation2] sm:$0xf]  ;;  %v4993_v14 = vor.u32 %v5956_v4, %v4992_v3  ;;  %2702 = vmatpush.bf16.msrb.mxu2 %v5249_v9  ;;  %v5346_v3 = vld [vmem:[#allocation2 + $0x720] sm:$0xf0] }
 0x28a   :  { %v5820_v7 = vld [vmem:[#allocation2 + $0x1c] sm:$0xf0]  ;;  %v5976_v4 = vld [vmem:[#allocation2 + $0x504] sm:$0xf]  ;;  %v5349_v9 = vor.u32 %v6040_v1, %v5346_v3 }
 0x28b   :  { %v4704_v11 = vld [vmem:[#allocation2 + $0x200] sm:$0xf]  ;;  %v4449_v22 = vor.u32 %v5820_v7, %v4448_v6  ;;  %2689 = vmatpush.bf16.msrb.mxu1 %v4993_v14  ;;  %v4581_v6 = vor.u32 %v5848_v61, %v4578_v62  ;;  %v4837_v7 = vor.u32 %v5912_v63, %v4834_v55  ;;  %v5840_v8 = vld [vmem:[#allocation2 + $0xc4] sm:$0xf]  ;;  %v5093_v14 = vor.u32 %v5976_v4, %v5090_v5  ;;  %v5941_v61 = vld [vmem:[#allocation2 + $0x3e4] sm:$0xf0] }
 0x28c   :  { %v5884_v10 = vld [vmem:[#allocation2 + $0x21c] sm:$0xf0]  ;;  %v6024_v29 = vld [vmem:[#allocation2 + $0x684] sm:$0xf]  ;;  %v6069_v62 = vld [vmem:[#allocation2 + $0x7e4] sm:$0xf0] }
 0x28d   :  { %v5216_v13 = vld [vmem:[#allocation2 + $0x600] sm:$0xf]  ;;  %v4705_v52 = vor.u32 %v5884_v10, %v4704_v11  ;;  %2664 = vmatpush.bf16.msra.mxu3 %v4449_v22  ;;  %v4546_v11 = vld [vmem:[#allocation2 + $0xe0] sm:$0xf0]  ;;  %v5192_v5 = vld [vmem:[#allocation2 + $0x5c8] sm:$0xf] }
 0x28e   :  { %v6012_v15 = vld [vmem:[#allocation2 + $0x61c] sm:$0xf0]  ;;  %v5904_v10 = vld [vmem:[#allocation2 + $0x2c4] sm:$0xf]  ;;  %v4549_v19 = vor.u32 %v5840_v8, %v4546_v11  ;;  %v5869_v11 = vld [vmem:[#allocation2 + $0x1a4] sm:$0xf0] }
 0x28f   :  { %v4960_v25 = vld [vmem:[#allocation2 + $0x400] sm:$0xf]  ;;  %v5217_v28 = vor.u32 %v6012_v15, %v5216_v13  ;;  %2677 = vmatpush.bf16.msrb.mxu0 %v4705_v52  ;;  %v4802_v13 = vld [vmem:[#allocation2 + $0x2e0] sm:$0xf0] }
 0x290   :  { %v5948_v26 = vld [vmem:[#allocation2 + $0x41c] sm:$0xf0]  ;;  %2665 = vmatmul.bf16.vlgmr.msra.gmra.mxu3 %v6575_v12  ;;  %v6032_v15 = vld [vmem:[#allocation2 + $0x6c4] sm:$0xf]  ;;  %v4805_v20 = vor.u32 %v5904_v10, %v4802_v13  ;;  %v4904_v10 = vld [vmem:[#allocation2 + $0x388] sm:$0xf] }
 0x291   :  { %v4961_v32 = vor.u32 %v5948_v26, %v4960_v25  ;;  %2703 = vmatpush.bf16.msrb.mxu2 %v5217_v28  ;;  %2709 = vmatpush.bf16.msrb.mxu3 %v4677_v34  ;;  %v5832_v22 = vld [vmem:[#allocation2 + $0x84] sm:$0xf]  ;;  %v5317_v24 = vor.u32 %v6032_v15, %v5314_v16  ;;  %v5061_v28 = vor.u32 %v5968_v17, %v5058_v18  ;;  %v5416_v15 = vld [vmem:[#allocation2 + $0x788] sm:$0xf] }
 0x292   :  { %2678 = vmatmul.bf16.vlgmr.msrb.gmra.mxu0 %v6583_v40  ;;  %v4514_v25 = vld [vmem:[#allocation2 + $0xa0] sm:$0xf0]  ;;  %v6061_v16 = vld [vmem:[#allocation2 + $0x7a4] sm:$0xf0] }
 0x293   :  { %2722 = vmatpush.bf16.msra.mxu0 %v4933_v23  ;;  %2690 = vmatpush.bf16.msrb.mxu1 %v4961_v32  ;;  %v5896_v26 = vld [vmem:[#allocation2 + $0x284] sm:$0xf]  ;;  %v4517_v21 = vor.u32 %v5832_v22, %v4514_v25  ;;  %v4616_v25 = vld [vmem:[#allocation2 + $0x148] sm:$0xf] }
 0x294   :  { %2704 = vmatmul.bf16.vlgmr.msrb.gmra.mxu2 %v6579_v46  ;;  %v4770_v52 = vld [vmem:[#allocation2 + $0x2a0] sm:$0xf0] }
 0x295   :  { %2748 = vmatpush.bf16.msra.mxu2 %v5445_v38  ;;  %2710 = vmatpush.bf16.msrb.mxu3 %v4645_v31  ;;  %v5282_v30 = vld [vmem:[#allocation2 + $0x6a0] sm:$0xf0]  ;;  %v4773_v38 = vor.u32 %v5896_v26, %v4770_v52  ;;  %v5861_v26 = vld [vmem:[#allocation2 + $0x164] sm:$0xf0] }
 0x296   :  { %2691 = vmatmul.bf16.vlgmr.msrb.gmra.mxu1 %v6587_v2  ;;  %v5960_v34 = vld [vmem:[#allocation2 + $0x484] sm:$0xf]  ;;  %v5285_v33 = vor.u32 %v6024_v29, %v5282_v30  ;;  %v4872_v52 = vld [vmem:[#allocation2 + $0x348] sm:$0xf] }
 0x297   :  { %2735 = vmatpush.bf16.msra.mxu1 %v5189_v37  ;;  %2723 = vmatpush.bf16.msra.mxu0 %v4901_v58  ;;  %v5026_v23 = vld [vmem:[#allocation2 + $0x4a0] sm:$0xf0]  ;;  %v5384_v29 = vld [vmem:[#allocation2 + $0x748] sm:$0xf] }
 0x298   :  { %v5824_v32 = vld [vmem:[#allocation2 + $0x44] sm:$0xf]  ;;  %v5029_v39 = vor.u32 %v5960_v34, %v5026_v23  ;;  %v6053_v30 = vld [vmem:[#allocation2 + $0x764] sm:$0xf0]  ;;  %v4617_v23 = vor.u32 %v5861_v26, %v4616_v25 }
 0x299   :  { %2749 = vmatpush.bf16.msra.mxu2 %v5413_v45  ;;  %2711 = vmatpush.bf16.msrb.mxu3 %v4613_v59  ;;  %v4482_v35 = vld [vmem:[#allocation2 + $0x60] sm:$0xf0]  ;;  %v5877_v59 = vld [vmem:[#allocation2 + $0x1e4] sm:$0xf0] }
 0x29a   :  { %v5888_v36 = vld [vmem:[#allocation2 + $0x244] sm:$0xf]  ;;  %v4485_v58 = vor.u32 %v5824_v32, %v4482_v35  ;;  %v4681_v4 = vor.u32 %v5877_v59, %v4680_v57  ;;  %v4584_v35 = vld [vmem:[#allocation2 + $0x108] sm:$0xf] }
 0x29b   :  { %2736 = vmatpush.bf16.msra.mxu1 %v5157_v43  ;;  %2724 = vmatpush.bf16.msra.mxu0 %v4869_v60  ;;  %v4738_v37 = vld [vmem:[#allocation2 + $0x260] sm:$0xf0]  ;;  %v4936_v60 = vld [vmem:[#allocation2 + $0x3c8] sm:$0xf] }
 0x29c   :  { %v6016_v41 = vld [vmem:[#allocation2 + $0x644] sm:$0xf]  ;;  %v4741_v47 = vor.u32 %v5888_v36, %v4738_v37  ;;  %v5853_v36 = vld [vmem:[#allocation2 + $0x124] sm:$0xf0] }
 0x29d   :  { %2750 = vmatpush.bf16.msra.mxu2 %v5381_v54  ;;  %2712 = vmatpush.bf16.msrb.mxu3 %v4581_v6  ;;  %v5250_v42 = vld [vmem:[#allocation2 + $0x660] sm:$0xf0]  ;;  %v5448_v54 = vld [vmem:[#allocation2 + $0x7c8] sm:$0xf] }
 0x29e   :  { %v5952_v44 = vld [vmem:[#allocation2 + $0x444] sm:$0xf]  ;;  %v5253_v50 = vor.u32 %v6016_v41, %v5250_v42  ;;  %v6005_v6 = vld [vmem:[#allocation2 + $0x5e4] sm:$0xf0]  ;;  %v5449_v8 = vor.u32 %v6069_v62, %v5448_v54 }
 0x29f   :  { %2737 = vmatpush.bf16.msra.mxu1 %v5125_v0  ;;  %2725 = vmatpush.bf16.msra.mxu0 %v4837_v7  ;;  %v4994_v31 = vld [vmem:[#allocation2 + $0x460] sm:$0xf0]  ;;  %v4937_v7 = vor.u32 %v5941_v61, %v4936_v60  ;;  %v5193_v17 = vor.u32 %v6005_v6, %v5192_v5  ;;  %v4840_v37 = vld [vmem:[#allocation2 + $0x308] sm:$0xf] }
 0x2a0   :  { %v5816_v45 = vld [vmem:[#allocation2 + $0x4] sm:$0xf]  ;;  %v4997_v53 = vor.u32 %v5952_v44, %v4994_v31  ;;  %v5352_v41 = vld [vmem:[#allocation2 + $0x708] sm:$0xf]  ;;  %v4585_v31 = vor.u32 %v5853_v36, %v4584_v35  ;;  %v6065_v35 = vld [vmem:[#allocation2 + $0x7cc] sm:$0xf] }
 0x2a1   :  { %2751 = vmatpush.bf16.msra.mxu2 %v5349_v9  ;;  %2713 = vmatpush.bf16.msrb.mxu3 %v4549_v19  ;;  %v4450_v48 = vld [vmem:[#allocation2 + $0x20] sm:$0xf0]  ;;  %v4648_v9 = vld [vmem:[#allocation2 + $0x188] sm:$0xf] }
 0x2a2   :  { %v5880_v49 = vld [vmem:[#allocation2 + $0x204] sm:$0xf]  ;;  %v4453_v63 = vor.u32 %v5816_v45, %v4450_v48  ;;  %v4649_v18 = vor.u32 %v5869_v11, %v4648_v9  ;;  %v5160_v19 = vld [vmem:[#allocation2 + $0x588] sm:$0xf] }
 0x2a3   :  { %2738 = vmatpush.bf16.msra.mxu1 %v5093_v14  ;;  %2726 = vmatpush.bf16.msra.mxu0 %v4805_v20  ;;  %v4706_v43 = vld [vmem:[#allocation2 + $0x220] sm:$0xf0]  ;;  %v5933_v14 = vld [vmem:[#allocation2 + $0x3a4] sm:$0xf0] }
 0x2a4   :  { %v6008_v56 = vld [vmem:[#allocation2 + $0x604] sm:$0xf]  ;;  %v4709_v55 = vor.u32 %v5880_v49, %v4706_v43  ;;  %v5997_v20 = vld [vmem:[#allocation2 + $0x5a4] sm:$0xf0]  ;;  %v4905_v22 = vor.u32 %v5933_v14, %v4904_v10 }
 0x2a5   :  { %2752 = vmatpush.bf16.msra.mxu2 %v5317_v24  ;;  %2714 = vmatpush.bf16.msrb.mxu3 %v4517_v21  ;;  %v5218_v51 = vld [vmem:[#allocation2 + $0x620] sm:$0xf0]  ;;  %v5417_v24 = vor.u32 %v6061_v16, %v5416_v15  ;;  %v5161_v34 = vor.u32 %v5997_v20, %v5160_v19  ;;  %v5128_v21 = vld [vmem:[#allocation2 + $0x548] sm:$0xf] }
 0x2a6   :  { %v5944_v0 = vld [vmem:[#allocation2 + $0x404] sm:$0xf]  ;;  %v5221_v3 = vor.u32 %v6008_v56, %v5218_v51  ;;  %v6045_v42 = vld [vmem:[#allocation2 + $0x724] sm:$0xf0] }
 0x2a7   :  { %2739 = vmatpush.bf16.msra.mxu1 %v5061_v28  ;;  %2727 = vmatpush.bf16.msra.mxu0 %v4773_v38  ;;  %v4962_v1 = vld [vmem:[#allocation2 + $0x420] sm:$0xf0]  ;;  %v5925_v28 = vld [vmem:[#allocation2 + $0x364] sm:$0xf0]  ;;  %v5353_v48 = vor.u32 %v6045_v42, %v5352_v41 }
 0x2a8   :  { %v4965_v13 = vor.u32 %v5944_v0, %v4962_v1  ;;  %v5989_v38 = vld [vmem:[#allocation2 + $0x564] sm:$0xf0]  ;;  %v4873_v32 = vor.u32 %v5925_v28, %v4872_v52 }
 0x2a9   :  { %2753 = vmatpush.bf16.msra.mxu2 %v5285_v33  ;;  %2715 = vmatpush.bf16.msrb.mxu3 %v4485_v58  ;;  %v5385_v33 = vor.u32 %v6053_v30, %v5384_v29  ;;  %v5129_v44 = vor.u32 %v5989_v38, %v5128_v21  ;;  %v5096_v58 = vld [vmem:[#allocation2 + $0x508] sm:$0xf]  ;;  %v4682_v21 = vld [vmem:[#allocation2 + $0x1e8] sm:$0xf0] }
 0x2aa   :  { %v4552_v49 = vld [vmem:[#allocation2 + $0xc8] sm:$0xf] }
 0x2ab   :  { %2740 = vmatpush.bf16.msra.mxu1 %v5029_v39  ;;  %2728 = vmatpush.bf16.msra.mxu0 %v4741_v47  ;;  %v5917_v39 = vld [vmem:[#allocation2 + $0x324] sm:$0xf0] }
 0x2ac   :  { %v5981_v47 = vld [vmem:[#allocation2 + $0x524] sm:$0xf0]  ;;  %v4841_v45 = vor.u32 %v5917_v39, %v4840_v37  ;;  %v5450_v37 = vld [vmem:[#allocation2 + $0x7e8] sm:$0xf0] }
 0x2ad   :  { %2754 = vmatpush.bf16.msra.mxu2 %v5253_v50  ;;  %2716 = vmatpush.bf16.msrb.mxu3 %v4453_v63  ;;  %v5845_v50 = vld [vmem:[#allocation2 + $0xe4] sm:$0xf0]  ;;  %v5097_v57 = vor.u32 %v5981_v47, %v5096_v58  ;;  %v5194_v58 = vld [vmem:[#allocation2 + $0x5e8] sm:$0xf0] }
 0x2ae   :  { %v4808_v43 = vld [vmem:[#allocation2 + $0x2c8] sm:$0xf]  ;;  %v4553_v59 = vor.u32 %v5845_v50, %v4552_v49  ;;  %v5453_v49 = vor.u32 %v6065_v35, %v5450_v37 }
 0x2af   :  { %2741 = vmatpush.bf16.msra.mxu1 %v4997_v53  ;;  %2729 = vmatpush.bf16.msra.mxu0 %v4709_v55  ;;  %v5909_v56 = vld [vmem:[#allocation2 + $0x2e4] sm:$0xf0] }
 0x2b0   :  { %2717 = vmatmul.bf16.vlgmr.msrb.gmra.mxu3 %v6575_v12  ;;  %v5320_v51 = vld [vmem:[#allocation2 + $0x6c8] sm:$0xf]  ;;  %v4809_v54 = vor.u32 %v5909_v56, %v4808_v43  ;;  %v4650_v43 = vld [vmem:[#allocation2 + $0x1a8] sm:$0xf0] }
 0x2b1   :  { %2755 = vmatpush.bf16.msra.mxu2 %v5221_v3  ;;  %2761 = vmatpush.bf16.msra.mxu3 %v4681_v4  ;;  %v6037_v53 = vld [vmem:[#allocation2 + $0x6e4] sm:$0xf0]  ;;  %v5929_v56 = vld [vmem:[#allocation2 + $0x38c] sm:$0xf] }
 0x2b2   :  { %2730 = vmatmul.bf16.vlgmr.msra.gmra.mxu0 %v6583_v40  ;;  %v5064_v60 = vld [vmem:[#allocation2 + $0x4c8] sm:$0xf]  ;;  %v5321_v62 = vor.u32 %v6037_v53, %v5320_v51  ;;  %v4906_v51 = vld [vmem:[#allocation2 + $0x3a8] sm:$0xf0] }
 0x2b3   :  { %2774 = vmatpush.bf16.msrb.mxu0 %v4937_v7  ;;  %2742 = vmatpush.bf16.msra.mxu1 %v4965_v13  ;;  %v5973_v61 = vld [vmem:[#allocation2 + $0x4e4] sm:$0xf0] }
 0x2b4   :  { %2756 = vmatmul.bf16.vlgmr.msra.gmra.mxu2 %v6579_v46  ;;  %v4520_v63 = vld [vmem:[#allocation2 + $0x88] sm:$0xf]  ;;  %v5065_v5 = vor.u32 %v5973_v61, %v5064_v60  ;;  %v5993_v60 = vld [vmem:[#allocation2 + $0x58c] sm:$0xf] }
 0x2b5   :  { %2800 = vmatpush.bf16.msrb.mxu2 %v5449_v8  ;;  %2762 = vmatpush.bf16.msra.mxu3 %v4649_v18  ;;  %v5837_v55 = vld [vmem:[#allocation2 + $0xa4] sm:$0xf0]  ;;  %v5162_v61 = vld [vmem:[#allocation2 + $0x5a8] sm:$0xf0] }
 0x2b6   :  { %2743 = vmatmul.bf16.vlgmr.msra.gmra.mxu1 %v6587_v2  ;;  %v4776_v0 = vld [vmem:[#allocation2 + $0x288] sm:$0xf]  ;;  %v4521_v6 = vor.u32 %v5837_v55, %v4520_v63  ;;  %v5857_v63 = vld [vmem:[#allocation2 + $0x14c] sm:$0xf] }
 0x2b7   :  { %2787 = vmatpush.bf16.msrb.mxu1 %v5193_v17  ;;  %2775 = vmatpush.bf16.msrb.mxu0 %v4905_v22  ;;  %v5901_v1 = vld [vmem:[#allocation2 + $0x2a4] sm:$0xf0] }
 0x2b8   :  { %v5288_v3 = vld [vmem:[#allocation2 + $0x688] sm:$0xf]  ;;  %v4777_v9 = vor.u32 %v5901_v1, %v4776_v0  ;;  %v4618_v0 = vld [vmem:[#allocation2 + $0x168] sm:$0xf0] }
 0x2b9   :  { %2801 = vmatpush.bf16.msrb.mxu2 %v5417_v24  ;;  %2763 = vmatpush.bf16.msra.mxu3 %v4617_v23  ;;  %v6029_v4 = vld [vmem:[#allocation2 + $0x6a4] sm:$0xf0]  ;;  %v5873_v23 = vld [vmem:[#allocation2 + $0x1cc] sm:$0xf] }
 0x2ba   :  { %v5032_v7 = vld [vmem:[#allocation2 + $0x488] sm:$0xf]  ;;  %v5289_v11 = vor.u32 %v6029_v4, %v5288_v3  ;;  %v4685_v47 = vor.u32 %v5873_v23, %v4682_v21  ;;  %v5921_v1 = vld [vmem:[#allocation2 + $0x34c] sm:$0xf]  ;;  %v5165_v4 = vor.u32 %v5993_v60, %v5162_v61 }
 0x2bb   :  { %2788 = vmatpush.bf16.msrb.mxu1 %v5161_v34  ;;  %2776 = vmatpush.bf16.msrb.mxu0 %v4873_v32  ;;  %v5965_v8 = vld [vmem:[#allocation2 + $0x4a4] sm:$0xf0]  ;;  %v5937_v32 = vld [vmem:[#allocation2 + $0x3cc] sm:$0xf] }
 0x2bc   :  { %v4488_v10 = vld [vmem:[#allocation2 + $0x48] sm:$0xf]  ;;  %v5033_v18 = vor.u32 %v5965_v8, %v5032_v7  ;;  %v4874_v3 = vld [vmem:[#allocation2 + $0x368] sm:$0xf0] }
 0x2bd   :  { %2802 = vmatpush.bf16.msrb.mxu2 %v5385_v33  ;;  %2764 = vmatpush.bf16.msra.mxu3 %v4585_v31  ;;  %v5829_v13 = vld [vmem:[#allocation2 + $0x64] sm:$0xf0]  ;;  %v4938_v33 = vld [vmem:[#allocation2 + $0x3e8] sm:$0xf0] }
 0x2be   :  { %v4744_v14 = vld [vmem:[#allocation2 + $0x248] sm:$0xf]  ;;  %v4489_v20 = vor.u32 %v5829_v13, %v4488_v10  ;;  %v6001_v31 = vld [vmem:[#allocation2 + $0x5cc] sm:$0xf] }
 0x2bf   :  { %2789 = vmatpush.bf16.msrb.mxu1 %v5129_v44  ;;  %2777 = vmatpush.bf16.msrb.mxu0 %v4841_v45  ;;  %v5893_v15 = vld [vmem:[#allocation2 + $0x264] sm:$0xf0]  ;;  %v4941_v45 = vor.u32 %v5937_v32, %v4938_v33  ;;  %v5197_v53 = vor.u32 %v6001_v31, %v5194_v58  ;;  %v5985_v7 = vld [vmem:[#allocation2 + $0x54c] sm:$0xf] }
 0x2c0   :  { %v5256_v16 = vld [vmem:[#allocation2 + $0x648] sm:$0xf]  ;;  %v4745_v26 = vor.u32 %v5893_v15, %v4744_v14  ;;  %v5130_v8 = vld [vmem:[#allocation2 + $0x568] sm:$0xf0] }
 0x2c1   :  { %2803 = vmatpush.bf16.msrb.mxu2 %v5353_v48  ;;  %2765 = vmatpush.bf16.msra.mxu3 %v4553_v59  ;;  %v6021_v17 = vld [vmem:[#allocation2 + $0x664] sm:$0xf0]  ;;  %v5865_v48 = vld [vmem:[#allocation2 + $0x18c] sm:$0xf] }
 0x2c2   :  { %v5000_v19 = vld [vmem:[#allocation2 + $0x448] sm:$0xf]  ;;  %v5257_v52 = vor.u32 %v6021_v17, %v5256_v16  ;;  %v5418_v59 = vld [vmem:[#allocation2 + $0x7a8] sm:$0xf0]  ;;  %v5133_v17 = vor.u32 %v5985_v7, %v5130_v8  ;;  %v4688_v8 = vld [vmem:[#allocation2 + $0x1d0] sm:$0xf] }
 0x2c3   :  { %2790 = vmatpush.bf16.msrb.mxu1 %v5097_v57  ;;  %2778 = vmatpush.bf16.msrb.mxu0 %v4809_v54  ;;  %v5957_v22 = vld [vmem:[#allocation2 + $0x464] sm:$0xf0]  ;;  %v6057_v57 = vld [vmem:[#allocation2 + $0x78c] sm:$0xf]  ;;  %v4653_v54 = vor.u32 %v5865_v48, %v4650_v43 }
 0x2c4   :  { %v4456_v24 = vld [vmem:[#allocation2 + $0x8] sm:$0xf]  ;;  %v5001_v38 = vor.u32 %v5957_v22, %v5000_v19  ;;  %v5421_v55 = vor.u32 %v6057_v57, %v5418_v59  ;;  %v5849_v10 = vld [vmem:[#allocation2 + $0x10c] sm:$0xf] }
 0x2c5   :  { %2804 = vmatpush.bf16.msrb.mxu2 %v5321_v62  ;;  %2766 = vmatpush.bf16.msra.mxu3 %v4521_v6  ;;  %v5821_v25 = vld [vmem:[#allocation2 + $0x24] sm:$0xf0]  ;;  %v4909_v62 = vor.u32 %v5929_v56, %v4906_v51  ;;  %v5386_v6 = vld [vmem:[#allocation2 + $0x768] sm:$0xf0] }
 0x2c6   :  { %v4712_v28 = vld [vmem:[#allocation2 + $0x208] sm:$0xf]  ;;  %v4457_v36 = vor.u32 %v5821_v25, %v4456_v24  ;;  %v4586_v14 = vld [vmem:[#allocation2 + $0x128] sm:$0xf0] }
 0x2c7   :  { %2791 = vmatpush.bf16.msrb.mxu1 %v5065_v5  ;;  %2779 = vmatpush.bf16.msrb.mxu0 %v4777_v9  ;;  %v5885_v29 = vld [vmem:[#allocation2 + $0x224] sm:$0xf0]  ;;  %v6049_v5 = vld [vmem:[#allocation2 + $0x74c] sm:$0xf]  ;;  %v4621_v9 = vor.u32 %v5857_v63, %v4618_v0  ;;  %v4589_v24 = vor.u32 %v5849_v10, %v4586_v14  ;;  %v5942_v10 = vld [vmem:[#allocation2 + $0x3ec] sm:$0xf0] }
 0x2c8   :  { %v5224_v30 = vld [vmem:[#allocation2 + $0x608] sm:$0xf]  ;;  %v4713_v42 = vor.u32 %v5885_v29, %v4712_v28  ;;  %v5389_v13 = vor.u32 %v6049_v5, %v5386_v6  ;;  %v5913_v15 = vld [vmem:[#allocation2 + $0x30c] sm:$0xf]  ;;  %v6070_v14 = vld [vmem:[#allocation2 + $0x7ec] sm:$0xf0] }
 0x2c9   :  { %2805 = vmatpush.bf16.msrb.mxu2 %v5289_v11  ;;  %v6013_v34 = vld [vmem:[#allocation2 + $0x624] sm:$0xf0]  ;;  %2767 = vmatpush.bf16.msra.mxu3 %v4489_v20  ;;  %v4877_v11 = vor.u32 %v5921_v1, %v4874_v3  ;;  %v4842_v16 = vld [vmem:[#allocation2 + $0x328] sm:$0xf0] }
 0x2ca   :  { %v4968_v39 = vld [vmem:[#allocation2 + $0x408] sm:$0xf]  ;;  %v5225_v44 = vor.u32 %v6013_v34, %v5224_v30  ;;  %v5354_v19 = vld [vmem:[#allocation2 + $0x728] sm:$0xf0]  ;;  %v4845_v25 = vor.u32 %v5913_v15, %v4842_v16 }
 0x2cb   :  { %2792 = vmatpush.bf16.msrb.mxu1 %v5033_v18  ;;  %v5949_v41 = vld [vmem:[#allocation2 + $0x424] sm:$0xf0]  ;;  %2780 = vmatpush.bf16.msrb.mxu0 %v4745_v26  ;;  %v6041_v18 = vld [vmem:[#allocation2 + $0x70c] sm:$0xf] }
 0x2cc   :  { %v4969_v50 = vor.u32 %v5949_v41, %v4968_v39  ;;  %v5977_v20 = vld [vmem:[#allocation2 + $0x50c] sm:$0xf] }
 0x2cd   :  { %2806 = vmatpush.bf16.msrb.mxu2 %v5257_v52  ;;  %2768 = vmatpush.bf16.msra.mxu3 %v4457_v36  ;;  %v5098_v22 = vld [vmem:[#allocation2 + $0x528] sm:$0xf0]  ;;  %v5357_v52 = vor.u32 %v6041_v18, %v5354_v19 }
 0x2ce   :  { %v5841_v26 = vld [vmem:[#allocation2 + $0xcc] sm:$0xf]  ;;  %v5101_v34 = vor.u32 %v5977_v20, %v5098_v22  ;;  %v5200_v22 = vld [vmem:[#allocation2 + $0x5d0] sm:$0xf] }
 0x2cf   :  { %2793 = vmatpush.bf16.msrb.mxu1 %v5001_v38  ;;  %2781 = vmatpush.bf16.msrb.mxu0 %v4713_v42  ;;  %v4554_v28 = vld [vmem:[#allocation2 + $0xe8] sm:$0xf0] }
 0x2d0   :  { %2769 = vmatmul.bf16.vlgmr.msra.gmra.mxu3 %v6575_v12  ;;  %v5905_v29 = vld [vmem:[#allocation2 + $0x2cc] sm:$0xf]  ;;  %v4557_v33 = vor.u32 %v5841_v26, %v4554_v28  ;;  %v5870_v28 = vld [vmem:[#allocation2 + $0x1ac] sm:$0xf0] }
 0x2d1   :  { %2807 = vmatpush.bf16.msrb.mxu2 %v5225_v44  ;;  %2813 = vmatpush.bf16.msrb.mxu3 %v4685_v47  ;;  %v4810_v30 = vld [vmem:[#allocation2 + $0x2e8] sm:$0xf0] }
 0x2d2   :  { %2782 = vmatmul.bf16.vlgmr.msrb.gmra.mxu0 %v6583_v40  ;;  %v6033_v23 = vld [vmem:[#allocation2 + $0x6cc] sm:$0xf]  ;;  %v4813_v35 = vor.u32 %v5905_v29, %v4810_v30  ;;  %v4912_v29 = vld [vmem:[#allocation2 + $0x390] sm:$0xf] }
 0x2d3   :  { %2826 = vmatpush.bf16.msra.mxu0 %v4941_v45  ;;  %2794 = vmatpush.bf16.msrb.mxu1 %v4969_v50  ;;  %v5322_v21 = vld [vmem:[#allocation2 + $0x6e8] sm:$0xf0] }
 0x2d4   :  { %2808 = vmatmul.bf16.vlgmr.msrb.gmra.mxu2 %v6579_v46  ;;  %v5969_v38 = vld [vmem:[#allocation2 + $0x4cc] sm:$0xf]  ;;  %v5325_v37 = vor.u32 %v6033_v23, %v5322_v21  ;;  %v5424_v23 = vld [vmem:[#allocation2 + $0x790] sm:$0xf] }
 0x2d5   :  { %2852 = vmatpush.bf16.msra.mxu2 %v5453_v49  ;;  %2814 = vmatpush.bf16.msrb.mxu3 %v4653_v54  ;;  %v5066_v32 = vld [vmem:[#allocation2 + $0x4e8] sm:$0xf0]  ;;  %v6062_v21 = vld [vmem:[#allocation2 + $0x7ac] sm:$0xf0] }
 0x2d6   :  { %2795 = vmatmul.bf16.vlgmr.msrb.gmra.mxu1 %v6587_v2  ;;  %v5833_v36 = vld [vmem:[#allocation2 + $0x8c] sm:$0xf]  ;;  %v5069_v44 = vor.u32 %v5969_v38, %v5066_v32 }
 0x2d7   :  { %2839 = vmatpush.bf16.msra.mxu1 %v5197_v53  ;;  %2827 = vmatpush.bf16.msra.mxu0 %v4909_v62  ;;  %v4522_v39 = vld [vmem:[#allocation2 + $0xa8] sm:$0xf0] }
 0x2d8   :  { %v5897_v41 = vld [vmem:[#allocation2 + $0x28c] sm:$0xf]  ;;  %v4525_v48 = vor.u32 %v5833_v36, %v4522_v39  ;;  %v4624_v39 = vld [vmem:[#allocation2 + $0x150] sm:$0xf] }
 0x2d9   :  { %2853 = vmatpush.bf16.msra.mxu2 %v5421_v55  ;;  %2815 = vmatpush.bf16.msrb.mxu3 %v4621_v9  ;;  %v4778_v42 = vld [vmem:[#allocation2 + $0x2a8] sm:$0xf0]  ;;  %v5878_v9 = vld [vmem:[#allocation2 + $0x1ec] sm:$0xf0] }
 0x2da   :  { %v6025_v31 = vld [vmem:[#allocation2 + $0x68c] sm:$0xf]  ;;  %v4781_v49 = vor.u32 %v5897_v41, %v4778_v42  ;;  %v4689_v20 = vor.u32 %v5878_v9, %v4688_v8  ;;  %v5862_v41 = vld [vmem:[#allocation2 + $0x16c] sm:$0xf0] }
 0x2db   :  { %2840 = vmatpush.bf16.msra.mxu1 %v5165_v4  ;;  %2828 = vmatpush.bf16.msra.mxu0 %v4877_v11  ;;  %v5290_v58 = vld [vmem:[#allocation2 + $0x6a8] sm:$0xf0]  ;;  %v4944_v11 = vld [vmem:[#allocation2 + $0x3d0] sm:$0xf] }
 0x2dc   :  { %v5961_v47 = vld [vmem:[#allocation2 + $0x48c] sm:$0xf]  ;;  %v5293_v43 = vor.u32 %v6025_v31, %v5290_v58  ;;  %v4880_v42 = vld [vmem:[#allocation2 + $0x350] sm:$0xf] }
 0x2dd   :  { %2854 = vmatpush.bf16.msra.mxu2 %v5389_v13  ;;  %2816 = vmatpush.bf16.msrb.mxu3 %v4589_v24  ;;  %v5034_v45 = vld [vmem:[#allocation2 + $0x4a8] sm:$0xf0]  ;;  %v5456_v13 = vld [vmem:[#allocation2 + $0x7d0] sm:$0xf] }
 0x2de   :  { %v5825_v50 = vld [vmem:[#allocation2 + $0x4c] sm:$0xf]  ;;  %v5037_v57 = vor.u32 %v5961_v47, %v5034_v45  ;;  %v6006_v24 = vld [vmem:[#allocation2 + $0x5ec] sm:$0xf0]  ;;  %v5457_v26 = vor.u32 %v6070_v14, %v5456_v13  ;;  %v4625_v45 = vor.u32 %v5862_v41, %v4624_v39 }
 0x2df   :  { %2841 = vmatpush.bf16.msra.mxu1 %v5133_v17  ;;  %2829 = vmatpush.bf16.msra.mxu0 %v4845_v25  ;;  %v4490_v56 = vld [vmem:[#allocation2 + $0x68] sm:$0xf0]  ;;  %v4945_v25 = vor.u32 %v5942_v10, %v4944_v11  ;;  %v5201_v38 = vor.u32 %v6006_v24, %v5200_v22  ;;  %v5392_v31 = vld [vmem:[#allocation2 + $0x750] sm:$0xf] }
 0x2e0   :  { %v5889_v51 = vld [vmem:[#allocation2 + $0x24c] sm:$0xf]  ;;  %v4493_v62 = vor.u32 %v5825_v50, %v4490_v56  ;;  %v6054_v58 = vld [vmem:[#allocation2 + $0x76c] sm:$0xf0] }
 0x2e1   :  { %2855 = vmatpush.bf16.msra.mxu2 %v5357_v52  ;;  %2817 = vmatpush.bf16.msrb.mxu3 %v4557_v33  ;;  %v4746_v53 = vld [vmem:[#allocation2 + $0x268] sm:$0xf0]  ;;  %v4656_v52 = vld [vmem:[#allocation2 + $0x190] sm:$0xf] }
 0x2e2   :  { %v6017_v59 = vld [vmem:[#allocation2 + $0x64c] sm:$0xf]  ;;  %v4749_v63 = vor.u32 %v5889_v51, %v4746_v53  ;;  %v4657_v32 = vor.u32 %v5870_v28, %v4656_v52  ;;  %v5168_v33 = vld [vmem:[#allocation2 + $0x590] sm:$0xf] }
 0x2e3   :  { %2842 = vmatpush.bf16.msra.mxu1 %v5101_v34  ;;  %2830 = vmatpush.bf16.msra.mxu0 %v4813_v35  ;;  %v5258_v60 = vld [vmem:[#allocation2 + $0x668] sm:$0xf0]  ;;  %v5934_v34 = vld [vmem:[#allocation2 + $0x3ac] sm:$0xf0] }
 0x2e4   :  { %v5953_v61 = vld [vmem:[#allocation2 + $0x44c] sm:$0xf]  ;;  %v5261_v3 = vor.u32 %v6017_v59, %v5258_v60  ;;  %v5998_v35 = vld [vmem:[#allocation2 + $0x5ac] sm:$0xf0]  ;;  %v4913_v36 = vor.u32 %v5934_v34, %v4912_v29 }
 0x2e5   :  { %2856 = vmatpush.bf16.msra.mxu2 %v5325_v37  ;;  %v5002_v54 = vld [vmem:[#allocation2 + $0x468] sm:$0xf0]  ;;  %2818 = vmatpush.bf16.msrb.mxu3 %v4525_v48  ;;  %v5425_v37 = vor.u32 %v6062_v21, %v5424_v23  ;;  %v5169_v47 = vor.u32 %v5998_v35, %v5168_v33  ;;  %v5136_v48 = vld [vmem:[#allocation2 + $0x550] sm:$0xf] }
 0x2e6   :  { %v5817_v55 = vld [vmem:[#allocation2 + $0xc] sm:$0xf]  ;;  %v5005_v7 = vor.u32 %v5953_v61, %v5002_v54  ;;  %v4592_v56 = vld [vmem:[#allocation2 + $0x110] sm:$0xf] }
 0x2e7   :  { %2843 = vmatpush.bf16.msra.mxu1 %v5069_v44  ;;  %2831 = vmatpush.bf16.msra.mxu0 %v4781_v49  ;;  %v4458_v0 = vld [vmem:[#allocation2 + $0x28] sm:$0xf0]  ;;  %v5926_v44 = vld [vmem:[#allocation2 + $0x36c] sm:$0xf0] }
 0x2e8   :  { %v5881_v1 = vld [vmem:[#allocation2 + $0x20c] sm:$0xf]  ;;  %v4461_v15 = vor.u32 %v5817_v55, %v4458_v0  ;;  %v5990_v49 = vld [vmem:[#allocation2 + $0x56c] sm:$0xf0]  ;;  %v4881_v50 = vor.u32 %v5926_v44, %v4880_v42 }
 0x2e9   :  { %2857 = vmatpush.bf16.msra.mxu2 %v5293_v43  ;;  %v4714_v4 = vld [vmem:[#allocation2 + $0x228] sm:$0xf0]  ;;  %2819 = vmatpush.bf16.msrb.mxu3 %v4493_v62  ;;  %v5393_v43 = vor.u32 %v6054_v58, %v5392_v31  ;;  %v5854_v51 = vld [vmem:[#allocation2 + $0x12c] sm:$0xf0]  ;;  %v5137_v61 = vor.u32 %v5990_v49, %v5136_v48  ;;  %v4690_v48 = vld [vmem:[#allocation2 + $0x1f0] sm:$0xf0] }
 0x2ea   :  { %v6009_v5 = vld [vmem:[#allocation2 + $0x60c] sm:$0xf]  ;;  %v4717_v16 = vor.u32 %v5881_v1, %v4714_v4  ;;  %v4848_v53 = vld [vmem:[#allocation2 + $0x310] sm:$0xf]  ;;  %v4593_v54 = vor.u32 %v5854_v51, %v4592_v56  ;;  %v6066_v56 = vld [vmem:[#allocation2 + $0x7d4] sm:$0xf] }
 0x2eb   :  { %v5226_v6 = vld [vmem:[#allocation2 + $0x628] sm:$0xf0]  ;;  %2844 = vmatpush.bf16.msra.mxu1 %v5037_v57  ;;  %2832 = vmatpush.bf16.msra.mxu0 %v4749_v63  ;;  %v5918_v57 = vld [vmem:[#allocation2 + $0x32c] sm:$0xf0] }
 0x2ec   :  { %v5945_v17 = vld [vmem:[#allocation2 + $0x40c] sm:$0xf]  ;;  %v5229_v19 = vor.u32 %v6009_v5, %v5226_v6  ;;  %v5360_v59 = vld [vmem:[#allocation2 + $0x710] sm:$0xf]  ;;  %v4849_v55 = vor.u32 %v5918_v57, %v4848_v53  ;;  %v5458_v53 = vld [vmem:[#allocation2 + $0x7f0] sm:$0xf0] }
 0x2ed   :  { %v4970_v18 = vld [vmem:[#allocation2 + $0x428] sm:$0xf0]  ;;  %2858 = vmatpush.bf16.msra.mxu2 %v5261_v3  ;;  %2820 = vmatpush.bf16.msrb.mxu3 %v4461_v15  ;;  %v6046_v60 = vld [vmem:[#allocation2 + $0x72c] sm:$0xf0] }
 0x2ee   :  { %v4973_v30 = vor.u32 %v5945_v17, %v4970_v18  ;;  %v5104_v62 = vld [vmem:[#allocation2 + $0x510] sm:$0xf]  ;;  %v5361_v0 = vor.u32 %v6046_v60, %v5360_v59 }
 0x2ef   :  { %2845 = vmatpush.bf16.msra.mxu1 %v5005_v7  ;;  %2833 = vmatpush.bf16.msra.mxu0 %v4717_v16  ;;  %v5982_v63 = vld [vmem:[#allocation2 + $0x52c] sm:$0xf0] }
 0x2f0   :  { %2821 = vmatmul.bf16.vlgmr.msrb.gmra.mxu3 %v6575_v12  ;;  %v4560_v1 = vld [vmem:[#allocation2 + $0xd0] sm:$0xf]  ;;  %v5105_v8 = vor.u32 %v5982_v63, %v5104_v62  ;;  %v5202_v62 = vld [vmem:[#allocation2 + $0x5f0] sm:$0xf0] }
 0x2f1   :  { %2859 = vmatpush.bf16.msra.mxu2 %v5229_v19  ;;  %2865 = vmatpush.bf16.msra.mxu3 %v4689_v20  ;;  %v5846_v3 = vld [vmem:[#allocation2 + $0xec] sm:$0xf0] }
 0x2f2   :  { %2834 = vmatmul.bf16.vlgmr.msra.gmra.mxu0 %v6583_v40  ;;  %v4816_v4 = vld [vmem:[#allocation2 + $0x2d0] sm:$0xf]  ;;  %v4561_v9 = vor.u32 %v5846_v3, %v4560_v1  ;;  %v5461_v1 = vor.u32 %v6066_v56, %v5458_v53  ;;  %v5074_v56 = vld [vmem:[#allocation2 + $0x4f0] sm:$0xf0] }
 0x2f3   :  { %2878 = vmatpush.bf16.msrb.mxu0 %v4945_v25  ;;  %2846 = vmatpush.bf16.msra.mxu1 %v4973_v30  ;;  %v5910_v5 = vld [vmem:[#allocation2 + $0x2ec] sm:$0xf0] }
 0x2f4   :  { %2860 = vmatmul.bf16.vlgmr.msra.gmra.mxu2 %v6579_v46  ;;  %v5328_v6 = vld [vmem:[#allocation2 + $0x6d0] sm:$0xf]  ;;  %v4817_v13 = vor.u32 %v5910_v5, %v4816_v4  ;;  %v4658_v4 = vld [vmem:[#allocation2 + $0x1b0] sm:$0xf0] }
 0x2f5   :  { %2904 = vmatpush.bf16.msrb.mxu2 %v5457_v26  ;;  %2866 = vmatpush.bf16.msra.mxu3 %v4657_v32  ;;  %v6038_v7 = vld [vmem:[#allocation2 + $0x6ec] sm:$0xf0]  ;;  %v5930_v5 = vld [vmem:[#allocation2 + $0x394] sm:$0xf] }
 0x2f6   :  { %2847 = vmatmul.bf16.vlgmr.msra.gmra.mxu1 %v6587_v2  ;;  %v5072_v11 = vld [vmem:[#allocation2 + $0x4d0] sm:$0xf]  ;;  %v5329_v14 = vor.u32 %v6038_v7, %v5328_v6  ;;  %v4914_v6 = vld [vmem:[#allocation2 + $0x3b0] sm:$0xf0] }
 0x2f7   :  { %2891 = vmatpush.bf16.msrb.mxu1 %v5201_v38  ;;  %2879 = vmatpush.bf16.msrb.mxu0 %v4913_v36  ;;  %v5974_v10 = vld [vmem:[#allocation2 + $0x4ec] sm:$0xf0] }
 0x2f8   :  { %v4528_v15 = vld [vmem:[#allocation2 + $0x90] sm:$0xf]  ;;  %v5073_v22 = vor.u32 %v5974_v10, %v5072_v11  ;;  %v5994_v11 = vld [vmem:[#allocation2 + $0x594] sm:$0xf] }
 0x2f9   :  { %2905 = vmatpush.bf16.msrb.mxu2 %v5425_v37  ;;  %2867 = vmatpush.bf16.msra.mxu3 %v4625_v45  ;;  %v5838_v16 = vld [vmem:[#allocation2 + $0xac] sm:$0xf0]  ;;  %v5874_v45 = vld [vmem:[#allocation2 + $0x1d4] sm:$0xf] }
 0x2fa   :  { %v4784_v17 = vld [vmem:[#allocation2 + $0x290] sm:$0xf]  ;;  %v4529_v24 = vor.u32 %v5838_v16, %v4528_v15  ;;  %v4693_v63 = vor.u32 %v5874_v45, %v4690_v48  ;;  %v5170_v10 = vld [vmem:[#allocation2 + $0x5b0] sm:$0xf0] }
 0x2fb   :  { %2892 = vmatpush.bf16.msrb.mxu1 %v5169_v47  ;;  %2880 = vmatpush.bf16.msrb.mxu0 %v4881_v50  ;;  %v5902_v18 = vld [vmem:[#allocation2 + $0x2ac] sm:$0xf0]  ;;  %v5938_v50 = vld [vmem:[#allocation2 + $0x3d4] sm:$0xf] }
 0x2fc   :  { %v5296_v19 = vld [vmem:[#allocation2 + $0x690] sm:$0xf]  ;;  %v4785_v52 = vor.u32 %v5902_v18, %v4784_v17  ;;  %v5858_v15 = vld [vmem:[#allocation2 + $0x154] sm:$0xf] }
 0x2fd   :  { %2906 = vmatpush.bf16.msrb.mxu2 %v5393_v43  ;;  %2868 = vmatpush.bf16.msra.mxu3 %v4593_v54  ;;  %v6030_v20 = vld [vmem:[#allocation2 + $0x6ac] sm:$0xf0]  ;;  %v4946_v43 = vld [vmem:[#allocation2 + $0x3f0] sm:$0xf0] }
 0x2fe   :  { %v5040_v25 = vld [vmem:[#allocation2 + $0x490] sm:$0xf]  ;;  %v5297_v28 = vor.u32 %v6030_v20, %v5296_v19  ;;  %v6002_v54 = vld [vmem:[#allocation2 + $0x5d4] sm:$0xf]  ;;  %v5173_v20 = vor.u32 %v5994_v11, %v5170_v10 }
 0x2ff   :  { %2893 = vmatpush.bf16.msrb.mxu1 %v5137_v61  ;;  %2881 = vmatpush.bf16.msrb.mxu0 %v4849_v55  ;;  %v5966_v26 = vld [vmem:[#allocation2 + $0x4ac] sm:$0xf0]  ;;  %v4949_v55 = vor.u32 %v5938_v50, %v4946_v43  ;;  %v5205_v7 = vor.u32 %v6002_v54, %v5202_v62  ;;  %v4626_v17 = vld [vmem:[#allocation2 + $0x170] sm:$0xf0] }
 0x300   :  { %v4496_v29 = vld [vmem:[#allocation2 + $0x50] sm:$0xf]  ;;  %v5041_v32 = vor.u32 %v5966_v26, %v5040_v25  ;;  %v5922_v18 = vld [vmem:[#allocation2 + $0x354] sm:$0xf] }
 0x301   :  { %2907 = vmatpush.bf16.msrb.mxu2 %v5361_v0  ;;  %2869 = vmatpush.bf16.msra.mxu3 %v4561_v9  ;;  %v5830_v30 = vld [vmem:[#allocation2 + $0x6c] sm:$0xf0]  ;;  %v5866_v0 = vld [vmem:[#allocation2 + $0x194] sm:$0xf] }
 0x302   :  { %v4752_v34 = vld [vmem:[#allocation2 + $0x250] sm:$0xf]  ;;  %v4497_v35 = vor.u32 %v5830_v30, %v4496_v29  ;;  %v5426_v9 = vld [vmem:[#allocation2 + $0x7b0] sm:$0xf0] }
 0x303   :  { %2894 = vmatpush.bf16.msrb.mxu1 %v5105_v8  ;;  %2882 = vmatpush.bf16.msrb.mxu0 %v4817_v13  ;;  %v5894_v23 = vld [vmem:[#allocation2 + $0x26c] sm:$0xf0]  ;;  %v6058_v8 = vld [vmem:[#allocation2 + $0x794] sm:$0xf]  ;;  %v4661_v13 = vor.u32 %v5866_v0, %v4658_v4 }
 0x304   :  { %v5264_v21 = vld [vmem:[#allocation2 + $0x650] sm:$0xf]  ;;  %v4753_v41 = vor.u32 %v5894_v23, %v4752_v34  ;;  %v5429_v16 = vor.u32 %v6058_v8, %v5426_v9  ;;  %v4882_v19 = vld [vmem:[#allocation2 + $0x370] sm:$0xf0] }
 0x305   :  { %2908 = vmatpush.bf16.msrb.mxu2 %v5329_v14  ;;  %v6022_v38 = vld [vmem:[#allocation2 + $0x66c] sm:$0xf0]  ;;  %2870 = vmatpush.bf16.msra.mxu3 %v4529_v24  ;;  %v4917_v14 = vor.u32 %v5930_v5, %v4914_v6  ;;  %v5394_v24 = vld [vmem:[#allocation2 + $0x770] sm:$0xf0] }
 0x306   :  { %v5008_v33 = vld [vmem:[#allocation2 + $0x450] sm:$0xf]  ;;  %v5265_v42 = vor.u32 %v6022_v38, %v5264_v21  ;;  %v5986_v25 = vld [vmem:[#allocation2 + $0x554] sm:$0xf] }
 0x307   :  { %2895 = vmatpush.bf16.msrb.mxu1 %v5073_v22  ;;  %v5958_v36 = vld [vmem:[#allocation2 + $0x46c] sm:$0xf0]  ;;  %2883 = vmatpush.bf16.msrb.mxu0 %v4785_v52  ;;  %v6050_v22 = vld [vmem:[#allocation2 + $0x754] sm:$0xf]  ;;  %v4629_v52 = vor.u32 %v5858_v15, %v4626_v17 }
 0x308   :  { %v4464_v37 = vld [vmem:[#allocation2 + $0x10] sm:$0xf]  ;;  %v5009_v49 = vor.u32 %v5958_v36, %v5008_v33  ;;  %v5138_v26 = vld [vmem:[#allocation2 + $0x570] sm:$0xf0]  ;;  %v5397_v30 = vor.u32 %v6050_v22, %v5394_v24 }
 0x309   :  { %v5822_v39 = vld [vmem:[#allocation2 + $0x2c] sm:$0xf0]  ;;  %2909 = vmatpush.bf16.msrb.mxu2 %v5297_v28  ;;  %2871 = vmatpush.bf16.msra.mxu3 %v4497_v35  ;;  %v4885_v28 = vor.u32 %v5922_v18, %v4882_v19  ;;  %v5850_v29 = vld [vmem:[#allocation2 + $0x114] sm:$0xf]  ;;  %v5141_v38 = vor.u32 %v5986_v25, %v5138_v26 }
 0x30a   :  { %v4720_v44 = vld [vmem:[#allocation2 + $0x210] sm:$0xf]  ;;  %v4465_v51 = vor.u32 %v5822_v39, %v4464_v37  ;;  %v4594_v34 = vld [vmem:[#allocation2 + $0x130] sm:$0xf0] }
 0x30b   :  { %v5886_v31 = vld [vmem:[#allocation2 + $0x22c] sm:$0xf0]  ;;  %2896 = vmatpush.bf16.msrb.mxu1 %v5041_v32  ;;  %2884 = vmatpush.bf16.msrb.mxu0 %v4753_v41  ;;  %v5914_v23 = vld [vmem:[#allocation2 + $0x314] sm:$0xf]  ;;  %v4597_v37 = vor.u32 %v5850_v29, %v4594_v34 }
 0x30c   :  { %v5232_v58 = vld [vmem:[#allocation2 + $0x610] sm:$0xf]  ;;  %v4721_v60 = vor.u32 %v5886_v31, %v4720_v44  ;;  %v4850_v21 = vld [vmem:[#allocation2 + $0x330] sm:$0xf0] }
 0x30d   :  { %v6014_v47 = vld [vmem:[#allocation2 + $0x62c] sm:$0xf0]  ;;  %2910 = vmatpush.bf16.msrb.mxu2 %v5265_v42  ;;  %2872 = vmatpush.bf16.msra.mxu3 %v4465_v51  ;;  %v6042_v32 = vld [vmem:[#allocation2 + $0x714] sm:$0xf]  ;;  %v4853_v39 = vor.u32 %v5914_v23, %v4850_v21 }
 0x30e   :  { %v4976_v57 = vld [vmem:[#allocation2 + $0x410] sm:$0xf]  ;;  %v5233_v61 = vor.u32 %v6014_v47, %v5232_v58  ;;  %v5362_v33 = vld [vmem:[#allocation2 + $0x730] sm:$0xf0] }
 0x30f   :  { %v5950_v59 = vld [vmem:[#allocation2 + $0x42c] sm:$0xf0]  ;;  %2897 = vmatpush.bf16.msrb.mxu1 %v5009_v49  ;;  %2885 = vmatpush.bf16.msrb.mxu0 %v4721_v60  ;;  %v5978_v35 = vld [vmem:[#allocation2 + $0x514] sm:$0xf]  ;;  %v5365_v44 = vor.u32 %v6042_v32, %v5362_v33  ;;  %v2679_v50 = vpop.f32.mrf.mxu0  ;;  %v4696_v33 = vld [vmem:[#allocation2 + $0x1d8] sm:$0xf] }
 0x310   :  { %v4977_v3 = vor.u32 %v5950_v59, %v4976_v57  ;;  %2873 = vmatmul.bf16.vlgmr.msra.gmra.mxu3 %v6575_v12  ;;  %v5106_v36 = vld [vmem:[#allocation2 + $0x530] sm:$0xf0] }
 0x311   :  { %2911 = vmatpush.bf16.msrb.mxu2 %v5233_v61  ;;  %2917 = vmatpush.bf16.msrb.mxu3 %v4693_v63  ;;  %v5842_v41 = vld [vmem:[#allocation2 + $0xd4] sm:$0xf]  ;;  %v5109_v45 = vor.u32 %v5978_v35, %v5106_v36  ;;  %v5879_v35 = vld [vmem:[#allocation2 + $0x1f4] sm:$0xf0] }
 0x312   :  { %2886 = vmatmul.bf16.vlgmr.msrb.gmra.mxu0 %v6583_v40  ;;  %v4562_v42 = vld [vmem:[#allocation2 + $0xf0] sm:$0xf0] }
 0x313   :  { %2930 = vmatpush.bf16.msra.mxu0 %v4949_v55  ;;  %2898 = vmatpush.bf16.msrb.mxu1 %v4977_v3  ;;  %v5906_v31 = vld [vmem:[#allocation2 + $0x2d4] sm:$0xf]  ;;  %v4565_v51 = vor.u32 %v5842_v41, %v4562_v42  ;;  %v2692_v60 = vpop.f32.mrf.mxu1  ;;  %v2666_v5 = vpop.f32.mrf.mxu3  ;;  %v5943_v41 = vld [vmem:[#allocation2 + $0x3f4] sm:$0xf0] }
 0x314   :  { %2912 = vmatmul.bf16.vlgmr.msrb.gmra.mxu2 %v6579_v46  ;;  %v4818_v58 = vld [vmem:[#allocation2 + $0x2f0] sm:$0xf0]  ;;  %v5464_v42 = vld [vmem:[#allocation2 + $0x7d8] sm:$0xf] }
 0x315   :  { %2956 = vmatpush.bf16.msra.mxu2 %v5461_v1  ;;  %2918 = vmatpush.bf16.msrb.mxu3 %v4661_v13  ;;  %v6609_v47 = vld [vmem:[#allocation9 + $0x13] sm:$0xff]  ;;  %v4821_v53 = vor.u32 %v5906_v31, %v4818_v58 }
 0x316   :  { %2899 = vmatmul.bf16.vlgmr.msrb.gmra.mxu1 %v6587_v2  ;;  %v6034_v48 = vld [vmem:[#allocation2 + $0x6d4] sm:$0xf]  ;;  %v1361_v59 = vperm.slane %v6609_v47, 0 }
 0x317   :  { %2943 = vmatpush.bf16.msra.mxu1 %v5205_v7  ;;  %2931 = vmatpush.bf16.msra.mxu0 %v4917_v14  ;;  %v5330_v49 = vld [vmem:[#allocation2 + $0x6f0] sm:$0xf0]  ;;  %v2705_v11 = vpop.f32.mrf.mxu2  ;;  %v2681_v22 = vpop.f32.mrf.mxu0 }
 0x318   :  { %v5970_v43 = vld [vmem:[#allocation2 + $0x4d4] sm:$0xf]  ;;  %v5333_v61 = vor.u32 %v6034_v48, %v5330_v49  ;;  %v2667_v8 = vadd.f32 %v2666_v5, %v1361_v59  ;;  %v5400_v22 = vld [vmem:[#allocation2 + $0x758] sm:$0xf] }
 0x319   :  { %2957 = vmatpush.bf16.msra.mxu2 %v5429_v16  ;;  %2919 = vmatpush.bf16.msrb.mxu3 %v4629_v52  ;;  %v5834_v57 = vld [vmem:[#allocation2 + $0x94] sm:$0xf]  ;;  %v5077_v55 = vor.u32 %v5970_v43, %v5074_v56  ;;  %v5208_v56 = vld [vmem:[#allocation2 + $0x5d8] sm:$0xf] }
 0x31a   :  { %v4530_v54 = vld [vmem:[#allocation2 + $0xb0] sm:$0xf0]  ;;  %v2680_v19 = vadd.f32 %v2679_v50, %v2667_v8 }
 0x31b   :  { %2944 = vmatpush.bf16.msra.mxu1 %v5173_v20  ;;  %2932 = vmatpush.bf16.msra.mxu0 %v4885_v28  ;;  %v5898_v62 = vld [vmem:[#allocation2 + $0x294] sm:$0xf]  ;;  %v4533_v6 = vor.u32 %v5834_v57, %v4530_v54  ;;  %v2694_v21 = vpop.f32.mrf.mxu1  ;;  %v5871_v54 = vld [vmem:[#allocation2 + $0x1b4] sm:$0xf0] }
 0x31c   :  { %v4786_v63 = vld [vmem:[#allocation2 + $0x2b0] sm:$0xf0]  ;;  %v2693_v29 = vadd.f32 %v2692_v60, %v2680_v19  ;;  %v4697_v60 = vor.u32 %v5879_v35, %v4696_v33  ;;  %v4856_v21 = vld [vmem:[#allocation2 + $0x318] sm:$0xf] }
 0x31d   :  { %2958 = vmatpush.bf16.msra.mxu2 %v5397_v30  ;;  %2920 = vmatpush.bf16.msrb.mxu3 %v4597_v37  ;;  %v6026_v0 = vld [vmem:[#allocation2 + $0x694] sm:$0xf]  ;;  %v4789_v7 = vor.u32 %v5898_v62, %v4786_v63  ;;  %v5368_v35 = vld [vmem:[#allocation2 + $0x718] sm:$0xf] }
 0x31e   :  { %v5298_v1 = vld [vmem:[#allocation2 + $0x6b0] sm:$0xf0]  ;;  %v6612_v37 = vadd.f32 %v2705_v11, %v2693_v29  ;;  %v5176_v11 = vld [vmem:[#allocation2 + $0x598] sm:$0xf] }
 0x31f   :  { %2945 = vmatpush.bf16.msra.mxu1 %v5141_v38  ;;  %2933 = vmatpush.bf16.msra.mxu0 %v4853_v39  ;;  %v5962_v3 = vld [vmem:[#allocation2 + $0x494] sm:$0xf]  ;;  %v5301_v10 = vor.u32 %v6026_v0, %v5298_v1  ;;  %v4952_v39 = vld [vmem:[#allocation2 + $0x3d8] sm:$0xf] }
 0x320   :  { %v5042_v4 = vld [vmem:[#allocation2 + $0x4b0] sm:$0xf0]  ;;  %v3075_v50 = vsel %vm309_vm0, %v6612_v37, 0.0  ;;  %v3139_v43 = vmul.f32 %v6612_v37, %v6612_v37  ;;  %v4953_v63 = vor.u32 %v5943_v41, %v4952_v39  ;;  %v4920_v0 = vld [vmem:[#allocation2 + $0x398] sm:$0xf] }
 0x321   :  { %2959 = vmatpush.bf16.msra.mxu2 %v5365_v44  ;;  %2921 = vmatpush.bf16.msrb.mxu3 %v4565_v51  ;;  %v5826_v9 = vld [vmem:[#allocation2 + $0x54] sm:$0xf]  ;;  %v5045_v16 = vor.u32 %v5962_v3, %v5042_v4  ;;  %v6071_v44 = vld [vmem:[#allocation2 + $0x7f4] sm:$0xf0]  ;;  %v3076_v59 = vrot.slane %v3075_v50, 4 }
 0x322   :  { %v4498_v13 = vld [vmem:[#allocation2 + $0x70] sm:$0xf0]  ;;  %v6007_v51 = vld [vmem:[#allocation2 + $0x5f4] sm:$0xf0]  ;;  %v3147_v62 = vsel %vm309_vm0, %v3139_v43, 0.0 }
 0x323   :  { %2946 = vmatpush.bf16.msra.mxu1 %v5109_v45  ;;  %2934 = vmatpush.bf16.msra.mxu0 %v4821_v53  ;;  %v5890_v14 = vld [vmem:[#allocation2 + $0x254] sm:$0xf]  ;;  %v4501_v52 = vor.u32 %v5826_v9, %v4498_v13  ;;  %v2668_v45 = vpop.f32.mrf.mxu3  ;;  %v2707_v53 = vpop.f32.mrf.mxu2  ;;  %v5935_v1 = vld [vmem:[#allocation2 + $0x3b4] sm:$0xf0]  ;;  %v3077_v3 = vadd.f32 %v3076_v59, %v3075_v50  ;;  %v3148_v4 = vrot.slane %v3147_v62, 4  ;;  %v5209_v8 = vor.u32 %v6007_v51, %v5208_v56 }
 0x324   :  { %v4754_v15 = vld [vmem:[#allocation2 + $0x270] sm:$0xf0]  ;;  %v4632_v13 = vld [vmem:[#allocation2 + $0x158] sm:$0xf] }
 0x325   :  { %2960 = vmatpush.bf16.msra.mxu2 %v5333_v61  ;;  %v6018_v17 = vld [vmem:[#allocation2 + $0x654] sm:$0xf]  ;;  %2922 = vmatpush.bf16.msrb.mxu3 %v4533_v6  ;;  %v4757_v28 = vor.u32 %v5890_v14, %v4754_v15  ;;  %v4664_v61 = vld [vmem:[#allocation2 + $0x198] sm:$0xf]  ;;  %v4921_v14 = vor.u32 %v5935_v1, %v4920_v0  ;;  %v3078_v19 = vrot.slane %v3077_v3, 2 }
 0x326   :  { %v5266_v18 = vld [vmem:[#allocation2 + $0x670] sm:$0xf0]  ;;  %v5432_v6 = vld [vmem:[#allocation2 + $0x798] sm:$0xf]  ;;  %v4665_v9 = vor.u32 %v5871_v54, %v4664_v61  ;;  %v1362_v54 = vperm.slane %v6609_v47, 1 }
 0x327   :  { %2947 = vmatpush.bf16.msra.mxu1 %v5077_v55  ;;  %v5954_v20 = vld [vmem:[#allocation2 + $0x454] sm:$0xf]  ;;  %2935 = vmatpush.bf16.msra.mxu0 %v4789_v7  ;;  %v5269_v38 = vor.u32 %v6018_v17, %v5266_v18  ;;  %v5465_v55 = vor.u32 %v6071_v44, %v5464_v42  ;;  %v6063_v7 = vld [vmem:[#allocation2 + $0x7b4] sm:$0xf0] }
 0x328   :  { %v5010_v24 = vld [vmem:[#allocation2 + $0x470] sm:$0xf0]  ;;  %v5433_v15 = vor.u32 %v6063_v7, %v5432_v6  ;;  %v4888_v17 = vld [vmem:[#allocation2 + $0x358] sm:$0xf] }
 0x329   :  { %v5818_v25 = vld [vmem:[#allocation2 + $0x14] sm:$0xf]  ;;  %2961 = vmatpush.bf16.msra.mxu2 %v5301_v10  ;;  %v5013_v36 = vor.u32 %v5954_v20, %v5010_v24  ;;  %2923 = vmatpush.bf16.msrb.mxu3 %v4501_v52  ;;  %v5999_v10 = vld [vmem:[#allocation2 + $0x5b4] sm:$0xf0]  ;;  %v3149_v20 = vadd.f32 %v3148_v4, %v3147_v62 }
 0x32a   :  { %v4466_v26 = vld [vmem:[#allocation2 + $0x30] sm:$0xf0]  ;;  %v5927_v18 = vld [vmem:[#allocation2 + $0x374] sm:$0xf0] }
 0x32b   :  { %v5882_v30 = vld [vmem:[#allocation2 + $0x214] sm:$0xf]  ;;  %2948 = vmatpush.bf16.msra.mxu1 %v5045_v16  ;;  %2936 = vmatpush.bf16.msra.mxu0 %v4757_v28  ;;  %v4469_v48 = vor.u32 %v5818_v25, %v4466_v26  ;;  %v5863_v16 = vld [vmem:[#allocation2 + $0x174] sm:$0xf0]  ;;  %v5177_v25 = vor.u32 %v5999_v10, %v5176_v11  ;;  %v3150_v33 = vrot.slane %v3149_v20, 2 }
 0x32c   :  { %v4722_v34 = vld [vmem:[#allocation2 + $0x230] sm:$0xf0]  ;;  %v6055_v24 = vld [vmem:[#allocation2 + $0x774] sm:$0xf0]  ;;  %v4633_v26 = vor.u32 %v5863_v16, %v4632_v13 }
 0x32d   :  { %v6010_v23 = vld [vmem:[#allocation2 + $0x614] sm:$0xf]  ;;  %v4725_v49 = vor.u32 %v5882_v30, %v4722_v34  ;;  %2962 = vmatpush.bf16.msra.mxu2 %v5269_v38  ;;  %2924 = vmatpush.bf16.msrb.mxu3 %v4469_v48  ;;  %v5144_v52 = vld [vmem:[#allocation2 + $0x558] sm:$0xf]  ;;  %v4889_v30 = vor.u32 %v5927_v18, %v4888_v17  ;;  %v5401_v34 = vor.u32 %v6055_v24, %v5400_v22 }
 0x32e   :  { %v5234_v32 = vld [vmem:[#allocation2 + $0x630] sm:$0xf0]  ;;  %v5991_v28 = vld [vmem:[#allocation2 + $0x574] sm:$0xf0]  ;;  %v3151_v56 = vadd.f32 %v3150_v33, %v3149_v20 }
 0x32f   :  { %v5946_v31 = vld [vmem:[#allocation2 + $0x414] sm:$0xf]  ;;  %v5237_v57 = vor.u32 %v6010_v23, %v5234_v32  ;;  %2949 = vmatpush.bf16.msra.mxu1 %v5013_v36  ;;  %2937 = vmatpush.bf16.msra.mxu0 %v4725_v49  ;;  %v4600_v29 = vld [vmem:[#allocation2 + $0x118] sm:$0xf]  ;;  %v3079_v32 = vadd.f32 %v3078_v19, %v3077_v3  ;;  %v5145_v39 = vor.u32 %v5991_v28, %v5144_v52 }
 0x330   :  { %v4978_v58 = vld [vmem:[#allocation2 + $0x430] sm:$0xf0]  ;;  %2925 = vmatmul.bf16.vlgmr.msrb.gmra.mxu3 %v6575_v12  ;;  %v5855_v23 = vld [vmem:[#allocation2 + $0x134] sm:$0xf0]  ;;  %v3152_v7 = vrot.slane %v3151_v56, 1 }
 0x331   :  { %v4981_v5 = vor.u32 %v5946_v31, %v4978_v58  ;;  %2963 = vmatpush.bf16.msra.mxu2 %v5237_v57  ;;  %2969 = vmatpush.bf16.msra.mxu3 %v4697_v60  ;;  %v5919_v38 = vld [vmem:[#allocation2 + $0x334] sm:$0xf0]  ;;  %v4601_v41 = vor.u32 %v5855_v23, %v4600_v29  ;;  %v3080_v43 = vrot.slane %v3079_v32, 1  ;;  %v2731_v60 = vpop.f32.mrf.mxu0 }
 0x332   :  { %2938 = vmatmul.bf16.vlgmr.msra.gmra.mxu0 %v6583_v40  ;;  %v6047_v36 = vld [vmem:[#allocation2 + $0x734] sm:$0xf0]  ;;  %v4857_v58 = vor.u32 %v5919_v38, %v4856_v21 }
 0x333   :  { %2982 = vmatpush.bf16.msrb.mxu0 %v4953_v63  ;;  %2950 = vmatpush.bf16.msra.mxu1 %v4981_v5  ;;  %v5112_v42 = vld [vmem:[#allocation2 + $0x518] sm:$0xf]  ;;  %v5369_v45 = vor.u32 %v6047_v36, %v5368_v35  ;;  %v2744_v5 = vpop.f32.mrf.mxu1  ;;  %v3081_v6 = vadd.f32 %v3080_v43, %v3079_v32  ;;  %v2718_v11 = vpop.f32.mrf.mxu3  ;;  %v5875_v43 = vld [vmem:[#allocation2 + $0x1dc] sm:$0xf] }
 0x334   :  { %2964 = vmatmul.bf16.vlgmr.msra.gmra.mxu2 %v6579_v46  ;;  %v5983_v44 = vld [vmem:[#allocation2 + $0x534] sm:$0xf0]  ;;  %v2719_v13 = vadd.f32 %v2718_v11, %v1362_v54 }
 0x335   :  { %3008 = vmatpush.bf16.msrb.mxu2 %v5465_v55  ;;  %2970 = vmatpush.bf16.msra.mxu3 %v4665_v9  ;;  %v4568_v31 = vld [vmem:[#allocation2 + $0xd8] sm:$0xf]  ;;  %v5113_v57 = vor.u32 %v5983_v44, %v5112_v42 }
 0x336   :  { %2951 = vmatmul.bf16.vlgmr.msra.gmra.mxu1 %v6587_v2  ;;  %v5847_v48 = vld [vmem:[#allocation2 + $0xf4] sm:$0xf0]  ;;  %v2732_v52 = vadd.f32 %v2731_v60, %v2719_v13  ;;  %v5466_v60 = vld [vmem:[#allocation2 + $0x7f8] sm:$0xf0] }
 0x337   :  { %2995 = vmatpush.bf16.msrb.mxu1 %v5209_v8  ;;  %2983 = vmatpush.bf16.msrb.mxu0 %v4921_v14  ;;  %v4824_v49 = vld [vmem:[#allocation2 + $0x2d8] sm:$0xf]  ;;  %v4569_v61 = vor.u32 %v5847_v48, %v4568_v31  ;;  %v2757_v17 = vpop.f32.mrf.mxu2  ;;  %v5867_v13 = vld [vmem:[#allocation2 + $0x19c] sm:$0xf] }
 0x338   :  { %v5911_v50 = vld [vmem:[#allocation2 + $0x2f4] sm:$0xf0]  ;;  %v2745_v32 = vadd.f32 %v2744_v5, %v2732_v52 }
 0x339   :  { %3009 = vmatpush.bf16.msrb.mxu2 %v5433_v15  ;;  %2971 = vmatpush.bf16.msra.mxu3 %v4633_v26  ;;  %v5336_v51 = vld [vmem:[#allocation2 + $0x6d8] sm:$0xf]  ;;  %v4825_v55 = vor.u32 %v5911_v50, %v4824_v49  ;;  %v3153_v26 = vadd.f32 %v3152_v7, %v3151_v56  ;;  %v2733_v38 = vpop.f32.mrf.mxu0  ;;  %v4698_v56 = vld [vmem:[#allocation2 + $0x1f8] sm:$0xf0] }
 0x33a   :  { %v6039_v53 = vld [vmem:[#allocation2 + $0x6f4] sm:$0xf0]  ;;  %v6630_v50 = vadd.f32 %v2757_v17, %v2745_v32  ;;  %v5210_v7 = vld [vmem:[#allocation2 + $0x5f8] sm:$0xf0]  ;;  %v4701_v11 = vor.u32 %v5875_v43, %v4698_v56 }
 0x33b   :  { %2996 = vmatpush.bf16.msrb.mxu1 %v5177_v25  ;;  %2984 = vmatpush.bf16.msrb.mxu0 %v4889_v30  ;;  %v5080_v59 = vld [vmem:[#allocation2 + $0x4d8] sm:$0xf]  ;;  %v5337_v0 = vor.u32 %v6039_v53, %v5336_v51  ;;  %v6625_v25 = vmul.f32 %v3081_v6, %v6422_v27  ;;  %v3203_v48 = vmul.f32 %v3153_v26, %v6422_v27  ;;  %v5939_v51 = vld [vmem:[#allocation2 + $0x3dc] sm:$0xf] }
 0x33c   :  { %v5975_v62 = vld [vmem:[#allocation2 + $0x4f4] sm:$0xf0]  ;;  %v3082_v54 = vsel %vm309_vm0, %v6630_v50, 0.0  ;;  %v6003_v6 = vld [vmem:[#allocation2 + $0x5dc] sm:$0xf] }
 0x33d   :  { %3010 = vmatpush.bf16.msrb.mxu2 %v5401_v34  ;;  %2972 = vmatpush.bf16.msra.mxu3 %v4601_v41  ;;  %v4536_v63 = vld [vmem:[#allocation2 + $0x98] sm:$0xf]  ;;  %v5081_v10 = vor.u32 %v5975_v62, %v5080_v59  ;;  %v3211_v49 = vmul.f32 %v6625_v25, %v6625_v25  ;;  %v6067_v59 = vld [vmem:[#allocation2 + $0x7dc] sm:$0xf]  ;;  %v3140_v62 = vmul.f32 %v6630_v50, %v6630_v50 }
 0x33e   :  { %v5839_v1 = vld [vmem:[#allocation2 + $0xb4] sm:$0xf0]  ;;  %v5469_v17 = vor.u32 %v6067_v59, %v5466_v60  ;;  %v5434_v26 = vld [vmem:[#allocation2 + $0x7b8] sm:$0xf0] }
 0x33f   :  { %2997 = vmatpush.bf16.msrb.mxu1 %v5145_v39  ;;  %2985 = vmatpush.bf16.msrb.mxu0 %v4857_v58  ;;  %v4792_v3 = vld [vmem:[#allocation2 + $0x298] sm:$0xf]  ;;  %v4537_v14 = vor.u32 %v5839_v1, %v4536_v63  ;;  %v2759_v1 = vpop.f32.mrf.mxu2  ;;  %v5859_v38 = vld [vmem:[#allocation2 + $0x15c] sm:$0xf] }
 0x340   :  { %v5903_v4 = vld [vmem:[#allocation2 + $0x2b4] sm:$0xf0]  ;;  %v4634_v32 = vld [vmem:[#allocation2 + $0x178] sm:$0xf0] }
 0x341   :  { %3011 = vmatpush.bf16.msrb.mxu2 %v5369_v45  ;;  %v5304_v8 = vld [vmem:[#allocation2 + $0x698] sm:$0xf]  ;;  %2973 = vmatpush.bf16.msra.mxu3 %v4569_v61  ;;  %v4793_v18 = vor.u32 %v5903_v4, %v4792_v3  ;;  %v2746_v45 = vpop.f32.mrf.mxu1  ;;  %v2720_v61 = vpop.f32.mrf.mxu3  ;;  %v3083_v3 = vrot.slane %v3082_v54, 4  ;;  %v4637_v43 = vor.u32 %v5859_v38, %v4634_v32 }
 0x342   :  { %v6031_v9 = vld [vmem:[#allocation2 + $0x6b4] sm:$0xf0]  ;;  %v5915_v61 = vld [vmem:[#allocation2 + $0x31c] sm:$0xf] }
 0x343   :  { %2998 = vmatpush.bf16.msrb.mxu1 %v5113_v57  ;;  %v5048_v15 = vld [vmem:[#allocation2 + $0x498] sm:$0xf]  ;;  %2986 = vmatpush.bf16.msrb.mxu0 %v4825_v55  ;;  %v5305_v19 = vor.u32 %v6031_v9, %v5304_v8  ;;  %v4954_v57 = vld [vmem:[#allocation2 + $0x3f8] sm:$0xf0]  ;;  %v3219_v8 = vsub.f32 %v3203_v48, %v3211_v49  ;;  %v3154_v9 = vsel %vm309_vm0, %v3140_v62, 0.0 }
 0x344   :  { %v5967_v16 = vld [vmem:[#allocation2 + $0x4b4] sm:$0xf0]  ;;  %v5987_v48 = vld [vmem:[#allocation2 + $0x55c] sm:$0xf] }
 0x345   :  { %3012 = vmatpush.bf16.msrb.mxu2 %v5337_v0  ;;  %v4504_v20 = vld [vmem:[#allocation2 + $0x58] sm:$0xf]  ;;  %v5049_v34 = vor.u32 %v5967_v16, %v5048_v15  ;;  %2974 = vmatpush.bf16.msra.mxu3 %v4537_v14  ;;  %v4666_v14 = vld [vmem:[#allocation2 + $0x1b8] sm:$0xf0]  ;;  %v3084_v15 = vadd.f32 %v3083_v3, %v3082_v54  ;;  %v3155_v16 = vrot.slane %v3154_v9, 4 }
 0x346   :  { %v5831_v22 = vld [vmem:[#allocation2 + $0x74] sm:$0xf0]  ;;  %v5146_v49 = vld [vmem:[#allocation2 + $0x578] sm:$0xf0] }
 0x347   :  { %v4760_v24 = vld [vmem:[#allocation2 + $0x258] sm:$0xf]  ;;  %2999 = vmatpush.bf16.msrb.mxu1 %v5081_v10  ;;  %v4505_v33 = vor.u32 %v5831_v22, %v4504_v20  ;;  %2987 = vmatpush.bf16.msrb.mxu0 %v4793_v18  ;;  %v4957_v10 = vor.u32 %v5939_v51, %v4954_v57  ;;  %v4922_v20 = vld [vmem:[#allocation2 + $0x3b8] sm:$0xf0]  ;;  %v5213_v22 = vor.u32 %v6003_v6, %v5210_v7  ;;  %v3085_v52 = vrot.slane %v3084_v15, 2 }
 0x348   :  { %v5895_v28 = vld [vmem:[#allocation2 + $0x274] sm:$0xf0]  ;;  %v5851_v51 = vld [vmem:[#allocation2 + $0x11c] sm:$0xf]  ;;  %v5149_v62 = vor.u32 %v5987_v48, %v5146_v49 }
 0x349   :  { %v5272_v29 = vld [vmem:[#allocation2 + $0x658] sm:$0xf]  ;;  %3013 = vmatpush.bf16.msrb.mxu2 %v5305_v19  ;;  %v4761_v41 = vor.u32 %v5895_v28, %v4760_v24  ;;  %2975 = vmatpush.bf16.msra.mxu3 %v4505_v33  ;;  %v5931_v19 = vld [vmem:[#allocation2 + $0x39c] sm:$0xf]  ;;  %v3156_v28 = vadd.f32 %v3155_v16, %v3154_v9  ;;  %v3086_v33 = vadd.f32 %v3085_v52, %v3084_v15 }
 0x34a   :  { %v6023_v30 = vld [vmem:[#allocation2 + $0x674] sm:$0xf0]  ;;  %v6059_v24 = vld [vmem:[#allocation2 + $0x79c] sm:$0xf] }
 0x34b   :  { %v5016_v23 = vld [vmem:[#allocation2 + $0x458] sm:$0xf]  ;;  %v5273_v42 = vor.u32 %v6023_v30, %v5272_v29  ;;  %3000 = vmatpush.bf16.msrb.mxu1 %v5049_v34  ;;  %2988 = vmatpush.bf16.msrb.mxu0 %v4761_v41  ;;  %v5995_v29 = vld [vmem:[#allocation2 + $0x59c] sm:$0xf]  ;;  %v6637_v34 = vadd.f32 0.8, %v3219_v8 }
 0x34c   :  { %v5959_v21 = vld [vmem:[#allocation2 + $0x474] sm:$0xf0]  ;;  %v5178_v30 = vld [vmem:[#allocation2 + $0x5b8] sm:$0xf0] }
 0x34d   :  { %v4472_v35 = vld [vmem:[#allocation2 + $0x18] sm:$0xf]  ;;  %v5017_v53 = vor.u32 %v5959_v21, %v5016_v23  ;;  %3014 = vmatpush.bf16.msrb.mxu2 %v5273_v42  ;;  %v4669_v23 = vor.u32 %v5867_v13, %v4666_v14  ;;  %v4925_v21 = vor.u32 %v5931_v19, %v4922_v20  ;;  %v4890_v41 = vld [vmem:[#allocation2 + $0x378] sm:$0xf0]  ;;  %v5181_v42 = vor.u32 %v5995_v29, %v5178_v30 }
 0x34e   :  { %v5823_v36 = vld [vmem:[#allocation2 + $0x34] sm:$0xf0]  ;;  %6161 = vrsqrt.f32 %v6637_v34  ;;  %v4858_v54 = vld [vmem:[#allocation2 + $0x338] sm:$0xf0]  ;;  %v1363_v30 = vperm.slane %v6609_v47, 2  ;;  %vm3241_vm10 = vweird.f32 %v6637_v34 }
 0x34f   :  { %v4728_v39 = vld [vmem:[#allocation2 + $0x218] sm:$0xf]  ;;  %v4473_v63 = vor.u32 %v5823_v36, %v4472_v35  ;;  %3001 = vmatpush.bf16.msrb.mxu1 %v5017_v53  ;;  %v3157_v35 = vrot.slane %v3156_v28, 2  ;;  %v5437_v36 = vor.u32 %v6059_v24, %v5434_v26  ;;  %v4602_v53 = vld [vmem:[#allocation2 + $0x138] sm:$0xf0]  ;;  %v4861_v6 = vor.u32 %v5915_v61, %v4858_v54  ;;  %v2783_v19 = vpop.f32.mrf.mxu0 }
 0x350   :  { %v5887_v44 = vld [vmem:[#allocation2 + $0x234] sm:$0xf0]  ;;  %v5979_v3 = vld [vmem:[#allocation2 + $0x51c] sm:$0xf] }
 0x351   :  { %v5240_v31 = vld [vmem:[#allocation2 + $0x618] sm:$0xf]  ;;  %v4729_v4 = vor.u32 %v5887_v44, %v4728_v39  ;;  %2976 = vmatpush.bf16.msra.mxu3 %v4473_v63  ;;  %v5923_v39 = vld [vmem:[#allocation2 + $0x35c] sm:$0xf]  ;;  %v3158_v45 = vadd.f32 %v3157_v35, %v3156_v28 }
 0x352   :  { %v6015_v58 = vld [vmem:[#allocation2 + $0x634] sm:$0xf0]  ;;  %v6051_v44 = vld [vmem:[#allocation2 + $0x75c] sm:$0xf]  ;;  %v4893_v56 = vor.u32 %v5923_v39, %v4890_v41 }
 0x353   :  { %v4984_v55 = vld [vmem:[#allocation2 + $0x418] sm:$0xf]  ;;  %v5241_v5 = vor.u32 %v6015_v58, %v5240_v31  ;;  %2989 = vmatpush.bf16.msrb.mxu0 %v4729_v4  ;;  %v5402_v31 = vld [vmem:[#allocation2 + $0x778] sm:$0xf0]  ;;  %v3087_v58 = vrot.slane %v3086_v33, 1  ;;  %v3159_v59 = vrot.slane %v3158_v45, 1 }
 0x354   :  { %v5951_v0 = vld [vmem:[#allocation2 + $0x434] sm:$0xf0]  ;;  %2977 = vmatmul.bf16.vlgmr.msra.gmra.mxu3 %v6575_v12  ;;  %v5405_v60 = vor.u32 %v6051_v44, %v5402_v31  ;;  %v6043_v63 = vld [vmem:[#allocation2 + $0x71c] sm:$0xf]  ;;  %v6650_v15 = vpop.eup %6161  ;;  %v2770_v31 = vpop.f32.mrf.mxu3 }
 0x355   :  { %v4985_v18 = vor.u32 %v5951_v0, %v4984_v55  ;;  %3015 = vmatpush.bf16.msrb.mxu2 %v5241_v5  ;;  %3021 = vmatpush.bf16.msrb.mxu3 %v4701_v11  ;;  %v3088_v57 = vadd.f32 %v3087_v58, %v3086_v33  ;;  %v5370_v55 = vld [vmem:[#allocation2 + $0x738] sm:$0xf0]  ;;  %v3160_v1 = vadd.f32 %v3159_v59, %v3158_v45  ;;  %vm3242_vm11 = vweird.f32 %v6650_v15 }
 0x356   :  { %2990 = vmatmul.bf16.vlgmr.msrb.gmra.mxu0 %v6583_v40  ;;  %v5114_v4 = vld [vmem:[#allocation2 + $0x538] sm:$0xf0]  ;;  %v4605_v5 = vor.u32 %v5851_v51, %v4602_v53  ;;  %v5373_v11 = vor.u32 %v6043_v63, %v5370_v55  ;;  %v2771_v48 = vadd.f32 %v2770_v31, %v1363_v30  ;;  %vm3243_vm13 = vmor %vm3241_vm10, %vm3242_vm11 }
 0x357   :  { %3034 = vmatpush.bf16.msra.mxu0 %v4957_v10  ;;  %3002 = vmatpush.bf16.msrb.mxu1 %v4985_v18  ;;  %v6645_v0 = vmul.f32 %v3088_v57, %v6422_v27  ;;  %v5843_v7 = vld [vmem:[#allocation2 + $0xdc] sm:$0xf]  ;;  %v3204_v8 = vmul.f32 %v3160_v1, %v6422_v27  ;;  %v5117_v16 = vor.u32 %v5979_v3, %v5114_v4  ;;  %v2785_v63 = vpop.f32.mrf.mxu0 }
 0x358   :  { %3016 = vmatmul.bf16.vlgmr.msrb.gmra.mxu2 %v6579_v46  ;;  %v4570_v10 = vld [vmem:[#allocation2 + $0xf8] sm:$0xf0] }
 0x359   :  { %3060 = vmatpush.bf16.msra.mxu2 %v5469_v17  ;;  %3022 = vmatpush.bf16.msrb.mxu3 %v4669_v23  ;;  %v3212_v9 = vmul.f32 %v6645_v0, %v6645_v0  ;;  %v5907_v13 = vld [vmem:[#allocation2 + $0x2dc] sm:$0xf]  ;;  %v4573_v26 = vor.u32 %v5843_v7, %v4570_v10  ;;  %v2796_v23 = vpop.f32.mrf.mxu1 }
 0x35a   :  { %3003 = vmatmul.bf16.vlgmr.msrb.gmra.mxu1 %v6587_v2  ;;  %v4826_v14 = vld [vmem:[#allocation2 + $0x2f8] sm:$0xf0] }
 0x35b   :  { %3047 = vmatpush.bf16.msra.mxu1 %v5213_v22  ;;  %3035 = vmatpush.bf16.msra.mxu0 %v4925_v21  ;;  %v6035_v17 = vld [vmem:[#allocation2 + $0x6dc] sm:$0xf]  ;;  %v3220_v20 = vsub.f32 %v3204_v8, %v3212_v9  ;;  %v4829_v52 = vor.u32 %v5907_v13, %v4826_v14  ;;  %v3236_v21 = vmul.f32 %v6650_v15, %v6637_v34 }
 0x35c   :  { %v5338_v18 = vld [vmem:[#allocation2 + $0x6f8] sm:$0xf0] }
 0x35d   :  { %3061 = vmatpush.bf16.msra.mxu2 %v5437_v36  ;;  %3023 = vmatpush.bf16.msrb.mxu3 %v4637_v43  ;;  %v5971_v22 = vld [vmem:[#allocation2 + $0x4dc] sm:$0xf]  ;;  %v6655_v38 = vadd.f32 0.8, %v3220_v20  ;;  %v5341_v32 = vor.u32 %v6035_v17, %v5338_v18  ;;  %v2809_v43 = vpop.f32.mrf.mxu2 }
 0x35e   :  { %v5082_v24 = vld [vmem:[#allocation2 + $0x4f8] sm:$0xf0] }
 0x35f   :  { %3048 = vmatpush.bf16.msra.mxu1 %v5181_v42  ;;  %3036 = vmatpush.bf16.msra.mxu0 %v4893_v56  ;;  %v5835_v28 = vld [vmem:[#allocation2 + $0x9c] sm:$0xf]  ;;  %v5085_v36 = vor.u32 %v5971_v22, %v5082_v24  ;;  %6163 = vrsqrt.f32 %v6655_v38  ;;  %v3237_v56 = vmul.f32 %v6650_v15, %v3236_v21  ;;  %vm3251_vm8 = vweird.f32 %v6655_v38 }
 0x360   :  { %v4538_v29 = vld [vmem:[#allocation2 + $0xb8] sm:$0xf0] }
 0x361   :  { %3062 = vmatpush.bf16.msra.mxu2 %v5405_v60  ;;  %3024 = vmatpush.bf16.msrb.mxu3 %v4605_v5  ;;  %v5899_v33 = vld [vmem:[#allocation2 + $0x29c] sm:$0xf]  ;;  %v4541_v58 = vor.u32 %v5835_v28, %v4538_v29  ;;  %v2798_v9 = vpop.f32.mrf.mxu1  ;;  %v3238_v10 = vmul.f32 0.5, %v3237_v56 }
 0x362   :  { %v4794_v35 = vld [vmem:[#allocation2 + $0x2b8] sm:$0xf0] }
 0x363   :  { %3049 = vmatpush.bf16.msra.mxu1 %v5149_v62  ;;  %3037 = vmatpush.bf16.msra.mxu0 %v4861_v6  ;;  %v6027_v39 = vld [vmem:[#allocation2 + $0x69c] sm:$0xf]  ;;  %v4797_v45 = vor.u32 %v5899_v33, %v4794_v35  ;;  %v2784_v62 = vadd.f32 %v2783_v19, %v2771_v48 }
 0x364   :  { %v5306_v41 = vld [vmem:[#allocation2 + $0x6b8] sm:$0xf0] }
 0x365   :  { %3063 = vmatpush.bf16.msra.mxu2 %v5373_v11  ;;  %v5963_v42 = vld [vmem:[#allocation2 + $0x49c] sm:$0xf]  ;;  %3025 = vmatpush.bf16.msrb.mxu3 %v4573_v26  ;;  %v5309_v51 = vor.u32 %v6027_v39, %v5306_v41  ;;  %v2797_v5 = vadd.f32 %v2796_v23, %v2784_v62  ;;  %v6164_v11 = vpop.eup %6163  ;;  %v2811_v21 = vpop.f32.mrf.mxu2 }
 0x366   :  { %v5050_v44 = vld [vmem:[#allocation2 + $0x4b8] sm:$0xf0]  ;;  %v3246_v17 = vmul.f32 %v6164_v11, %v6655_v38  ;;  %vm3252_vm9 = vweird.f32 %v6164_v11 }
 0x367   :  { %3050 = vmatpush.bf16.msra.mxu1 %v5117_v16  ;;  %3038 = vmatpush.bf16.msra.mxu0 %v4829_v52  ;;  %v5827_v49 = vld [vmem:[#allocation2 + $0x5c] sm:$0xf]  ;;  %v5053_v60 = vor.u32 %v5963_v42, %v5050_v44  ;;  %v6660_v20 = vadd.f32 %v2809_v43, %v2797_v5  ;;  %v2772_v52 = vpop.f32.mrf.mxu3  ;;  %vm3253_vm12 = vmor %vm3251_vm8, %vm3252_vm9 }
 0x368   :  { %v4506_v53 = vld [vmem:[#allocation2 + $0x78] sm:$0xf0]  ;;  %v3247_v28 = vmul.f32 %v6164_v11, %v3246_v17 }
 0x369   :  { %3064 = vmatpush.bf16.msra.mxu2 %v5341_v32  ;;  %v5891_v57 = vld [vmem:[#allocation2 + $0x25c] sm:$0xf]  ;;  %3026 = vmatpush.bf16.msrb.mxu3 %v4541_v58  ;;  %v4509_v3 = vor.u32 %v5827_v49, %v4506_v53  ;;  %v3089_v30 = vsel %vm309_vm0, %v6660_v20, 0.0  ;;  %v3141_v23 = vmul.f32 %v6660_v20, %v6660_v20  ;;  %v3239_v32 = vsub.f32 1.5, %v3238_v10 }
 0x36a   :  { %v4762_v59 = vld [vmem:[#allocation2 + $0x278] sm:$0xf0]  ;;  %v3090_v35 = vrot.slane %v3089_v30, 4  ;;  %v3248_v39 = vmul.f32 0.5, %v3247_v28 }
 0x36b   :  { %3051 = vmatpush.bf16.msra.mxu1 %v5085_v36  ;;  %v6019_v61 = vld [vmem:[#allocation2 + $0x65c] sm:$0xf]  ;;  %3039 = vmatpush.bf16.msra.mxu0 %v4797_v45  ;;  %v4765_v4 = vor.u32 %v5891_v57, %v4762_v59  ;;  %v3161_v41 = vsel %vm309_vm0, %v3141_v23, 0.0  ;;  %v3240_v48 = vmul.f32 %v6650_v15, %v3239_v32 }
 0x36c   :  { %v5274_v54 = vld [vmem:[#allocation2 + $0x678] sm:$0xf0]  ;;  %v3091_v42 = vadd.f32 %v3090_v35, %v3089_v30  ;;  %v3162_v44 = vrot.slane %v3161_v41, 4  ;;  %v3249_v31 = vsub.f32 1.5, %v3248_v39 }
 0x36d   :  { %v5955_v55 = vld [vmem:[#allocation2 + $0x45c] sm:$0xf]  ;;  %3065 = vmatpush.bf16.msra.mxu2 %v5309_v51  ;;  %v5277_v13 = vor.u32 %v6019_v61, %v5274_v54  ;;  %3027 = vmatpush.bf16.msrb.mxu3 %v4509_v3  ;;  %v3244_v51 = vsel %vm3243_vm13, %v6650_v15, %v3240_v48  ;;  %vm3333_vm13 = vcmask 1044484  }
 0x36e   :  { %v5018_v1 = vld [vmem:[#allocation2 + $0x478] sm:$0xf0]  ;;  %v3092_v58 = vrot.slane %v3091_v42, 2  ;;  %v3163_v45 = vadd.f32 %v3162_v44, %v3161_v41  ;;  %v3250_v38 = vmul.f32 %v6164_v11, %v3249_v31  ;;  %v1365_v44 = vperm.slane %v6609_v47, 4 }
 0x36f   :  { %v5819_v6 = vld [vmem:[#allocation2 + $0x1c] sm:$0xf]  ;;  %3052 = vmatpush.bf16.msra.mxu1 %v5053_v60  ;;  %v5021_v18 = vor.u32 %v5955_v55, %v5018_v1  ;;  %3040 = vmatpush.bf16.msra.mxu0 %v4765_v4  ;;  %v2835_v54 = vpop.f32.mrf.mxu0 }
 0x370   :  { %v4474_v7 = vld [vmem:[#allocation2 + $0x38] sm:$0xf0]  ;;  %v3093_v49 = vadd.f32 %v3092_v58, %v3091_v42  ;;  %v3164_v43 = vrot.slane %v3163_v45, 2  ;;  %v3254_v34 = vsel %vm3253_vm12, %v6164_v11, %v3250_v38 }
 0x371   :  { %v5883_v8 = vld [vmem:[#allocation2 + $0x21c] sm:$0xf]  ;;  %v4477_v26 = vor.u32 %v5819_v6, %v4474_v7  ;;  %3066 = vmatpush.bf16.msra.mxu2 %v5277_v13  ;;  %v3323_v56 = vrot.slane %v3254_v34, 7 }
 0x372   :  { %v4730_v14 = vld [vmem:[#allocation2 + $0x238] sm:$0xf0]  ;;  %v3094_v57 = vrot.slane %v3093_v49, 1  ;;  %v3165_v59 = vadd.f32 %v3164_v43, %v3163_v45 }
 0x373   :  { %v6011_v16 = vld [vmem:[#allocation2 + $0x61c] sm:$0xf]  ;;  %v4733_v29 = vor.u32 %v5883_v8, %v4730_v14  ;;  %3053 = vmatpush.bf16.msra.mxu1 %v5021_v18  ;;  %3028 = vmatpush.bf16.msrb.mxu3 %v4477_v26  ;;  %v6677_v53 = vsel %vm380_vm7, %v3244_v51, %v3323_v56  ;;  %v2848_v62 = vpop.f32.mrf.mxu1  ;;  %v2822_v63 = vpop.f32.mrf.mxu3 }
 0x374   :  { %v5242_v19 = vld [vmem:[#allocation2 + $0x638] sm:$0xf0]  ;;  %v3095_v60 = vadd.f32 %v3094_v57, %v3093_v49  ;;  %v3166_v61 = vrot.slane %v3165_v59, 1 }
 0x375   :  { %v5947_v22 = vld [vmem:[#allocation2 + $0x41c] sm:$0xf]  ;;  %v5245_v33 = vor.u32 %v6011_v16, %v5242_v19  ;;  %3041 = vmatpush.bf16.msra.mxu0 %v4733_v29 }
 0x376   :  { %v4986_v24 = vld [vmem:[#allocation2 + $0x438] sm:$0xf0]  ;;  %3029 = vmatmul.bf16.vlgmr.msrb.gmra.mxu3 %v6575_v12  ;;  %v1364_v12 = vperm.slane %v6609_v47, 3 }
 0x377   :  { %v4989_v36 = vor.u32 %v5947_v22, %v4986_v24  ;;  %3067 = vmatpush.bf16.msra.mxu2 %v5245_v33  ;;  %v2837_v4 = vpop.f32.mrf.mxu0 }
 0x378   :  { %3042 = vmatmul.bf16.vlgmr.msra.gmra.mxu0 %v6583_v40  ;;  %v6681_v40 = vmul.f32 %v3095_v60, %v6422_v27  ;;  %v2823_v55 = vadd.f32 %v2822_v63, %v1364_v12 }
 0x379   :  { %3054 = vmatpush.bf16.msra.mxu1 %v4989_v36 }
 0x37a   :  { %3068 = vmatmul.bf16.vlgmr.msra.gmra.mxu2 %v6579_v46  ;;  %v3167_v46 = vadd.f32 %v3166_v61, %v3165_v59  ;;  %v3213_v1 = vmul.f32 %v6681_v40, %v6681_v40  ;;  %v2836_v3 = vadd.f32 %v2835_v54, %v2823_v55 }
 0x37b   :  { %v2850_v6 = vpop.f32.mrf.mxu1  ;;  %v2824_v9 = vpop.f32.mrf.mxu3 }
 0x37c   :  { %3055 = vmatmul.bf16.vlgmr.msra.gmra.mxu1 %v6587_v2  ;;  %v2861_v2 = vpop.f32.mrf.mxu2  ;;  %v3205_v15 = vmul.f32 %v3167_v46, %v6422_v27  ;;  %v2849_v5 = vadd.f32 %v2848_v62, %v2836_v3 }
 0x37e   :  { %v3221_v7 = vsub.f32 %v3205_v15, %v3213_v1  ;;  %v6686_v8 = vadd.f32 %v2861_v2, %v2849_v5 }
 0x380   :  { %v3096_v11 = vsel %vm309_vm0, %v6686_v8, 0.0  ;;  %v3142_v10 = vmul.f32 %v6686_v8, %v6686_v8  ;;  %v3229_v16 = vadd.f32 0.8, %v3221_v7 }
 0x381   :  { %v3097_v14 = vrot.slane %v3096_v11, 4 }
 0x382   :  { %v3168_v17 = vsel %vm309_vm0, %v3142_v10, 0.0  ;;  %6165 = vrsqrt.f32 %v3229_v16  ;;  %vm3261_vm14 = vweird.f32 %v3229_v16 }
 0x383   :  { %v3098_v18 = vadd.f32 %v3097_v14, %v3096_v11  ;;  %v3169_v19 = vrot.slane %v3168_v17, 4 }
 0x384   :  { %v2863_v13 = vpop.f32.mrf.mxu2 }
 0x385   :  { %v3099_v22 = vrot.slane %v3098_v18, 2  ;;  %v3170_v24 = vadd.f32 %v3169_v19, %v3168_v17 }
 0x387   :  { %v3100_v26 = vadd.f32 %v3099_v22, %v3098_v18  ;;  %v3171_v52 = vrot.slane %v3170_v24, 2 }
 0x388   :  { %v6166_v21 = vpop.eup %6165 }
 0x389   :  { %v3101_v28 = vrot.slane %v3100_v26, 1  ;;  %v3172_v29 = vadd.f32 %v3171_v52, %v3170_v24  ;;  %v3256_v35 = vmul.f32 %v6166_v21, %v3229_v16  ;;  %vm3262_vm15 = vweird.f32 %v6166_v21 }
 0x38a   :  { %vm3263_vm3 = vmor %vm3261_vm14, %vm3262_vm15 }
 0x38b   :  { %v3102_v30 = vadd.f32 %v3101_v28, %v3100_v26  ;;  %v3173_v23 = vrot.slane %v3172_v29, 1  ;;  %v3257_v58 = vmul.f32 %v6166_v21, %v3256_v35 }
 0x38d   :  { %v6694_v32 = vmul.f32 %v3102_v30, %v6422_v27  ;;  %v3174_v33 = vadd.f32 %v3173_v23, %v3172_v29  ;;  %v3258_v43 = vmul.f32 0.5, %v3257_v58  ;;  %v6712_v29 = vld [vmem:[#allocation9 + $0x13] sm:$0xff] }
 0x38e   :  { %v1366_v30 = vperm.slane %v6712_v29, 5 }
 0x38f   :  { %v3206_v36 = vmul.f32 %v3174_v33, %v6422_v27  ;;  %v3214_v39 = vmul.f32 %v6694_v32, %v6694_v32  ;;  %v2887_v41 = vpop.f32.mrf.mxu0  ;;  %v3259_v60 = vsub.f32 1.5, %v3258_v43 }
 0x391   :  { %v3222_v42 = vsub.f32 %v3206_v36, %v3214_v39  ;;  %v3260_v55 = vmul.f32 %v6166_v21, %v3259_v60 }
 0x393   :  { %v2900_v31 = vpop.f32.mrf.mxu1  ;;  %v3230_v45 = vadd.f32 0.8, %v3222_v42  ;;  %v2874_v48 = vpop.f32.mrf.mxu3  ;;  %v3264_v9 = vsel %vm3263_vm3, %v6166_v21, %v3260_v55 }
 0x394   :  { %v2875_v38 = vadd.f32 %v2874_v48, %v1365_v44  ;;  %v3324_v16 = vrot.slane %v3264_v9, 6 }
 0x395   :  { %6167 = vrsqrt.f32 %v3230_v45  ;;  %vm3271_vm1 = vweird.f32 %v3230_v45 }
 0x396   :  { %v2888_v34 = vadd.f32 %v2887_v41, %v2875_v38 }
 0x397   :  { %v2913_v49 = vpop.f32.mrf.mxu2  ;;  %v2889_v56 = vpop.f32.mrf.mxu0 }
 0x398   :  { %v2901_v51 = vadd.f32 %v2900_v31, %v2888_v34 }
 0x39a   :  { %v6700_v54 = vadd.f32 %v2913_v49, %v2901_v51 }
 0x39b   :  { %v2902_v57 = vpop.f32.mrf.mxu1  ;;  %v6168_v59 = vpop.eup %6167 }
 0x39c   :  { %v3266_v61 = vmul.f32 %v6168_v59, %v3230_v45  ;;  %v2876_v12 = vpop.f32.mrf.mxu3  ;;  %v3103_v62 = vsel %vm309_vm0, %v6700_v54, 0.0  ;;  %v3143_v46 = vmul.f32 %v6700_v54, %v6700_v54  ;;  %vm3272_vm2 = vweird.f32 %v6168_v59 }
 0x39d   :  { %v3104_v2 = vrot.slane %v3103_v62, 4  ;;  %vm3273_vm4 = vmor %vm3271_vm1, %vm3272_vm2 }
 0x39e   :  { %v3267_v47 = vmul.f32 %v6168_v59, %v3266_v61  ;;  %v3175_v1 = vsel %vm309_vm0, %v3143_v46, 0.0 }
 0x39f   :  { %v2915_v63 = vpop.f32.mrf.mxu2  ;;  %v3105_v3 = vadd.f32 %v3104_v2, %v3103_v62  ;;  %v3176_v4 = vrot.slane %v3175_v1, 4 }
 0x3a0   :  { %v3268_v15 = vmul.f32 0.5, %v3267_v47 }
 0x3a1   :  { %v3106_v6 = vrot.slane %v3105_v3, 2  ;;  %v3177_v7 = vadd.f32 %v3176_v4, %v3175_v1 }
 0x3a2   :  { %v3269_v5 = vsub.f32 1.5, %v3268_v15 }
 0x3a3   :  { %v3107_v10 = vadd.f32 %v3106_v6, %v3105_v3  ;;  %v3178_v13 = vrot.slane %v3177_v7, 2 }
 0x3a4   :  { %v3270_v11 = vmul.f32 %v6168_v59, %v3269_v5 }
 0x3a5   :  { %v3108_v19 = vrot.slane %v3107_v10, 1  ;;  %v3179_v22 = vadd.f32 %v3178_v13, %v3177_v7 }
 0x3a6   :  { %v3274_v14 = vsel %vm3273_vm4, %v6168_v59, %v3270_v11  ;;  %v1367_v11 = vperm.slane %v6712_v29, 6 }
 0x3a7   :  { %v3325_v17 = vrot.slane %v3274_v14, 5  ;;  %v3109_v26 = vadd.f32 %v3108_v19, %v3107_v10  ;;  %v3180_v52 = vrot.slane %v3179_v22, 1 }
 0x3a9   :  { %v3331_v18 = vsel %vm1040_vm6, %v3324_v16, %v3325_v17  ;;  %v6716_v21 = vmul.f32 %v3109_v26, %v6422_v27  ;;  %v3181_v33 = vadd.f32 %v3180_v52, %v3179_v22 }
 0x3aa   :  { %v6710_v24 = vsel %vm309_vm0, %v6677_v53, %v3331_v18 }
 0x3ab   :  { %v3207_v41 = vmul.f32 %v3181_v33, %v6422_v27  ;;  %v3215_v53 = vmul.f32 %v6716_v21, %v6716_v21 }
 0x3ad   :  { %v3223_v45 = vsub.f32 %v3207_v41, %v3215_v53 }
 0x3af   :  { %v2939_v28 = vpop.f32.mrf.mxu0  ;;  %v3231_v51 = vadd.f32 0.8, %v3223_v45 }
 0x3b1   :  { %6169 = vrsqrt.f32 %v3231_v51  ;;  %vm3281_vm5 = vweird.f32 %v3231_v51 }
 0x3b3   :  { %v2952_v23 = vpop.f32.mrf.mxu1  ;;  %v2926_v35 = vpop.f32.mrf.mxu3 }
 0x3b4   :  { %v2927_v36 = vadd.f32 %v2926_v35, %v1366_v30 }
 0x3b6   :  { %v2940_v42 = vadd.f32 %v2939_v28, %v2927_v36 }
 0x3b7   :  { %v2965_v39 = vpop.f32.mrf.mxu2  ;;  %v2941_v44 = vpop.f32.mrf.mxu0 }
 0x3b8   :  { %v2953_v31 = vadd.f32 %v2952_v23, %v2940_v42  ;;  %v6170_v15 = vpop.eup %6169 }
 0x3b9   :  { %v3276_v4 = vmul.f32 %v6170_v15, %v3231_v51  ;;  %vm3282_vm8 = vweird.f32 %v6170_v15 }
 0x3ba   :  { %v6721_v48 = vadd.f32 %v2965_v39, %v2953_v31  ;;  %vm3283_vm11 = vmor %vm3281_vm5, %vm3282_vm8  ;;  %vm3335_vm5 = vcmask 1046534   ;;  %vm3337_vm8 = vcmask 1045508  }
 0x3bb   :  { %v2954_v58 = vpop.f32.mrf.mxu1  ;;  %v2928_v38 = vpop.f32.mrf.mxu3  ;;  %v3277_v13 = vmul.f32 %v6170_v15, %v3276_v4 }
 0x3bc   :  { %v3110_v49 = vsel %vm309_vm0, %v6721_v48, 0.0  ;;  %v3144_v43 = vmul.f32 %v6721_v48, %v6721_v48 }
 0x3bd   :  { %v3111_v56 = vrot.slane %v3110_v49, 4  ;;  %v3278_v19 = vmul.f32 0.5, %v3277_v13 }
 0x3be   :  { %v3182_v57 = vsel %vm309_vm0, %v3144_v43, 0.0 }
 0x3bf   :  { %v2967_v34 = vpop.f32.mrf.mxu2  ;;  %v3112_v59 = vadd.f32 %v3111_v56, %v3110_v49  ;;  %v3183_v60 = vrot.slane %v3182_v57, 4  ;;  %v3279_v23 = vsub.f32 1.5, %v3278_v19 }
 0x3c1   :  { %v3113_v61 = vrot.slane %v3112_v59, 2  ;;  %v3184_v12 = vadd.f32 %v3183_v60, %v3182_v57  ;;  %v3280_v44 = vmul.f32 %v6170_v15, %v3279_v23 }
 0x3c3   :  { %v3114_v47 = vadd.f32 %v3113_v61, %v3112_v59  ;;  %v3185_v62 = vrot.slane %v3184_v12, 2  ;;  %v3284_v51 = vsel %vm3283_vm11, %v6170_v15, %v3280_v44 }
 0x3c5   :  { %v3115_v46 = vrot.slane %v3114_v47, 1  ;;  %v3186_v63 = vadd.f32 %v3185_v62, %v3184_v12  ;;  %v3326_v12 = vrot.slane %v3284_v51, 4 }
 0x3c7   :  { %v3116_v55 = vadd.f32 %v3115_v46, %v3114_v47  ;;  %v3187_v2 = vrot.slane %v3186_v63, 1 }
 0x3c9   :  { %v6729_v1 = vmul.f32 %v3116_v55, %v6422_v27  ;;  %v3188_v3 = vadd.f32 %v3187_v2, %v3186_v63 }
 0x3cb   :  { %v3208_v5 = vmul.f32 %v3188_v3, %v6422_v27  ;;  %v3216_v6 = vmul.f32 %v6729_v1, %v6729_v1 }
 0x3cd   :  { %v3224_v9 = vsub.f32 %v3208_v5, %v3216_v6  ;;  %v1368_v5 = vperm.slane %v6712_v29, 7 }
 0x3cf   :  { %v3232_v14 = vadd.f32 0.8, %v3224_v9 }
 0x3d1   :  { %6171 = vrsqrt.f32 %v3232_v14  ;;  %vm3291_vm9 = vweird.f32 %v3232_v14 }
 0x3d3   :  { %v2991_v7 = vpop.f32.mrf.mxu0 }
 0x3d7   :  { %v3004_v10 = vpop.f32.mrf.mxu1  ;;  %v2978_v16 = vpop.f32.mrf.mxu3 }
 0x3d8   :  { %v2979_v17 = vadd.f32 %v2978_v16, %v1367_v11  ;;  %v6172_v30 = vpop.eup %6171 }
 0x3d9   :  { %v3286_v33 = vmul.f32 %v6172_v30, %v3232_v14  ;;  %vm3292_vm10 = vweird.f32 %v6172_v30 }
 0x3da   :  { %v2992_v22 = vadd.f32 %v2991_v7, %v2979_v17  ;;  %vm3293_vm12 = vmor %vm3291_vm9, %vm3292_vm10  ;;  %vm3339_vm9 = vcmask 1043456  }
 0x3db   :  { %v3017_v18 = vpop.f32.mrf.mxu2  ;;  %v2993_v26 = vpop.f32.mrf.mxu0  ;;  %v3287_v39 = vmul.f32 %v6172_v30, %v3286_v33 }
 0x3dc   :  { %v3005_v52 = vadd.f32 %v3004_v10, %v2992_v22 }
 0x3dd   :  { %v3288_v58 = vmul.f32 0.5, %v3287_v39 }
 0x3de   :  { %v6735_v35 = vadd.f32 %v3017_v18, %v3005_v52 }
 0x3df   :  { %v3006_v28 = vpop.f32.mrf.mxu1  ;;  %v2980_v36 = vpop.f32.mrf.mxu3  ;;  %v3289_v43 = vsub.f32 1.5, %v3288_v58 }
 0x3e0   :  { %v3117_v41 = vsel %vm309_vm0, %v6735_v35, 0.0  ;;  %v3145_v53 = vmul.f32 %v6735_v35, %v6735_v35 }
 0x3e1   :  { %v3118_v31 = vrot.slane %v3117_v41, 4  ;;  %v3290_v57 = vmul.f32 %v6172_v30, %v3289_v43 }
 0x3e2   :  { %v3189_v45 = vsel %vm309_vm0, %v3145_v53, 0.0 }
 0x3e3   :  { %v3019_v42 = vpop.f32.mrf.mxu2  ;;  %v3119_v38 = vadd.f32 %v3118_v31, %v3117_v41  ;;  %v3190_v49 = vrot.slane %v3189_v45, 4  ;;  %v3294_v59 = vsel %vm3293_vm12, %v6172_v30, %v3290_v57 }
 0x3e4   :  { %v3327_v47 = vrot.slane %v3294_v59, 3 }
 0x3e5   :  { %v3120_v34 = vrot.slane %v3119_v38, 2  ;;  %v3191_v56 = vadd.f32 %v3190_v49, %v3189_v45 }
 0x3e6   :  { %v6743_v62 = vsel %vm3333_vm13, %v3326_v12, %v3327_v47 }
 0x3e7   :  { %v3121_v60 = vadd.f32 %v3120_v34, %v3119_v38  ;;  %v3192_v61 = vrot.slane %v3191_v56, 2 }
 0x3e9   :  { %v3122_v46 = vrot.slane %v3121_v60, 1  ;;  %v3193_v63 = vadd.f32 %v3192_v61, %v3191_v56 }
 0x3eb   :  { %v3123_v2 = vadd.f32 %v3122_v46, %v3121_v60  ;;  %v3194_v3 = vrot.slane %v3193_v63, 1 }
 0x3ed   :  { %v6747_v15 = vmul.f32 %v3123_v2, %v6422_v27  ;;  %v3195_v6 = vadd.f32 %v3194_v3, %v3193_v63 }
 0x3ef   :  { %v3209_v14 = vmul.f32 %v3195_v6, %v6422_v27  ;;  %v3217_v16 = vmul.f32 %v6747_v15, %v6747_v15 }
 0x3f1   :  { %v3225_v22 = vsub.f32 %v3209_v14, %v3217_v16 }
 0x3f3   :  { %v3233_v33 = vadd.f32 0.8, %v3225_v22 }
 0x3f5   :  { %v3043_v55 = vpop.f32.mrf.mxu0  ;;  %6173 = vrsqrt.f32 %v3233_v33  ;;  %vm3301_vm14 = vweird.f32 %v3233_v33 }
 0x3f9   :  { %v3056_v4 = vpop.f32.mrf.mxu1  ;;  %v3030_v7 = vpop.f32.mrf.mxu3 }
 0x3fa   :  { %v3031_v9 = vadd.f32 %v3030_v7, %v1368_v5 }
 0x3fb   :  { %v6174_v49 = vpop.eup %6173 }
 0x3fc   :  { %v3044_v13 = vadd.f32 %v3043_v55, %v3031_v9  ;;  %v3296_v57 = vmul.f32 %v6174_v49, %v3233_v33  ;;  %vm3302_vm15 = vweird.f32 %v6174_v49 }
 0x3fd   :  { %v3069_v11 = vpop.f32.mrf.mxu2  ;;  %v3045_v10 = vpop.f32.mrf.mxu0  ;;  %vm3303_vm2 = vmor %vm3301_vm14, %vm3302_vm15 }
 0x3fe   :  { %v3057_v18 = vadd.f32 %v3056_v4, %v3044_v13  ;;  %v3297_v61 = vmul.f32 %v6174_v49, %v3296_v57 }
 0x400   :  { %v6752_v19 = vadd.f32 %v3069_v11, %v3057_v18  ;;  %v3298_v12 = vmul.f32 0.5, %v3297_v61  ;;  %v3073_v11 = vld [vmem:[#allocation9 + $0x1b] sm:$0xff] }
 0x401   :  { %v3058_v17 = vpop.f32.mrf.mxu1  ;;  %v3032_v29 = vpop.f32.mrf.mxu3 }
 0x402   :  { %v3124_v26 = vsel %vm309_vm0, %v6752_v19, 0.0  ;;  %v3146_v52 = vmul.f32 %v6752_v19, %v6752_v19  ;;  %v3299_v46 = vsub.f32 1.5, %v3298_v12 }
 0x403   :  { %v3125_v30 = vrot.slane %v3124_v26, 4 }
 0x404   :  { %v3196_v23 = vsel %vm309_vm0, %v3146_v52, 0.0  ;;  %v3300_v2 = vmul.f32 %v6174_v49, %v3299_v46 }
 0x405   :  { %v3071_v28 = vpop.f32.mrf.mxu2  ;;  %v3126_v36 = vadd.f32 %v3125_v30, %v3124_v26  ;;  %v3197_v39 = vrot.slane %v3196_v23, 4 }
 0x406   :  { %v3304_v5 = vsel %vm3303_vm2, %v6174_v49, %v3300_v2  ;;  %v3074_v49 = vld [vmem:[#allocation9 + $0x23] sm:$0xff] }
 0x407   :  { %v3127_v41 = vrot.slane %v3126_v36, 2  ;;  %v3198_v53 = vadd.f32 %v3197_v39, %v3196_v23  ;;  %v3328_v7 = vrot.slane %v3304_v5, 2 }
 0x409   :  { %v3128_v42 = vadd.f32 %v3127_v41, %v3126_v36  ;;  %v3199_v44 = vrot.slane %v3198_v53, 2 }
 0x40b   :  { %v3129_v31 = vrot.slane %v3128_v42, 1  ;;  %v3200_v58 = vadd.f32 %v3199_v44, %v3198_v53 }
 0x40d   :  { %v3130_v45 = vadd.f32 %v3129_v31, %v3128_v42  ;;  %v3201_v38 = vrot.slane %v3200_v58, 1 }
 0x40f   :  { %v3138_v43 = vmul.f32 %v3130_v45, %v6422_v27  ;;  %v3202_v34 = vadd.f32 %v3201_v38, %v3200_v58 }
 0x411   :  { %v3210_v56 = vmul.f32 %v3202_v34, %v6422_v27  ;;  %v3218_v51 = vmul.f32 %v3138_v43, %v3138_v43 }
 0x413   :  { %v3226_v59 = vsub.f32 %v3210_v56, %v3218_v51 }
 0x415   :  { %v3234_v60 = vadd.f32 0.8, %v3226_v59 }
 0x417   :  { %6175 = vrsqrt.f32 %v3234_v60  ;;  %vm3311_vm3 = vweird.f32 %v3234_v60 }
 0x41d   :  { %v6176_v47 = vpop.eup %6175 }
 0x41e   :  { %v3306_v63 = vmul.f32 %v6176_v47, %v3234_v60  ;;  %vm3312_vm1 = vweird.f32 %v6176_v47 }
 0x41f   :  { %vm3313_vm4 = vmor %vm3311_vm3, %vm3312_vm1 }
 0x420   :  { %v3307_v55 = vmul.f32 %v6176_v47, %v3306_v63 }
 0x422   :  { %v3308_v3 = vmul.f32 0.5, %v3307_v55 }
 0x424   :  { %v3309_v4 = vsub.f32 1.5, %v3308_v3 }
 0x426   :  { %v3310_v27 = vmul.f32 %v6176_v47, %v3309_v4 }
 0x428   :  { %v3314_v6 = vsel %vm3313_vm4, %v6176_v47, %v3310_v27 }
 0x429   :  { %v3329_v9 = vrot.slane %v3314_v6, 1 }
 0x42b   :  { %v3336_v10 = vsel %vm3335_vm5, %v3328_v7, %v3329_v9 }
 0x42c   :  { %v3338_v13 = vsel %vm3337_vm8, %v6743_v62, %v3336_v10 }
 0x42d   :  { %v3340_v14 = vsel %vm3339_vm9, %v6710_v24, %v3338_v13 }
 0x42e   :  { %v3342_v16 = vmul.f32 %v3340_v14, %v3073_v11 }
 0x430   :  { %v3344_v17 = vperm.slane %v3342_v16, 0  ;;  %v3345_v18 = vperm.slane %v3342_v16, 1  ;;  %v3346_v22 = vperm.slane %v3342_v16, 2  ;;  %v3347_v29 = vperm.slane %v3342_v16, 3 }
 0x431   :  { %v3348_v26 = vperm.slane %v3342_v16, 4  ;;  %v3349_v52 = vperm.slane %v3342_v16, 5  ;;  %v3350_v28 = vperm.slane %v3342_v16, 6  ;;  %v3351_v30 = vperm.slane %v3342_v16, 7 }
 0x432   :  { %v3360_v23 = vmul.f32 %v3344_v17, %v6625_v25  ;;  %v3361_v33 = vmul.f32 %v3345_v18, %v6645_v0  ;;  %v3362_v36 = vmul.f32 %v3346_v22, %v6681_v40  ;;  %v3363_v62 = vmul.f32 %v3347_v29, %v6694_v32 }
 0x433   :  { %v3364_v39 = vmul.f32 %v3348_v26, %v6716_v21  ;;  %v3365_v24 = vmul.f32 %v3349_v52, %v6729_v1  ;;  %v3366_v41 = vmul.f32 %v3350_v28, %v6747_v15  ;;  %v3367_v53 = vmul.f32 %v3351_v30, %v3138_v43 }
 0x434   :  { %v3376_v42 = vrot.slane %v3361_v33, 7  ;;  %v3377_v44 = vrot.slane %v3362_v36, 6  ;;  %v3378_v31 = vrot.slane %v3363_v62, 5  ;;  %v3392_v58 = vmul.f32 %v3344_v17, %v6612_v37 }
 0x435   :  { %v3379_v45 = vrot.slane %v3364_v39, 4  ;;  %v3380_v25 = vrot.slane %v3365_v24, 3  ;;  %v3381_v38 = vrot.slane %v3366_v41, 2  ;;  %v3382_v0 = vrot.slane %v3367_v53, 1 }
 0x436   :  { %v3383_v40 = vsel %vm380_vm7, %v3360_v23, %v3376_v42  ;;  %v3384_v32 = vsel %vm1040_vm6, %v3377_v44, %v3378_v31  ;;  %v3393_v21 = vmul.f32 %v3345_v18, %v6630_v50  ;;  %v3394_v1 = vmul.f32 %v3346_v22, %v6660_v20 }
 0x437   :  { %v3385_v15 = vsel %vm309_vm0, %v3383_v40, %v3384_v32  ;;  %v3386_v43 = vsel %vm3333_vm13, %v3379_v45, %v3380_v25  ;;  %v3387_v34 = vsel %vm3335_vm5, %v3381_v38, %v3382_v0  ;;  %v3395_v37 = vmul.f32 %v3347_v29, %v6686_v8 }
 0x438   :  { %v3388_v56 = vsel %vm3337_vm8, %v3386_v43, %v3387_v34  ;;  %v3396_v51 = vmul.f32 %v3348_v26, %v6700_v54  ;;  %v3397_v57 = vmul.f32 %v3349_v52, %v6721_v48  ;;  %v3398_v20 = vmul.f32 %v3350_v28, %v6735_v35 }
 0x439   :  { %v3389_v59 = vsel %vm3339_vm9, %v3385_v15, %v3388_v56  ;;  %v3399_v60 = vmul.f32 %v3351_v30, %v6752_v19 }
 0x43a   :  { %v3391_v50 = vsub.f32 %v3074_v49, %v3389_v59 }
 0x43c   :  { %v3401_v61 = vperm.slane %v3391_v50, 0  ;;  %v3402_v12 = vperm.slane %v3391_v50, 1  ;;  %v3403_v47 = vperm.slane %v3391_v50, 2  ;;  %v3404_v46 = vperm.slane %v3391_v50, 3 }
 0x43d   :  { %v3405_v63 = vperm.slane %v3391_v50, 4  ;;  %v3406_v55 = vperm.slane %v3391_v50, 5  ;;  %v3407_v8 = vperm.slane %v3391_v50, 6  ;;  %v3408_v2 = vperm.slane %v3391_v50, 7 }
 0x43e   :  { %v3417_v3 = vadd.f32 %v3401_v61, %v3392_v58  ;;  %v3418_v4 = vadd.f32 %v3402_v12, %v3393_v21  ;;  %v3419_v54 = vadd.f32 %v3403_v47, %v3394_v1  ;;  %v3420_v5 = vadd.f32 %v3404_v46, %v3395_v37 }
 0x43f   :  { %v3421_v48 = vadd.f32 %v3405_v63, %v3396_v51  ;;  %v3422_v27 = vadd.f32 %v3406_v55, %v3397_v57  ;;  %v3423_v6 = vadd.f32 %v3407_v8, %v3398_v20  ;;  %v3424_v7 = vadd.f32 %v3408_v2, %v3399_v60 }
 0x440   :  { %v3425_v9 = vmul.f32 0.2, %v3417_v3  ;;  %v3426_v35 = vmul.f32 0.2, %v3418_v4  ;;  %v3427_v11 = vmul.f32 0.2, %v3419_v54 }
 0x441   :  { %v3428_v19 = vmul.f32 0.2, %v3420_v5  ;;  %v3429_v10 = vmul.f32 0.2, %v3421_v48  ;;  %v3430_v13 = vmul.f32 0.2, %v3422_v27 }
 0x442   :  { %v3431_v14 = vmul.f32 0.2, %v3423_v6  ;;  %v3432_v16 = vmul.f32 0.2, %v3424_v7  ;;  %v6788_v17 = vmax.f32 %v3417_v3, %v3425_v9  ;;  %v6790_v18 = vmax.f32 %v3418_v4, %v3426_v35 }
 0x443   :  { %v6792_v22 = vmax.f32 %v3419_v54, %v3427_v11  ;;  %v6794_v29 = vmax.f32 %v3420_v5, %v3428_v19  ;;  %v6796_v26 = vmax.f32 %v3421_v48, %v3429_v10  ;;  %v6798_v52 = vmax.f32 %v3422_v27, %v3430_v13 }
 0x444   :  { %v6800_v28 = vmax.f32 %v3423_v6, %v3431_v14  ;;  %v6802_v30 = vmax.f32 %v3424_v7, %v3432_v16 }
 0x445   :  { %6307 = dma.done.wait [#allocation4 + $0x1], 8192 }
 0x446   :  { %6308 = vsyncadd [#allocation4 + $0x1], 4294959104  ;;  %v6079_v23 = vld [vmem:[#allocation3 + $0x38] sm:$0xff]  ;;  %v6078_v39 = vld [vmem:[#allocation3 + $0x30] sm:$0xff]  ;;  %v3574_v46 = vpack.c.bf16 %v6788_v17, %v6788_v17  ;;  %v3577_v55 = vpack.c.bf16 %v6794_v29, %v6794_v29  ;;  %v3575_v2 = vpack.c.bf16 %v6790_v18, %v6790_v18  ;;  %v3576_v54 = vpack.c.bf16 %v6792_v22, %v6792_v22 }
 0x447   :  { %v6087_v33 = vld [vmem:[#allocation3 + $0x78] sm:$0xff]  ;;  %3969 = vmatpush.bf16.msra.mxu3 %v6079_v23  ;;  %v6086_v24 = vld [vmem:[#allocation3 + $0x70] sm:$0xff]  ;;  %v6077_v42 = vld [vmem:[#allocation3 + $0x28] sm:$0xff] }
 0x448   :  { %v6103_v36 = vld [vmem:[#allocation3 + $0xf8] sm:$0xff]  ;;  %3982 = vmatpush.bf16.msrb.mxu0 %v6087_v33  ;;  %v6102_v41 = vld [vmem:[#allocation3 + $0xf0] sm:$0xff]  ;;  %v6085_v44 = vld [vmem:[#allocation3 + $0x68] sm:$0xff] }
 0x449   :  { %v6095_v62 = vld [vmem:[#allocation3 + $0xb8] sm:$0xff]  ;;  %4008 = vmatpush.bf16.msrb.mxu2 %v6103_v36  ;;  %v6094_v53 = vld [vmem:[#allocation3 + $0xb0] sm:$0xff]  ;;  %v6101_v31 = vld [vmem:[#allocation3 + $0xe8] sm:$0xff] }
 0x44a   :  { %3995 = vmatpush.bf16.msrb.mxu1 %v6095_v62  ;;  %v6093_v58 = vld [vmem:[#allocation3 + $0xa8] sm:$0xff]  ;;  %v6076_v45 = vld [vmem:[#allocation3 + $0x20] sm:$0xff]  ;;  %v6075_v40 = vld [vmem:[#allocation3 + $0x18] sm:$0xff] }
 0x44b   :  { %3970 = vmatpush.bf16.msra.mxu3 %v6078_v39  ;;  %v6084_v25 = vld [vmem:[#allocation3 + $0x60] sm:$0xff]  ;;  %v6083_v32 = vld [vmem:[#allocation3 + $0x58] sm:$0xff]  ;;  %v6074_v49 = vld [vmem:[#allocation3 + $0x10] sm:$0xff] }
 0x44c   :  { %3983 = vmatpush.bf16.msrb.mxu0 %v6086_v24  ;;  %v6100_v38 = vld [vmem:[#allocation3 + $0xe0] sm:$0xff]  ;;  %v6099_v21 = vld [vmem:[#allocation3 + $0xd8] sm:$0xff]  ;;  %v6082_v15 = vld [vmem:[#allocation3 + $0x50] sm:$0xff] }
 0x44d   :  { %4009 = vmatpush.bf16.msrb.mxu2 %v6102_v41  ;;  %v6092_v0 = vld [vmem:[#allocation3 + $0xa0] sm:$0xff]  ;;  %v6091_v1 = vld [vmem:[#allocation3 + $0x98] sm:$0xff]  ;;  %v6098_v43 = vld [vmem:[#allocation3 + $0xd0] sm:$0xff] }
 0x44e   :  { %3996 = vmatpush.bf16.msrb.mxu1 %v6094_v53  ;;  %v6090_v34 = vld [vmem:[#allocation3 + $0x90] sm:$0xff]  ;;  %v6073_v37 = vld [vmem:[#allocation3 + $0x8] sm:$0xff]  ;;  %v6072_v59 = vld [vmem:[#allocation3] sm:$0xff] }
 0x44f   :  { %3971 = vmatpush.bf16.msra.mxu3 %v6077_v42  ;;  %v6081_v56 = vld [vmem:[#allocation3 + $0x48] sm:$0xff]  ;;  %v6080_v50 = vld [vmem:[#allocation3 + $0x40] sm:$0xff]  ;;  %v6111_v60 = vld [vmem:[#allocation3 + $0x138] sm:$0xff]  ;;  %v3578_v42 = vpack.c.bf16 %v6796_v26, %v6796_v26 }
 0x450   :  { %3984 = vmatpush.bf16.msrb.mxu0 %v6085_v44  ;;  %v6097_v51 = vld [vmem:[#allocation3 + $0xc8] sm:$0xff]  ;;  %v6096_v20 = vld [vmem:[#allocation3 + $0xc0] sm:$0xff]  ;;  %v6119_v61 = vld [vmem:[#allocation3 + $0x178] sm:$0xff]  ;;  %v3579_v44 = vpack.c.bf16 %v6798_v52, %v6798_v52 }
 0x451   :  { %4010 = vmatpush.bf16.msrb.mxu2 %v6101_v31  ;;  %v6089_v57 = vld [vmem:[#allocation3 + $0x88] sm:$0xff]  ;;  %v6135_v12 = vld [vmem:[#allocation3 + $0x1f8] sm:$0xff]  ;;  %v6088_v47 = vld [vmem:[#allocation3 + $0x80] sm:$0xff]  ;;  %v3581_v31 = vpack.c.bf16 %v6802_v30, %v6802_v30 }
 0x452   :  { %3997 = vmatpush.bf16.msrb.mxu1 %v6093_v58  ;;  %v6127_v63 = vld [vmem:[#allocation3 + $0x1b8] sm:$0xff]  ;;  %v6110_v8 = vld [vmem:[#allocation3 + $0x130] sm:$0xff]  ;;  %v6109_v48 = vld [vmem:[#allocation3 + $0x128] sm:$0xff]  ;;  %v3580_v58 = vpack.c.bf16 %v6800_v28, %v6800_v28 }
 0x453   :  { %3972 = vmatpush.bf16.msra.mxu3 %v6076_v45  ;;  %v6118_v3 = vld [vmem:[#allocation3 + $0x170] sm:$0xff]  ;;  %v6117_v27 = vld [vmem:[#allocation3 + $0x168] sm:$0xff]  ;;  %v6108_v9 = vld [vmem:[#allocation3 + $0x120] sm:$0xff] }
 0x454   :  { %3985 = vmatpush.bf16.msrb.mxu0 %v6084_v25  ;;  %v6134_v4 = vld [vmem:[#allocation3 + $0x1f0] sm:$0xff]  ;;  %v6133_v6 = vld [vmem:[#allocation3 + $0x1e8] sm:$0xff]  ;;  %v6116_v35 = vld [vmem:[#allocation3 + $0x160] sm:$0xff] }
 0x455   :  { %4011 = vmatpush.bf16.msrb.mxu2 %v6100_v38  ;;  %v6126_v5 = vld [vmem:[#allocation3 + $0x1b0] sm:$0xff]  ;;  %v6125_v7 = vld [vmem:[#allocation3 + $0x1a8] sm:$0xff]  ;;  %v6132_v11 = vld [vmem:[#allocation3 + $0x1e0] sm:$0xff] }
 0x456   :  { %3998 = vmatpush.bf16.msrb.mxu1 %v6092_v0  ;;  %v6124_v19 = vld [vmem:[#allocation3 + $0x1a0] sm:$0xff]  ;;  %v6107_v10 = vld [vmem:[#allocation3 + $0x118] sm:$0xff]  ;;  %v6106_v17 = vld [vmem:[#allocation3 + $0x110] sm:$0xff] }
 0x457   :  { %3973 = vmatpush.bf16.msra.mxu3 %v6075_v40  ;;  %v6115_v13 = vld [vmem:[#allocation3 + $0x158] sm:$0xff]  ;;  %v6114_v18 = vld [vmem:[#allocation3 + $0x150] sm:$0xff]  ;;  %v6105_v23 = vld [vmem:[#allocation3 + $0x108] sm:$0xff] }
 0x458   :  { %3986 = vmatpush.bf16.msrb.mxu0 %v6083_v32  ;;  %v6131_v14 = vld [vmem:[#allocation3 + $0x1d8] sm:$0xff]  ;;  %v6130_v22 = vld [vmem:[#allocation3 + $0x1d0] sm:$0xff]  ;;  %v6113_v33 = vld [vmem:[#allocation3 + $0x148] sm:$0xff] }
 0x459   :  { %4012 = vmatpush.bf16.msrb.mxu2 %v6099_v21  ;;  %v6123_v16 = vld [vmem:[#allocation3 + $0x198] sm:$0xff]  ;;  %v6122_v29 = vld [vmem:[#allocation3 + $0x190] sm:$0xff]  ;;  %v6129_v36 = vld [vmem:[#allocation3 + $0x1c8] sm:$0xff] }
 0x45a   :  { %3999 = vmatpush.bf16.msrb.mxu1 %v6091_v1  ;;  %v6121_v62 = vld [vmem:[#allocation3 + $0x188] sm:$0xff]  ;;  %v6104_v39 = vld [vmem:[#allocation3 + $0x100] sm:$0xff] }
 0x45b   :  { %3974 = vmatpush.bf16.msra.mxu3 %v6074_v49  ;;  %v6112_v24 = vld [vmem:[#allocation3 + $0x140] sm:$0xff]  ;;  %v6178_v21 = vld [vmem:[#allocation9 + $0x2b] ss:$0 sm:$0xff] }
 0x45c   :  { %3987 = vmatpush.bf16.msrb.mxu0 %v6082_v15  ;;  %v6128_v41 = vld [vmem:[#allocation3 + $0x1c0] sm:$0xff] }
 0x45d   :  { %4013 = vmatpush.bf16.msrb.mxu2 %v6098_v43  ;;  %v6120_v53 = vld [vmem:[#allocation3 + $0x180] sm:$0xff] }
 0x45e   :  { %4000 = vmatpush.bf16.msrb.mxu1 %v6090_v34 }
 0x45f   :  { %3975 = vmatpush.bf16.msra.mxu3 %v6073_v37 }
 0x460   :  { %3988 = vmatpush.bf16.msrb.mxu0 %v6081_v56 }
 0x461   :  { %4014 = vmatpush.bf16.msrb.mxu2 %v6097_v51 }
 0x462   :  { %4001 = vmatpush.bf16.msrb.mxu1 %v6089_v57 }
 0x463   :  { %3976 = vmatpush.bf16.msra.mxu3 %v6072_v59 }
 0x464   :  { %3989 = vmatpush.bf16.msrb.mxu0 %v6080_v50 }
 0x465   :  { %4015 = vmatpush.bf16.msrb.mxu2 %v6096_v20 }
 0x466   :  { %4002 = vmatpush.bf16.msrb.mxu1 %v6088_v47  ;;  %3977 = vmatmul.bf16.vlgmr.msra.gmra.mxu3 %v3574_v46 }
 0x467   :  { %4021 = vmatpush.bf16.msrb.mxu3 %v6111_v60  ;;  %3990 = vmatmul.bf16.vlgmr.msrb.gmra.mxu0 %v3575_v2 }
 0x468   :  { %4034 = vmatpush.bf16.msra.mxu0 %v6119_v61  ;;  %4016 = vmatmul.bf16.vlgmr.msrb.gmra.mxu2 %v3577_v55 }
 0x469   :  { %4060 = vmatpush.bf16.msra.mxu2 %v6135_v12  ;;  %4003 = vmatmul.bf16.vlgmr.msrb.gmra.mxu1 %v3576_v54 }
 0x46a   :  { %4047 = vmatpush.bf16.msra.mxu1 %v6127_v63 }
 0x46b   :  { %4022 = vmatpush.bf16.msrb.mxu3 %v6110_v8 }
 0x46c   :  { %4035 = vmatpush.bf16.msra.mxu0 %v6118_v3 }
 0x46d   :  { %4061 = vmatpush.bf16.msra.mxu2 %v6134_v4 }
 0x46e   :  { %4048 = vmatpush.bf16.msra.mxu1 %v6126_v5 }
 0x46f   :  { %4023 = vmatpush.bf16.msrb.mxu3 %v6109_v48 }
 0x470   :  { %4036 = vmatpush.bf16.msra.mxu0 %v6117_v27 }
 0x471   :  { %4062 = vmatpush.bf16.msra.mxu2 %v6133_v6 }
 0x472   :  { %4049 = vmatpush.bf16.msra.mxu1 %v6125_v7 }
 0x473   :  { %4024 = vmatpush.bf16.msrb.mxu3 %v6108_v9 }
 0x474   :  { %4037 = vmatpush.bf16.msra.mxu0 %v6116_v35 }
 0x475   :  { %4063 = vmatpush.bf16.msra.mxu2 %v6132_v11 }
 0x476   :  { %4050 = vmatpush.bf16.msra.mxu1 %v6124_v19 }
 0x477   :  { %4025 = vmatpush.bf16.msrb.mxu3 %v6107_v10 }
 0x478   :  { %4038 = vmatpush.bf16.msra.mxu0 %v6115_v13 }
 0x479   :  { %4064 = vmatpush.bf16.msra.mxu2 %v6131_v14 }
 0x47a   :  { %4051 = vmatpush.bf16.msra.mxu1 %v6123_v16 }
 0x47b   :  { %4026 = vmatpush.bf16.msrb.mxu3 %v6106_v17 }
 0x47c   :  { %4039 = vmatpush.bf16.msra.mxu0 %v6114_v18 }
 0x47d   :  { %4065 = vmatpush.bf16.msra.mxu2 %v6130_v22 }
 0x47e   :  { %4052 = vmatpush.bf16.msra.mxu1 %v6122_v29 }
 0x47f   :  { %4027 = vmatpush.bf16.msrb.mxu3 %v6105_v23 }
 0x480   :  { %4040 = vmatpush.bf16.msra.mxu0 %v6113_v33 }
 0x481   :  { %4066 = vmatpush.bf16.msra.mxu2 %v6129_v36 }
 0x482   :  { %4053 = vmatpush.bf16.msra.mxu1 %v6121_v62 }
 0x483   :  { %4028 = vmatpush.bf16.msrb.mxu3 %v6104_v39 }
 0x484   :  { %4041 = vmatpush.bf16.msra.mxu0 %v6112_v24 }
 0x485   :  { %4067 = vmatpush.bf16.msra.mxu2 %v6128_v41 }
 0x486   :  { %4054 = vmatpush.bf16.msra.mxu1 %v6120_v53  ;;  %4029 = vmatmul.bf16.vlgmr.msrb.gmra.mxu3 %v3578_v42 }
 0x487   :  { %4042 = vmatmul.bf16.vlgmr.msra.gmra.mxu0 %v3579_v44 }
 0x488   :  { %4068 = vmatmul.bf16.vlgmr.msra.gmra.mxu2 %v3581_v31 }
 0x489   :  { %4055 = vmatmul.bf16.vlgmr.msra.gmra.mxu1 %v3580_v58 }
 0x4e4   :  { %v3991_v45 = vpop.f32.mrf.mxu0 }
 0x4e6   :  { %v4004_v25 = vpop.f32.mrf.mxu1 }
 0x4e9   :  { %v3978_v26 = vpop.f32.mrf.mxu3 }
 0x4ea   :  { %v3979_v30 = vadd.f32 %v6178_v21, %v3978_v26 }
 0x4eb   :  { %v4017_v38 = vpop.f32.mrf.mxu2 }
 0x4ec   :  { %v3993_v0 = vpop.f32.mrf.mxu0  ;;  %v3992_v1 = vadd.f32 %v3991_v45, %v3979_v30 }
 0x4ee   :  { %v4006_v40 = vpop.f32.mrf.mxu1  ;;  %v4005_v49 = vadd.f32 %v4004_v25, %v3992_v1 }
 0x4f0   :  { %v4018_v28 = vadd.f32 %v4017_v38, %v4005_v49 }
 0x4f1   :  { %v3980_v52 = vpop.f32.mrf.mxu3 }
 0x4f3   :  { %v4019_v32 = vpop.f32.mrf.mxu2 }
 0x504   :  { %v4043_v15 = vpop.f32.mrf.mxu0 }
 0x506   :  { %v4056_v43 = vpop.f32.mrf.mxu1 }
 0x509   :  { %v4030_v34 = vpop.f32.mrf.mxu3 }
 0x50a   :  { %v4031_v37 = vadd.f32 %v4030_v34, %v4018_v28 }
 0x50b   :  { %v4069_v56 = vpop.f32.mrf.mxu2 }
 0x50c   :  { %v4044_v51 = vadd.f32 %v4043_v15, %v4031_v37  ;;  %v4045_v57 = vpop.f32.mrf.mxu0 }
 0x50e   :  { %v4057_v59 = vadd.f32 %v4056_v43, %v4044_v51  ;;  %v4058_v50 = vpop.f32.mrf.mxu1 }
 0x510   :  { %v4070_v20 = vadd.f32 %v4069_v56, %v4057_v59 }
 0x511   :  { %v4032_v60 = vpop.f32.mrf.mxu3 }
 0x512   :  { %6179 = vtanh.f32 %v4070_v20 }
 0x513   :  { %v4071_v61 = vpop.f32.mrf.mxu2 }
 0x518   :  { %v6180_v12 = vpop.eup %6179 }
 0x519   :  { %4074 = vst [vmem:[%s6830_s7] sm:$0x3] %v6180_v12 }
 0x51a   :  { %4079 = vsyncpa [#allocation6], 1 }
 0x51b   :  { %4080 = vsyncpa [#allocation8], 1 }
 0x51c   :  { %4081 = vsyncmov [#allocation4] }
 0x51f   :  { %s4082_s2 = vpop.sfrf %4081 }
 0x520   :  { %p5726_p0 = scmp.ne.s32.totalorder %s4082_s2, 0 }
 0x522   :  { %4086 = shalt.err (%p5726_p0)  }
 0x523   :  { %4088 = vsyncmov [#allocation4 + $0x1] }
 0x526   :  { %s4089_s19 = vpop.sfrf %4088 }
 0x527   :  { %p5727_p1 = scmp.ne.s32.totalorder %s4089_s19, 0 }
 0x529   :  { %4093 = shalt.err (%p5727_p1)  }

</bundles_post_ra>
